<compile_context>
chip_gen: v6e
topology: v6e:2x2x1
jax: 0.10.0
libtpu: 0.0.40
codegen_flags: <defaults>
</compile_context>

<pallas_src>
import functools

import jax
import jax.numpy as jnp
from jax.experimental import pallas as pl
from jax.experimental.pallas import tpu as pltpu

EPS = 1e-5
PADL = 8   # left margin in the pad scratch so the interior store is sublane-aligned


# ---------------------------------------------------------------------------
# Pallas kernel: one full Bottleneck block per batch element (grid over N).
# ---------------------------------------------------------------------------
def bottleneck_kernel(x_ref, w1_ref, b1_ref, w2_ref, b2_ref, w3_ref, b3_ref,
                      out_ref, yp_ref, col_ref, *, H, W):
    HW = H * W
    Cmid = w1_ref.shape[1]

    x = x_ref[0]                                               # (HW, Cin) bf16

    # ---- conv1 (1x1, bn1 scale folded into w1) + bias + ReLU -> bf16 ----
    y1 = jnp.dot(x, w1_ref[...], preferred_element_type=jnp.float32)
    y1 = jnp.maximum(y1 + b1_ref[...], 0.0).astype(jnp.bfloat16)   # (HW, Cmid)

    # ---- zero-pad (pad=1) into the bf16 VMEM scratch for the 3x3 conv.
    # Only the halo strips are re-zeroed each step (interior is overwritten).
    # NOTE: the 3x3 windows below read rows [0, H+2) and columns
    # [PADL-1, PADL+W+1) ONLY; columns 0..PADL-2 are never initialized and
    # never read -- keep window bounds tied to PADL if this code changes.
    Wp = yp_ref.shape[1]
    zrow = jnp.zeros((1, Wp, Cmid), jnp.bfloat16)
    zcol = jnp.zeros((H + 2, 1, Cmid), jnp.bfloat16)
    yp_ref[0:1, :, :] = zrow                                   # top halo row
    yp_ref[H + 1:H + 2, :, :] = zrow                           # bottom halo row
    yp_ref[:, PADL - 1:PADL, :] = zcol                         # left halo col
    yp_ref[:, PADL + W:PADL + W + 1, :] = zcol                 # right halo col
    yp_ref[pl.ds(1, H), pl.ds(PADL, W), :] = y1.reshape(H, W, Cmid)

    # ---- im2col: fuse the 9 taps into the matmul K dimension.
    # Windows are produced by slicing yp_ref directly (cheap vld's, no full
    # slab materialization) and stored 3D (no per-window reshape).
    def window(k):
        dy, dx = k // 3, k % 3
        return yp_ref[dy:dy + H, PADL - 1 + dx:PADL - 1 + dx + W, :]   # (H,W,Cmid) bf16

    if Cmid % 128 != 0:
        # lane-align col writes: store taps in pairs -> 2*Cmid-wide aligned stores
        for kp in range(4):
            k = 2 * kp
            w01 = jnp.concatenate([window(k), window(k + 1)], axis=-1)
            col_ref[:, :, k * Cmid:(k + 2) * Cmid] = w01
        col_ref[:, :, 8 * Cmid:9 * Cmid] = window(8)
    else:
        for k in range(9):
            col_ref[:, :, k * Cmid:(k + 1) * Cmid] = window(k)

    # ---- conv2 (3x3 as ONE MXU dot, K = 9*Cmid, bn2 folded) + bias + ReLU ----
    col = col_ref[...].reshape(HW, 9 * Cmid)
    y2 = jnp.dot(col, w2_ref[...], preferred_element_type=jnp.float32)
    y2 = jnp.maximum(y2 + b2_ref[...], 0.0).astype(jnp.bfloat16)   # (HW, Cmid)

    # ---- conv3 (1x1, bn3 folded) + bias + residual + ReLU -> bf16 output ----
    # NOTE: the residual uses the bf16-quantized x (same block feeds conv1),
    # trading ~8 mantissa bits on the skip path for shipping the input once.
    y3 = jnp.dot(y2, w3_ref[...], preferred_element_type=jnp.float32)
    y3 = y3 + b3_ref[...] + x.astype(jnp.float32)
    out_ref[0] = jnp.maximum(y3, 0.0).astype(jnp.bfloat16)        # (HW, Cout)


# ---------------------------------------------------------------------------
# Wrapper: BN folding + layout plumbing (plain JAX glue), then one pallas_call.
# ---------------------------------------------------------------------------
@jax.jit
def bottleneck_pallas(x_nchw, params):
    N, Cin, H, W = x_nchw.shape
    Cmid = params["w1"].shape[0]          # width
    Cout = params["w3"].shape[0]          # planes * expansion
    assert Cout == Cin, "downsample=None requires inplanes == planes * 4"
    HW = H * W

    # single bf16 input slab, channels-last, spatial flattened
    x = jnp.transpose(x_nchw, (0, 2, 3, 1)).reshape(N, HW, Cin).astype(jnp.bfloat16)

    # Fold BatchNorm (eval mode) into conv weights; keep biases in f32.
    s1 = params["g1"] * jax.lax.rsqrt(params["v1"] + EPS)
    s2 = params["g2"] * jax.lax.rsqrt(params["v2"] + EPS)
    s3 = params["g3"] * jax.lax.rsqrt(params["v3"] + EPS)

    w1 = (params["w1"][:, :, 0, 0].T * s1[None, :]).astype(jnp.bfloat16)   # (Cin, Cmid)
    w2 = (jnp.transpose(params["w2"], (2, 3, 1, 0)).reshape(9 * Cmid, Cmid)
          * s2[None, :]).astype(jnp.bfloat16)                              # (9*Cmid, Cmid)
    w3 = (params["w3"][:, :, 0, 0].T * s3[None, :]).astype(jnp.bfloat16)   # (Cmid, Cout)

    b1 = (params["b1"] - params["m1"] * s1).reshape(1, Cmid).astype(jnp.float32)
    b2 = (params["b2"] - params["m2"] * s2).reshape(1, Cmid).astype(jnp.float32)
    b3 = (params["b3"] - params["m3"] * s3).reshape(1, Cout).astype(jnp.float32)

    # Right-size the VMEM limit from the actual footprint (scratch + 2x
    # double-buffered in/out blocks + weights) with ~2x headroom.
    bpe = 2  # bf16
    scratch_bytes = ((H + 2) * (W + PADL + 1) * Cmid + HW * 9 * Cmid) * bpe
    io_bytes = 2 * (HW * Cin + HW * Cout) * bpe                    # double buffered
    w_bytes = 2 * (Cin * Cmid + 9 * Cmid * Cmid + Cmid * Cout) * bpe \
              + 2 * (2 * Cmid + Cout) * 4
    vmem_limit = int(min(100 * 2**20,
                         max(16 * 2**20, 2 * (scratch_bytes + io_bytes + w_bytes))))

    flops = 2 * N * HW * (Cin * Cmid + 9 * Cmid * Cmid + Cmid * Cout)
    bytes_accessed = N * HW * (Cin + Cout) * bpe \
                     + (Cin * Cmid + 9 * Cmid * Cmid + Cmid * Cout) * bpe
    cost = pl.CostEstimate(flops=flops, transcendentals=0,
                           bytes_accessed=bytes_accessed)

    out_flat = pl.pallas_call(
        functools.partial(bottleneck_kernel, H=H, W=W),
        out_shape=jax.ShapeDtypeStruct((N, HW, Cout), jnp.bfloat16),
        grid_spec=pltpu.PrefetchScalarGridSpec(
            num_scalar_prefetch=0,
            grid=(N,),
            in_specs=[
                pl.BlockSpec((1, HW, Cin), lambda n: (n, 0, 0)),    # x (also identity)
                pl.BlockSpec((Cin, Cmid), lambda n: (0, 0)),        # w1 (bn1-folded)
                pl.BlockSpec((1, Cmid), lambda n: (0, 0)),          # b1
                pl.BlockSpec((9 * Cmid, Cmid), lambda n: (0, 0)),   # w2 (bn2-folded)
                pl.BlockSpec((1, Cmid), lambda n: (0, 0)),          # b2
                pl.BlockSpec((Cmid, Cout), lambda n: (0, 0)),       # w3 (bn3-folded)
                pl.BlockSpec((1, Cout), lambda n: (0, 0)),          # b3
            ],
            out_specs=pl.BlockSpec((1, HW, Cout), lambda n: (n, 0, 0)),
            scratch_shapes=[
                pltpu.VMEM((H + 2, W + PADL + 1, Cmid), jnp.bfloat16),  # padded y1
                pltpu.VMEM((H, W, 9 * Cmid), jnp.bfloat16),             # im2col slab
            ],
        ),
        compiler_params=pltpu.CompilerParams(
            dimension_semantics=("parallel",),
            vmem_limit_bytes=vmem_limit,
        ),
        cost_estimate=cost,
    )(x, w1, b1, w2, b2, w3, b3)

    out = out_flat.astype(jnp.float32).reshape(N, H, W, Cout)
    return jnp.transpose(out, (0, 3, 1, 2))                     # back to NCHW


# ---------------------------------------------------------------------------
# Pure-JAX f32 reference (same semantics as the PyTorch module in eval mode).
# ---------------------------------------------------------------------------
def bottleneck_ref(x, params):
    def conv(x, w, pad):
        return jax.lax.conv_general_dilated(
            x, w, window_strides=(1, 1), padding=((pad, pad), (pad, pad)),
            dimension_numbers=("NCHW", "OIHW", "NCHW"))

    def bn(x, g, b, m, v):
        g, b, m, v = (t[None, :, None, None] for t in (g, b, m, v))
        return (x - m) / jnp.sqrt(v + EPS) * g + b

    out = jax.nn.relu(bn(conv(x, params["w1"], 0),
                         params["g1"], params["b1"], params["m1"], params["v1"]))
    out = jax.nn.relu(bn(conv(out, params["w2"], 1),
                         params["g2"], params["b2"], params["m2"], params["v2"]))
    out = bn(conv(out, params["w3"], 0),
             params["g3"], params["b3"], params["m3"], params["v3"]) + x
    return jax.nn.relu(out)


def make_params(key, inplanes, planes):
    width = planes                      # base_width=64, groups=1
    cout = planes * 4                   # expansion = 4
    ks = jax.random.split(key, 18)

    def bn_params(k0, k1, k2, k3, c):
        return (1.0 + 0.1 * jax.random.normal(k0, (c,), jnp.float32),
                0.1 * jax.random.normal(k1, (c,), jnp.float32),
                0.1 * jax.random.normal(k2, (c,), jnp.float32),
                0.5 + jnp.abs(jax.random.normal(k3, (c,), jnp.float32)))

    g1, b1, m1, v1 = bn_params(ks[1], ks[2], ks[3], ks[4], width)
    g2, b2, m2, v2 = bn_params(ks[6], ks[7], ks[8], ks[9], width)
    g3, b3, m3, v3 = bn_params(ks[11], ks[12], ks[13], ks[14], cout)
    return {
        "w1": jax.random.normal(ks[0], (width, inplanes, 1, 1), jnp.float32) * 0.1,
        "g1": g1, "b1": b1, "m1": m1, "v1": v1,
        "w2": jax.random.normal(ks[5], (width, width, 3, 3), jnp.float32) * 0.1,
        "g2": g2, "b2": b2, "m2": m2, "v2": v2,
        "w3": jax.random.normal(ks[10], (cout, width, 1, 1), jnp.float32) * 0.1,
        "g3": g3, "b3": b3, "m3": m3, "v3": v3,
    }


if __name__ == "__main__":
    key = jax.random.PRNGKey(0)
    k_x, k_p = jax.random.split(key)

    N, planes, Hs, Ws = 2, 4, 16, 16
    inplanes = planes * 4                # downsample=None => Cin == planes*4
    x = jax.random.normal(k_x, (N, inplanes, Hs, Ws), jnp.float32)
    params = make_params(k_p, inplanes=inplanes, planes=planes)

    out = jax.block_until_ready(bottleneck_pallas(x, params))
    ref = bottleneck_ref(x, params)

    assert out.shape == ref.shape == (N, inplanes, Hs, Ws)
    err = jnp.max(jnp.abs(out - ref))
    # tolerance loosened vs. pure-f32: activations/weights feed the MXU in bf16
    # and the kernel output is written back in bf16.
    assert jnp.allclose(out, ref, rtol=8e-2, atol=8e-2), f"max abs err = {err}"

    print("KERNEL_OK")
</pallas_src>

<mosaic_0001>
module attributes {stable_mosaic.version = 11 : i64} {
  func.func @bottleneck_kernel(%arg0: i32, %arg1: memref<1x256x16xbf16, #tpu.memory_space<vmem>>, %arg2: memref<16x4xbf16, #tpu.memory_space<vmem>>, %arg3: memref<1x4xf32, #tpu.memory_space<vmem>>, %arg4: memref<36x4xbf16, #tpu.memory_space<vmem>>, %arg5: memref<1x4xf32, #tpu.memory_space<vmem>>, %arg6: memref<4x16xbf16, #tpu.memory_space<vmem>>, %arg7: memref<1x16xf32, #tpu.memory_space<vmem>>, %arg8: memref<1x256x16xbf16, #tpu.memory_space<vmem>>, %arg9: memref<18x25x4xbf16, #tpu.memory_space<vmem>>, %arg10: memref<16x16x36xbf16, #tpu.memory_space<vmem>>) attributes {dimension_semantics = [#tpu.dimension_semantics<parallel>], iteration_bounds = array<i64: 2>, scalar_prefetch = 0 : i64, scratch_operands = 2 : i64, tpu.core_type = #tpu.core_type<tc>, window_params = [{transform_indices = @transform_0, window_bounds = array<i64: 1, 256, 16>}, {pipeline_mode = #tpu.pipeline_mode<synchronous>, transform_indices = @transform_1, window_bounds = array<i64: 16, 4>}, {pipeline_mode = #tpu.pipeline_mode<synchronous>, transform_indices = @transform_2, window_bounds = array<i64: 1, 4>}, {pipeline_mode = #tpu.pipeline_mode<synchronous>, transform_indices = @transform_3, window_bounds = array<i64: 36, 4>}, {pipeline_mode = #tpu.pipeline_mode<synchronous>, transform_indices = @transform_4, window_bounds = array<i64: 1, 4>}, {pipeline_mode = #tpu.pipeline_mode<synchronous>, transform_indices = @transform_5, window_bounds = array<i64: 4, 16>}, {pipeline_mode = #tpu.pipeline_mode<synchronous>, transform_indices = @transform_6, window_bounds = array<i64: 1, 16>}, {transform_indices = @transform_7, window_bounds = array<i64: 1, 256, 16>}]} {
    %c0 = arith.constant 0 : index
    %c0_0 = arith.constant 0 : index
    %c0_1 = arith.constant 0 : index
    %0 = vector.load %arg1[%c0, %c0_0, %c0_1] : memref<1x256x16xbf16, #tpu.memory_space<vmem>>, vector<1x256x16xbf16>
    %1 = vector.shape_cast %0 : vector<1x256x16xbf16> to vector<256x16xbf16>
    %c0_2 = arith.constant 0 : index
    %c0_3 = arith.constant 0 : index
    %2 = vector.load %arg2[%c0_2, %c0_3] : memref<16x4xbf16, #tpu.memory_space<vmem>>, vector<16x4xbf16>
    %cst = arith.constant dense<0.000000e+00> : vector<256x4xf32>
    %3 = tpu.matmul %1, %2, %cst {dimension_numbers = #tpu.dot_dimension_numbers<[1], [0], [0], [1], [0, 0, 1, 1], [], []>} : vector<256x16xbf16>, vector<16x4xbf16>, vector<256x4xf32> -> vector<256x4xf32>
    %c0_4 = arith.constant 0 : index
    %c0_5 = arith.constant 0 : index
    %4 = vector.load %arg3[%c0_4, %c0_5] : memref<1x4xf32, #tpu.memory_space<vmem>>, vector<1x4xf32>
    %5 = vector.broadcast %4 : vector<1x4xf32> to vector<256x4xf32>
    %6 = arith.addf %3, %5 : vector<256x4xf32>
    %cst_6 = arith.constant 0.000000e+00 : f32
    %7 = vector.broadcast %cst_6 : f32 to vector<256x4xf32>
    %8 = arith.maximumf %6, %7 : vector<256x4xf32>
    %9 = arith.truncf %8 : vector<256x4xf32> to vector<256x4xbf16>
    %cst_7 = arith.constant 0.000000e+00 : bf16
    %10 = vector.broadcast %cst_7 : bf16 to vector<1x25x4xbf16>
    %cst_8 = arith.constant 0.000000e+00 : bf16
    %11 = vector.broadcast %cst_8 : bf16 to vector<18x1x4xbf16>
    %c0_9 = arith.constant 0 : index
    %c0_10 = arith.constant 0 : index
    %c0_11 = arith.constant 0 : index
    %12 = vector.load %arg9[%c0_9, %c0_10, %c0_11] : memref<18x25x4xbf16, #tpu.memory_space<vmem>>, vector<1x25x4xbf16>
    tpu.vector_store %arg9[%c0_9, %c0_10, %c0_11], %10 {strides = array<i32>} : memref<18x25x4xbf16, #tpu.memory_space<vmem>>, vector<1x25x4xbf16>,
    %c17 = arith.constant 17 : index
    %c0_12 = arith.constant 0 : index
    %c0_13 = arith.constant 0 : index
    %13 = vector.load %arg9[%c17, %c0_12, %c0_13] : memref<18x25x4xbf16, #tpu.memory_space<vmem>>, vector<1x25x4xbf16>
    tpu.vector_store %arg9[%c17, %c0_12, %c0_13], %10 {strides = array<i32>} : memref<18x25x4xbf16, #tpu.memory_space<vmem>>, vector<1x25x4xbf16>,
    %c0_14 = arith.constant 0 : index
    %c7 = arith.constant 7 : index
    %c0_15 = arith.constant 0 : index
    %14 = vector.load %arg9[%c0_14, %c7, %c0_15] : memref<18x25x4xbf16, #tpu.memory_space<vmem>>, vector<18x1x4xbf16>
    tpu.vector_store %arg9[%c0_14, %c7, %c0_15], %11 {strides = array<i32>} : memref<18x25x4xbf16, #tpu.memory_space<vmem>>, vector<18x1x4xbf16>,
    %c0_16 = arith.constant 0 : index
    %c24 = arith.constant 24 : index
    %c0_17 = arith.constant 0 : index
    %15 = vector.load %arg9[%c0_16, %c24, %c0_17] : memref<18x25x4xbf16, #tpu.memory_space<vmem>>, vector<18x1x4xbf16>
    tpu.vector_store %arg9[%c0_16, %c24, %c0_17], %11 {strides = array<i32>} : memref<18x25x4xbf16, #tpu.memory_space<vmem>>, vector<18x1x4xbf16>,
    %16 = vector.shape_cast %9 : vector<256x4xbf16> to vector<16x16x4xbf16>
    %c1 = arith.constant 1 : index
    %c8 = arith.constant 8 : index
    %c0_18 = arith.constant 0 : index
    %17 = vector.load %arg9[%c1, %c8, %c0_18] : memref<18x25x4xbf16, #tpu.memory_space<vmem>>, vector<16x16x4xbf16>
    tpu.vector_store %arg9[%c1, %c8, %c0_18], %16 {strides = array<i32>} : memref<18x25x4xbf16, #tpu.memory_space<vmem>>, vector<16x16x4xbf16>,
    %c0_19 = arith.constant 0 : index
    %c7_20 = arith.constant 7 : index
    %c0_21 = arith.constant 0 : index
    %18 = vector.load %arg9[%c0_19, %c7_20, %c0_21] : memref<18x25x4xbf16, #tpu.memory_space<vmem>>, vector<16x16x4xbf16>
    %c0_22 = arith.constant 0 : index
    %c8_23 = arith.constant 8 : index
    %c0_24 = arith.constant 0 : index
    %19 = vector.load %arg9[%c0_22, %c8_23, %c0_24] : memref<18x25x4xbf16, #tpu.memory_space<vmem>>, vector<16x16x4xbf16>
    %20 = tpu.concatenate %18, %19 in 2 : vector<16x16x4xbf16>, vector<16x16x4xbf16> -> vector<16x16x8xbf16>
    %c0_25 = arith.constant 0 : index
    %c0_26 = arith.constant 0 : index
    %c0_27 = arith.constant 0 : index
    %21 = vector.load %arg10[%c0_25, %c0_26, %c0_27] : memref<16x16x36xbf16, #tpu.memory_space<vmem>>, vector<16x16x8xbf16>
    tpu.vector_store %arg10[%c0_25, %c0_26, %c0_27], %20 {strides = array<i32>} : memref<16x16x36xbf16, #tpu.memory_space<vmem>>, vector<16x16x8xbf16>,
    %c0_28 = arith.constant 0 : index
    %c9 = arith.constant 9 : index
    %c0_29 = arith.constant 0 : index
    %22 = vector.load %arg9[%c0_28, %c9, %c0_29] : memref<18x25x4xbf16, #tpu.memory_space<vmem>>, vector<16x16x4xbf16>
    %c1_30 = arith.constant 1 : index
    %c7_31 = arith.constant 7 : index
    %c0_32 = arith.constant 0 : index
    %23 = vector.load %arg9[%c1_30, %c7_31, %c0_32] : memref<18x25x4xbf16, #tpu.memory_space<vmem>>, vector<16x16x4xbf16>
    %24 = tpu.concatenate %22, %23 in 2 : vector<16x16x4xbf16>, vector<16x16x4xbf16> -> vector<16x16x8xbf16>
    %c0_33 = arith.constant 0 : index
    %c0_34 = arith.constant 0 : index
    %c8_35 = arith.constant 8 : index
    %25 = vector.load %arg10[%c0_33, %c0_34, %c8_35] : memref<16x16x36xbf16, #tpu.memory_space<vmem>>, vector<16x16x8xbf16>
    tpu.vector_store %arg10[%c0_33, %c0_34, %c8_35], %24 {strides = array<i32>} : memref<16x16x36xbf16, #tpu.memory_space<vmem>>, vector<16x16x8xbf16>,
    %c1_36 = arith.constant 1 : index
    %c8_37 = arith.constant 8 : index
    %c0_38 = arith.constant 0 : index
    %26 = vector.load %arg9[%c1_36, %c8_37, %c0_38] : memref<18x25x4xbf16, #tpu.memory_space<vmem>>, vector<16x16x4xbf16>
    %c1_39 = arith.constant 1 : index
    %c9_40 = arith.constant 9 : index
    %c0_41 = arith.constant 0 : index
    %27 = vector.load %arg9[%c1_39, %c9_40, %c0_41] : memref<18x25x4xbf16, #tpu.memory_space<vmem>>, vector<16x16x4xbf16>
    %28 = tpu.concatenate %26, %27 in 2 : vector<16x16x4xbf16>, vector<16x16x4xbf16> -> vector<16x16x8xbf16>
    %c0_42 = arith.constant 0 : index
    %c0_43 = arith.constant 0 : index
    %c16 = arith.constant 16 : index
    %29 = vector.load %arg10[%c0_42, %c0_43, %c16] : memref<16x16x36xbf16, #tpu.memory_space<vmem>>, vector<16x16x8xbf16>
    tpu.vector_store %arg10[%c0_42, %c0_43, %c16], %28 {strides = array<i32>} : memref<16x16x36xbf16, #tpu.memory_space<vmem>>, vector<16x16x8xbf16>,
    %c2 = arith.constant 2 : index
    %c7_44 = arith.constant 7 : index
    %c0_45 = arith.constant 0 : index
    %30 = vector.load %arg9[%c2, %c7_44, %c0_45] : memref<18x25x4xbf16, #tpu.memory_space<vmem>>, vector<16x16x4xbf16>
    %c2_46 = arith.constant 2 : index
    %c8_47 = arith.constant 8 : index
    %c0_48 = arith.constant 0 : index
    %31 = vector.load %arg9[%c2_46, %c8_47, %c0_48] : memref<18x25x4xbf16, #tpu.memory_space<vmem>>, vector<16x16x4xbf16>
    %32 = tpu.concatenate %30, %31 in 2 : vector<16x16x4xbf16>, vector<16x16x4xbf16> -> vector<16x16x8xbf16>
    %c0_49 = arith.constant 0 : index
    %c0_50 = arith.constant 0 : index
    %c24_51 = arith.constant 24 : index
    %33 = vector.load %arg10[%c0_49, %c0_50, %c24_51] : memref<16x16x36xbf16, #tpu.memory_space<vmem>>, vector<16x16x8xbf16>
    tpu.vector_store %arg10[%c0_49, %c0_50, %c24_51], %32 {strides = array<i32>} : memref<16x16x36xbf16, #tpu.memory_space<vmem>>, vector<16x16x8xbf16>,
    %c2_52 = arith.constant 2 : index
    %c9_53 = arith.constant 9 : index
    %c0_54 = arith.constant 0 : index
    %34 = vector.load %arg9[%c2_52, %c9_53, %c0_54] : memref<18x25x4xbf16, #tpu.memory_space<vmem>>, vector<16x16x4xbf16>
    %c0_55 = arith.constant 0 : index
    %c0_56 = arith.constant 0 : index
    %c32 = arith.constant 32 : index
    %35 = vector.load %arg10[%c0_55, %c0_56, %c32] : memref<16x16x36xbf16, #tpu.memory_space<vmem>>, vector<16x16x4xbf16>
    tpu.vector_store %arg10[%c0_55, %c0_56, %c32], %34 {strides = array<i32>} : memref<16x16x36xbf16, #tpu.memory_space<vmem>>, vector<16x16x4xbf16>,
    %c0_57 = arith.constant 0 : index
    %c0_58 = arith.constant 0 : index
    %c0_59 = arith.constant 0 : index
    %36 = vector.load %arg10[%c0_57, %c0_58, %c0_59] : memref<16x16x36xbf16, #tpu.memory_space<vmem>>, vector<16x16x36xbf16>
    %37 = vector.shape_cast %36 : vector<16x16x36xbf16> to vector<256x36xbf16>
    %c0_60 = arith.constant 0 : index
    %c0_61 = arith.constant 0 : index
    %38 = vector.load %arg4[%c0_60, %c0_61] : memref<36x4xbf16, #tpu.memory_space<vmem>>, vector<36x4xbf16>
    %cst_62 = arith.constant dense<0.000000e+00> : vector<256x4xf32>
    %39 = tpu.matmul %37, %38, %cst_62 {dimension_numbers = #tpu.dot_dimension_numbers<[1], [0], [0], [1], [0, 0, 1, 1], [], []>} : vector<256x36xbf16>, vector<36x4xbf16>, vector<256x4xf32> -> vector<256x4xf32>
    %c0_63 = arith.constant 0 : index
    %c0_64 = arith.constant 0 : index
    %40 = vector.load %arg5[%c0_63, %c0_64] : memref<1x4xf32, #tpu.memory_space<vmem>>, vector<1x4xf32>
    %41 = vector.broadcast %40 : vector<1x4xf32> to vector<256x4xf32>
    %42 = arith.addf %39, %41 : vector<256x4xf32>
    %cst_65 = arith.constant 0.000000e+00 : f32
    %43 = vector.broadcast %cst_65 : f32 to vector<256x4xf32>
    %44 = arith.maximumf %42, %43 : vector<256x4xf32>
    %45 = arith.truncf %44 : vector<256x4xf32> to vector<256x4xbf16>
    %c0_66 = arith.constant 0 : index
    %c0_67 = arith.constant 0 : index
    %46 = vector.load %arg6[%c0_66, %c0_67] : memref<4x16xbf16, #tpu.memory_space<vmem>>, vector<4x16xbf16>
    %cst_68 = arith.constant dense<0.000000e+00> : vector<256x16xf32>
    %47 = tpu.matmul %45, %46, %cst_68 {dimension_numbers = #tpu.dot_dimension_numbers<[1], [0], [0], [1], [0, 0, 1, 1], [], []>} : vector<256x4xbf16>, vector<4x16xbf16>, vector<256x16xf32> -> vector<256x16xf32>
    %c0_69 = arith.constant 0 : index
    %c0_70 = arith.constant 0 : index
    %48 = vector.load %arg7[%c0_69, %c0_70] : memref<1x16xf32, #tpu.memory_space<vmem>>, vector<1x16xf32>
    %49 = vector.broadcast %48 : vector<1x16xf32> to vector<256x16xf32>
    %50 = arith.addf %47, %49 : vector<256x16xf32>
    %51 = arith.extf %1 : vector<256x16xbf16> to vector<256x16xf32>
    %52 = arith.addf %50, %51 : vector<256x16xf32>
    %cst_71 = arith.constant 0.000000e+00 : f32
    %53 = vector.broadcast %cst_71 : f32 to vector<256x16xf32>
    %54 = arith.maximumf %52, %53 : vector<256x16xf32>
    %55 = arith.truncf %54 : vector<256x16xf32> to vector<256x16xbf16>
    %c0_72 = arith.constant 0 : index
    %c0_73 = arith.constant 0 : index
    %c0_74 = arith.constant 0 : index
    %56 = vector.load %arg8[%c0_72, %c0_73, %c0_74] : memref<1x256x16xbf16, #tpu.memory_space<vmem>>, vector<1x256x16xbf16>
    %57 = vector.shape_cast %56 : vector<1x256x16xbf16> to vector<256x16xbf16>
    %58 = vector.shape_cast %55 : vector<256x16xbf16> to vector<1x256x16xbf16>
    tpu.vector_store %arg8[%c0_72, %c0_73, %c0_74], %58 {strides = array<i32>} : memref<1x256x16xbf16, #tpu.memory_space<vmem>>, vector<1x256x16xbf16>,
    return
  }
  func.func @transform_0(%arg0: i32) -> (i32, i32, i32) {
    %c0_i32 = arith.constant 0 : i32
    %c0_i32_0 = arith.constant 0 : i32
    %c0_i32_1 = arith.constant 0 : i32
    return %arg0, %c0_i32, %c0_i32_0 : i32, i32, i32
  }
  func.func @transform_1(%arg0: i32) -> (i32, i32) {
    %c0_i32 = arith.constant 0 : i32
    %c0_i32_0 = arith.constant 0 : i32
    %c0_i32_1 = arith.constant 0 : i32
    return %c0_i32, %c0_i32_0 : i32, i32
  }
  func.func @transform_2(%arg0: i32) -> (i32, i32) {
    %c0_i32 = arith.constant 0 : i32
    %c0_i32_0 = arith.constant 0 : i32
    %c0_i32_1 = arith.constant 0 : i32
    return %c0_i32, %c0_i32_0 : i32, i32
  }
  func.func @transform_3(%arg0: i32) -> (i32, i32) {
    %c0_i32 = arith.constant 0 : i32
    %c0_i32_0 = arith.constant 0 : i32
    %c0_i32_1 = arith.constant 0 : i32
    return %c0_i32, %c0_i32_0 : i32, i32
  }
  func.func @transform_4(%arg0: i32) -> (i32, i32) {
    %c0_i32 = arith.constant 0 : i32
    %c0_i32_0 = arith.constant 0 : i32
    %c0_i32_1 = arith.constant 0 : i32
    return %c0_i32, %c0_i32_0 : i32, i32
  }
  func.func @transform_5(%arg0: i32) -> (i32, i32) {
    %c0_i32 = arith.constant 0 : i32
    %c0_i32_0 = arith.constant 0 : i32
    %c0_i32_1 = arith.constant 0 : i32
    return %c0_i32, %c0_i32_0 : i32, i32
  }
  func.func @transform_6(%arg0: i32) -> (i32, i32) {
    %c0_i32 = arith.constant 0 : i32
    %c0_i32_0 = arith.constant 0 : i32
    %c0_i32_1 = arith.constant 0 : i32
    return %c0_i32, %c0_i32_0 : i32, i32
  }
  func.func @transform_7(%arg0: i32) -> (i32, i32, i32) {
    %c0_i32 = arith.constant 0 : i32
    %c0_i32_0 = arith.constant 0 : i32
    %c0_i32_1 = arith.constant 0 : i32
    return %arg0, %c0_i32, %c0_i32_0 : i32, i32, i32
  }
}

</mosaic_0001>

<bundles_post_ra>
// kernel: bottleneck_pallas.1
= control target key start
LH: loop header
LB: loop body
LE: loop exit
PB: predicated region body
PF: predicated region fallthrough
CT: control target
= control target key end

     0   :  { %s7451_s24 = smov 0   ;;  %s10562_s0 = inlined_call_operand.vmem [shape: bf16[2,256,16], index: 0, kind: input, shape index: {}]   ;;  %s10563_s1 = inlined_call_operand.vmem [shape: bf16[16,4], index: 1, kind: input, shape index: {}]   ;;  %s10564_s2 = inlined_call_operand.vmem [shape: f32[1,4], index: 2, kind: input, shape index: {}]   ;;  %s10565_s3 = inlined_call_operand.vmem [shape: bf16[36,4], index: 3, kind: input, shape index: {}]   ;;  %s10566_s4 = inlined_call_operand.vmem [shape: f32[1,4], index: 4, kind: input, shape index: {}]   ;;  %s10567_s5 = inlined_call_operand.vmem [shape: bf16[4,16], index: 5, kind: input, shape index: {}]   ;;  %s10568_s6 = inlined_call_operand.vmem [shape: f32[1,16], index: 6, kind: input, shape index: {}]   ;;  %s10569_s7 = inlined_call_operand.vmem [shape: bf16[2,256,16], index: 7, kind: output, shape index: {}]  }
   0x1 LB: > { %s6301_s25 = sadd.s32 4294967295, %s7403_s24   ;;  %p6305_p0 = scmp.ge.s32.totalorder %s7403_s24, 1  ;;  %s7403_s24 = sphi %s7451_s24, %s17_s24  }
   0x2   : > { %p237_p1 = scmp.lt.s32.totalorder %s7403_s24, 3 }
   0x4   : > { %p238_p2 = pnand %p6305_p0, %p237_p1 }
   0x6   : > { %241 = sbr.rel (%p238_p2) target bundleno = 1241 (0x4d9), region = 48 }
   0xb   : > { %v7106_v0 = vld [vmem:[%s10563_s1] sm:$0xff]   ;;  %p269_p3 = scmp.lt.s32.totalorder %s6301_s25, 1  ;;  %vm407_vm0 = vcmask 130048   ;;  %vm665_vm1 = vcmask 27648   ;;  %v7405_v17 = vmov 0   ;;  %vm682_vm2 = vcmask 27651  }
   0xc   : > { %6982 = vmatprep.subr.bf16.mxu0 %v7106_v0  ;;  %7088 = vmatprep.subr.bf16.mxu1 %v7106_v0  ;;  %667 = vst.msk [vmem:[#allocation2 + $0x4] sm:$0xf] %vm665_vm1, %v7405_v17  ;;  %668 = vst.msk [vmem:[#allocation2 + $0x8] sm:$0xf] %vm665_vm1, %v7405_v17  ;;  %vm683_vm3 = vsmask.f32 7950 }
   0xd   : > { %s11069_s25 = smov (!%p269_p3, %s6301_s25), 1  ;;  %6983 = vmatpush3.bf16.msra.mxu0 %v7106_v0  ;;  %7089 = vmatpush3.bf16.msra.mxu1 %v7106_v0  ;;  %666 = vst.msk [vmem:[#allocation2] sm:$0xf] %vm665_vm1, %v7405_v17  ;;  %676 = vst.msk [vmem:[#allocation2 + $0x110] sm:$0xf] %vm665_vm1, %v7405_v17  ;;  %s7406_s9 = smov 4  }
   0xe   : > { %s6863_s28 = sshll.u32 %s11069_s25, 7  ;;  %677 = vst.msk [vmem:[#allocation2 + $0x114] sm:$0xf] %vm665_vm1, %v7405_v17  ;;  %678 = vst.msk [vmem:[#allocation2 + $0x118] sm:$0xf] %vm665_vm1, %v7405_v17  ;;  %vm669_vm5 = vcmask 24576  }
   0xf   : > { %s7470_s8 = scalar_lea.vmem %s10562_s0, %s6863_s28  ;;  %vm7510_vm4 = vmand %vm682_vm2, %vm683_vm3  ;;  %v691_v21 = vld [vmem:[#allocation2 + $0x20] sm:$0x8]  ;;  %v688_v38 = vld [vmem:[#allocation2 + $0x10] sm:$0x8]  ;;  %vm670_vm6 = vsmask.f32 256  ;;  %s10450_s13 = scalar_lea.vmem %s10569_s7, %s6863_s28 }
  0x10   : > { %v280_v1 = vld [vmem:[%s7470_s8] sm:$0xff]   ;;  %v282_v3 = vld [vmem:[%s7470_s8 + $0x8] sm:$0xff]   ;;  %v284_v5 = vld [vmem:[%s7470_s8 + $0x10] sm:$0xff]   ;;  %v692_v23 = vsel %vm7510_vm4, 0, %v691_v21  ;;  %v689_v39 = vsel %vm7510_vm4, 0, %v688_v38  ;;  %v10651_v41 = vmov 0 }
  0x11   : > { %v296_v2 = vld [vmem:[%s7470_s8 + $0x40] sm:$0xff]   ;;  %v298_v4 = vld [vmem:[%s7470_s8 + $0x48] sm:$0xff]   ;;  %v300_v6 = vld [vmem:[%s7470_s8 + $0x50] sm:$0xff]   ;;  %6984 = vmatprep.mubr.msk.bf16.mxu0 %vm407_vm0, %v280_v1  ;;  %693 = vst [vmem:[#allocation2 + $0x20] sm:$0x8] %v692_v23  ;;  %vm2270_vm8 = vcmask 1044480  }
  0x12   : > { %7000 = vmatprep.mubr.msk.bf16.mxu1 %vm407_vm0, %v296_v2  ;;  %6985 = vmatmul.mubr.msk.bf16.vlgmr.msra.gmra.mxu0 %vm407_vm0, %v282_v3  ;;  %v286_v7 = vld [vmem:[%s7470_s8 + $0x18] sm:$0xff]   ;;  %v288_v9 = vld [vmem:[%s7470_s8 + $0x20] sm:$0xff]   ;;  %v290_v11 = vld [vmem:[%s7470_s8 + $0x28] sm:$0xff]   ;;  %690 = vst [vmem:[#allocation2 + $0x10] sm:$0x8] %v689_v39  ;;  %s7407_s12 = smov 32  }
  0x13   : > { %7001 = vmatmul.mubr.msk.bf16.vlgmr.msra.gmra.mxu1 %vm407_vm0, %v298_v4  ;;  %6988 = vmatprep.mubr.msk.bf16.mxu0 %vm407_vm0, %v284_v5  ;;  %v302_v8 = vld [vmem:[%s7470_s8 + $0x58] sm:$0xff]   ;;  %v304_v10 = vld [vmem:[%s7470_s8 + $0x60] sm:$0xff]   ;;  %v306_v12 = vld [vmem:[%s7470_s8 + $0x68] sm:$0xff]   ;;  %vm2607_vm9 = vsmask.f32 3328  ;;  %vm1290_vm13 = vcmask 31744  }
  0x14   : > { %7004 = vmatprep.mubr.msk.bf16.mxu1 %vm407_vm0, %v300_v6  ;;  %v292_v13 = vld [vmem:[%s7470_s8 + $0x30] sm:$0xff]   ;;  %v294_v15 = vld [vmem:[%s7470_s8 + $0x38] sm:$0xff]   ;;  %v939_v19 = vld [vmem:[#allocation2 + $0x4] sm:$0xf]  ;;  %vm2608_vm10 = vsmask.f32 7440 }
  0x15   : > { %v308_v14 = vld [vmem:[%s7470_s8 + $0x70] sm:$0xff]   ;;  %v310_v16 = vld [vmem:[%s7470_s8 + $0x78] sm:$0xff]   ;;  %v940_v20 = vld [vmem:[#allocation2 + $0x8] sm:$0xf]  ;;  %vm3299_vm12 = vsmask.f32 7424 }
  0x16   : > { %v6408_v22 = vcombine.low %v939_v19, %v940_v20  ;;  %v715_v26 = vld [vmem:[#allocation2 + $0xa0] sm:$0x8]  ;;  %v3812_v27 = vld [vmem:[#allocation2 + $0x114] sm:$0xf]  ;;  %v3813_v28 = vld [vmem:[#allocation2 + $0x118] sm:$0xf] }
  0x17   : > { %v716_v29 = vsel %vm7510_vm4, 0, %v715_v26  ;;  %v6711_v32 = vcombine.low %v3812_v27, %v3813_v28  ;;  %vm7523_vm7 = vmand %vm669_vm5, %vm670_vm6  ;;  %v745_v42 = vld [vmem:[#allocation2 + $0x2c] sm:$0x1]  ;;  %v712_v44 = vld [vmem:[#allocation2 + $0x90] sm:$0x8]  ;;  %s7408_s15 = smov 16  }
  0x18   : > { %v1131_v24 = vshrl.u32 %v6408_v22, 16  ;;  %v1134_v25 = vshll.u32 %v6408_v22, 16  ;;  %717 = vst [vmem:[#allocation2 + $0xa0] sm:$0x8] %v716_v29  ;;  %v10652_v41 = vsel %vm7523_vm7, 4294967295, %v10651_v41  ;;  %v746_v43 = vsel %vm7523_vm7, 0, %v745_v42  ;;  %vm7615_vm11 = vmor %vm2607_vm9, %vm2608_vm10 }
  0x19   : > { %v4079_v34 = vshrl.u32 %v6711_v32, 16  ;;  %v4082_v35 = vshll.u32 %v6711_v32, 16  ;;  %10653 = vst [vmem:[#allocation4_spill] sm:$0xff] %v10652_v41  ;;  %747 = vst [vmem:[#allocation2 + $0x2c] sm:$0x1] %v746_v43  ;;  %v713_v45 = vsel %vm7510_vm4, 0, %v712_v44 }
  0x1a   : > { %6989 = vmatmul.mubr.msk.bf16.gmra.mxu0 %vm407_vm0, %v286_v7  ;;  %v1133_v30 = vrot.slane %v1131_v24, 4  ;;  %v1136_v31 = vrot.slane %v1134_v25, 5  ;;  %v769_v46 = vld [vmem:[#allocation2 + $0xac] sm:$0x1]  ;;  %714 = vst [vmem:[#allocation2 + $0x90] sm:$0x8] %v713_v45 }
  0x1b   : > { %7005 = vmatmul.mubr.msk.bf16.gmra.mxu1 %vm407_vm0, %v302_v8  ;;  %6992 = vmatprep.mubr.msk.bf16.mxu0 %vm407_vm0, %v288_v9  ;;  %v4081_v36 = vrot.slane %v4079_v34, 4  ;;  %v4084_v37 = vrot.slane %v4082_v35, 5  ;;  %v770_v47 = vsel %vm7523_vm7, 0, %v769_v46  ;;  %v742_v48 = vld [vmem:[#allocation2 + $0x1c] sm:$0x1]  ;;  %s7409_s16 = smov 8  }
  0x1c   : > { %7008 = vmatprep.mubr.msk.bf16.mxu1 %vm407_vm0, %v304_v10  ;;  %v1137_v33 = vor.u32 %v1136_v31, %v1133_v30  ;;  %771 = vst [vmem:[#allocation2 + $0xac] sm:$0x1] %v770_v47  ;;  %v743_v49 = vsel %vm7523_vm7, 0, %v742_v48  ;;  %v766_v50 = vld [vmem:[#allocation2 + $0x9c] sm:$0x1]  ;;  %s7410_s17 = smov 24  }
  0x1d   : > { %v4085_v40 = vor.u32 %v4084_v37, %v4081_v36  ;;  %744 = vst [vmem:[#allocation2 + $0x1c] sm:$0x1] %v743_v49  ;;  %v767_v51 = vsel %vm7523_vm7, 0, %v766_v50  ;;  %v697_v52 = vld [vmem:[#allocation2 + $0x40] sm:$0x8]  ;;  %vm3732_vm2 = vcmask 191616  }
  0x1e   : > { %1258 = vrot.lane.b32.xlu1 %v1137_v33, %s7406_s9  ;;  %768 = vst [vmem:[#allocation2 + $0x9c] sm:$0x1] %v767_v51  ;;  %v698_v53 = vsel %vm7510_vm4, 0, %v697_v52  ;;  %v751_v54 = vld [vmem:[#allocation2 + $0x4c] sm:$0x1]  ;;  %vm4774_vm3 = vcmask 257216  }
  0x1f   : > { %699 = vst [vmem:[#allocation2 + $0x40] sm:$0x8] %v698_v53  ;;  %v694_v55 = vld [vmem:[#allocation2 + $0x30] sm:$0x8]  ;;  %v748_v56 = vld [vmem:[#allocation2 + $0x3c] sm:$0x1] }
  0x20   : > { %v752_v57 = vsel %vm7523_vm7, 0, %v751_v54  ;;  %v695_v58 = vsel %vm7510_vm4, 0, %v694_v55  ;;  %v749_v59 = vsel %vm7523_vm7, 0, %v748_v56  ;;  %v721_v60 = vld [vmem:[#allocation2 + $0xc0] sm:$0x8]  ;;  %vm5556_vm5 = vcmask 1041408  }
  0x21   : > { %753 = vst [vmem:[#allocation2 + $0x4c] sm:$0x1] %v752_v57  ;;  %696 = vst [vmem:[#allocation2 + $0x30] sm:$0x8] %v695_v58  ;;  %v722_v61 = vsel %vm7510_vm4, 0, %v721_v60 }
  0x22   : > { %6993 = vmatmul.mubr.msk.bf16.gmra.mxu0 %vm407_vm0, %v290_v11  ;;  %4116 = vrot.lane.b32.xlu1 %v4085_v40, %s7406_s9  ;;  %750 = vst [vmem:[#allocation2 + $0x3c] sm:$0x1] %v749_v59  ;;  %723 = vst [vmem:[#allocation2 + $0xc0] sm:$0x8] %v722_v61  ;;  %v775_v62 = vld [vmem:[#allocation2 + $0xcc] sm:$0x1] }
  0x23   : > { %7009 = vmatmul.mubr.msk.bf16.gmra.mxu1 %vm407_vm0, %v306_v12  ;;  %6996 = vmatprep.mubr.msk.bf16.mxu0 %vm407_vm0, %v292_v13  ;;  %v718_v63 = vld [vmem:[#allocation2 + $0xb0] sm:$0x8]  ;;  %v772_v0 = vld [vmem:[#allocation2 + $0xbc] sm:$0x1]  ;;  %v776_v1 = vsel %vm7523_vm7, 0, %v775_v62 }
  0x24   : > { %7012 = vmatprep.mubr.msk.bf16.mxu1 %vm407_vm0, %v308_v14  ;;  %v719_v2 = vsel %vm7510_vm4, 0, %v718_v63  ;;  %v773_v3 = vsel %vm7523_vm7, 0, %v772_v0  ;;  %777 = vst [vmem:[#allocation2 + $0xcc] sm:$0x1] %v776_v1  ;;  %v7556_v4 = vld [vmem:[%s10564_s2] ss:$0 sm:$0xff] }
  0x25   : > { %720 = vst [vmem:[#allocation2 + $0xb0] sm:$0x8] %v719_v2  ;;  %774 = vst [vmem:[#allocation2 + $0xbc] sm:$0x1] %v773_v3  ;;  %v685_v9 = vld [vmem:[#allocation2] sm:$0x8] }
  0x26   : > { %v686_v12 = vsel %vm7510_vm4, 0, %v685_v9  ;;  %v703_v17 = vld [vmem:[#allocation2 + $0x60] sm:$0x8]  ;;  %v736_v26 = vld [vmem:[#allocation2 + $0x110] sm:$0x8] }
  0x27   : > { %687 = vst [vmem:[#allocation2] sm:$0x8] %v686_v12  ;;  %v704_v21 = vsel %vm7510_vm4, 0, %v703_v17  ;;  %v737_v31 = vsel %vm7510_vm4, 0, %v736_v26  ;;  %vm1499_vm14 = vsmask.f32 4368 }
  0x28   : > { %705 = vst [vmem:[#allocation2 + $0x60] sm:$0x8] %v704_v21  ;;  %738 = vst [vmem:[#allocation2 + $0x110] sm:$0x8] %v737_v31 }
  0x29   : > { %vm8744_vm15 = vmor %vm670_vm6, %vm1499_vm14  ;;  %vm5507_vm6 = vcmask 293888  }
  0x2a   : > { %6997 = vmatmul.mubr.msk.bf16.gmra.mxu0 %vm407_vm0, %v294_v15 }
  0x2b   : > { %7013 = vmatmul.mubr.msk.bf16.gmra.mxu1 %vm407_vm0, %v310_v16  ;;  %vm3090_vm0 = vcmask 126016  }
  0xd2   : > { %v6986_v5 = vpop.f32.mrf.mxu0 }
  0xd3   : > { %v7002_v6 = vpop.f32.mrf.mxu1  ;;  %v499_v7 = vadd.f32 %v6986_v5, %v7556_v4 }
  0xd4   : > { %v563_v8 = vadd.f32 %v7002_v6, %v7556_v4  ;;  %v490_v10 = vpop.f32.mrf.mxu0 }
  0xd5   : > { %v554_v11 = vpop.f32.mrf.mxu1  ;;  %v619_v13 = vmax.f32 %v499_v7, 0.0  ;;  %v491_v15 = vadd.f32 %v7556_v4, %v490_v10 }
  0xd6   : > { %v635_v14 = vmax.f32 %v563_v8, 0.0  ;;  %v555_v16 = vadd.f32 %v7556_v4, %v554_v11  ;;  %v6987_v19 = vpop.f32.mrf.mxu0 }
  0xd7   : > { %v7003_v20 = vpop.f32.mrf.mxu1  ;;  %v6867_v22 = vpack.c.bf16 %v619_v13, %v619_v13  ;;  %v617_v24 = vmax.f32 %v491_v15, 0.0  ;;  %v502_v27 = vadd.f32 %v6987_v19, %v7556_v4 }
  0xd8   : > { %v6883_v23 = vpack.c.bf16 %v635_v14, %v635_v14  ;;  %v633_v25 = vmax.f32 %v555_v16, 0.0  ;;  %v566_v28 = vadd.f32 %v7003_v20, %v7556_v4  ;;  %v493_v29 = vpop.f32.mrf.mxu0 }
  0xd9   : > { %v557_v30 = vpop.f32.mrf.mxu1  ;;  %908 = vst.msk [vmem:[#allocation2 + $0x24] sm:$0xf] %vm665_vm1, %v6867_v22  ;;  %v6865_v32 = vpack.c.bf16 %v617_v24, %v617_v24  ;;  %v494_v34 = vadd.f32 %v7556_v4, %v493_v29  ;;  %v620_v36 = vmax.f32 %v502_v27, 0.0 }
  0xda   : > { %924 = vst.msk [vmem:[#allocation2 + $0xa4] sm:$0xf] %vm665_vm1, %v6883_v23  ;;  %v6881_v33 = vpack.c.bf16 %v633_v25, %v633_v25  ;;  %v558_v35 = vadd.f32 %v7556_v4, %v557_v30  ;;  %v636_v37 = vmax.f32 %v566_v28, 0.0  ;;  %v6990_v38 = vpop.f32.mrf.mxu0 }
  0xdb   : > { %v7006_v39 = vpop.f32.mrf.mxu1  ;;  %906 = vst.msk [vmem:[#allocation2 + $0x14] sm:$0xf] %vm665_vm1, %v6865_v32  ;;  %v618_v40 = vmax.f32 %v494_v34, 0.0  ;;  %v515_v43 = vadd.f32 %v6990_v38, %v7556_v4  ;;  %v6868_v45 = vpack.c.bf16 %v620_v36, %v620_v36 }
  0xdc   : > { %922 = vst.msk [vmem:[#allocation2 + $0x94] sm:$0xf] %vm665_vm1, %v6881_v33  ;;  %v634_v42 = vmax.f32 %v558_v35, 0.0  ;;  %v579_v44 = vadd.f32 %v7006_v39, %v7556_v4  ;;  %v6884_v46 = vpack.c.bf16 %v636_v37, %v636_v37  ;;  %v506_v47 = vpop.f32.mrf.mxu0 }
  0xdd   : > { %v6866_v48 = vpack.c.bf16 %v618_v40, %v618_v40  ;;  %v623_v50 = vmax.f32 %v515_v43, 0.0  ;;  %v507_v51 = vadd.f32 %v7556_v4, %v506_v47  ;;  %909 = vst.msk [vmem:[#allocation2 + $0x28] sm:$0xf] %vm665_vm1, %v6868_v45  ;;  %v570_v5 = vpop.f32.mrf.mxu1  ;;  %v7135_v47 = vld [vmem:[#allocation2 + $0x2c] ss:$0 sps:$4 sm:$0x11]  }
  0xde   : > { %v6882_v49 = vpack.c.bf16 %v634_v42, %v634_v42  ;;  %925 = vst.msk [vmem:[#allocation2 + $0xa8] sm:$0xf] %vm665_vm1, %v6884_v46  ;;  %v6991_v52 = vpop.f32.mrf.mxu0  ;;  %v639_v53 = vmax.f32 %v579_v44, 0.0  ;;  %v571_v37 = vadd.f32 %v7556_v4, %v570_v5  ;;  %v3320_v5 = vshll.u32 %v7135_v47, 16 }
  0xdf   : > { %907 = vst.msk [vmem:[#allocation2 + $0x18] sm:$0xf] %vm665_vm1, %v6866_v48  ;;  %v6871_v54 = vpack.c.bf16 %v623_v50, %v623_v50  ;;  %v621_v55 = vmax.f32 %v507_v51, 0.0  ;;  %v518_v56 = vadd.f32 %v6991_v52, %v7556_v4  ;;  %v7007_v20 = vpop.f32.mrf.mxu1 }
  0xe0   : > { %923 = vst.msk [vmem:[#allocation2 + $0x98] sm:$0xf] %vm665_vm1, %v6882_v49  ;;  %v6887_v57 = vpack.c.bf16 %v639_v53, %v639_v53  ;;  %v509_v58 = vpop.f32.mrf.mxu0  ;;  %v4807_v59 = vld [vmem:[#allocation2 + $0x24] sm:$0xf]  ;;  %v582_v48 = vadd.f32 %v7007_v20, %v7556_v4 }
  0xe1   : > { %912 = vst.msk [vmem:[#allocation2 + $0x44] sm:$0xf] %vm665_vm1, %v6871_v54  ;;  %v6869_v60 = vpack.c.bf16 %v621_v55, %v621_v55  ;;  %v510_v61 = vadd.f32 %v7556_v4, %v509_v58  ;;  %v7126_v62 = vld [vmem:[#allocation2 + $0xa0] sm:$0xf8]   ;;  %v4856_v63 = vshrl.u32 %v4807_v59, 16  ;;  %v4859_v0 = vshll.u32 %v4807_v59, 16  ;;  %v573_v38 = vpop.f32.mrf.mxu1 }
  0xe2   : > { %v624_v1 = vmax.f32 %v518_v56, 0.0  ;;  %928 = vst.msk [vmem:[#allocation2 + $0xc4] sm:$0xf] %vm665_vm1, %v6887_v57  ;;  %v4831_v2 = vld [vmem:[#allocation2 + $0xa4] sm:$0xf]  ;;  %v2298_v13 = vrot.slane %v7126_v62, 3  ;;  %v574_v52 = vadd.f32 %v7556_v4, %v573_v38 }
  0xe3   : > { %910 = vst.msk [vmem:[#allocation2 + $0x34] sm:$0xf] %vm665_vm1, %v6869_v60  ;;  %v622_v3 = vmax.f32 %v510_v61, 0.0  ;;  %v4858_v6 = vrot.slane %v4856_v63, 4  ;;  %v4861_v7 = vrot.slane %v4859_v0, 5  ;;  %v5048_v14 = vshrl.u32 %v4831_v2, 16 }
  0xe4   : > { %v3791_v8 = vld [vmem:[#allocation2 + $0xa4] sm:$0xf]  ;;  %v7125_v9 = vld [vmem:[#allocation2 + $0x28] ss:$0 sps:$4 sm:$0xff]   ;;  %v6872_v10 = vpack.c.bf16 %v624_v1, %v624_v1  ;;  %v5051_v19 = vshll.u32 %v4831_v2, 16  ;;  %v637_v56 = vmax.f32 %v571_v37, 0.0 }
  0xe5   : > { %v6870_v11 = vpack.c.bf16 %v622_v3, %v622_v3  ;;  %v7127_v12 = vld [vmem:[#allocation2 + $0xa8] ss:$0 sps:$4 sm:$0xff]   ;;  %v2275_v15 = vrot.slane %v7125_v9, 3  ;;  %v3767_v16 = vld [vmem:[#allocation2 + $0x24] sm:$0xf]  ;;  %v4862_v27 = vor.u32 %v4861_v7, %v4858_v6  ;;  %v5050_v32 = vrot.slane %v5048_v14, 4 }
  0xe6   : > { %v3768_v17 = vld [vmem:[#allocation2 + $0x28] sm:$0xf]  ;;  %913 = vst.msk [vmem:[#allocation2 + $0x48] sm:$0xf] %vm665_vm1, %v6872_v10  ;;  %v2299_v21 = vrot.slane %v7127_v12, 3  ;;  %v5053_v35 = vrot.slane %v5051_v19, 5  ;;  %v6885_v0 = vpack.c.bf16 %v637_v56, %v637_v56 }
  0xe7   : > { %911 = vst.msk [vmem:[#allocation2 + $0x38] sm:$0xf] %vm665_vm1, %v6870_v11  ;;  %v6696_v22 = vcombine.low %v3767_v16, %v3768_v17  ;;  %v7590_v23 = vld [vmem:[#allocation2 + $0x28] sm:$0xf]  ;;  %2325 = vrot.lane.b32.xlu0 %v2275_v15, %s7406_s9  ;;  %v7593_v25 = vld [vmem:[#allocation2 + $0x18] ss:$0 sps:$4 sm:$0xff]  }
  0xe8   : > { %v3792_v24 = vld [vmem:[#allocation2 + $0xa8] sm:$0xf]  ;;  %v7129_v26 = vld [vmem:[#allocation2 + $0x20] sm:$0xf8]   ;;  %v2300_v29 = vsel %vm2270_vm8, %v2298_v13, %v2299_v21  ;;  %v4865_v33 = vshll.u32 %v7590_v23, 16  ;;  %v2272_v44 = vrot.slane %v7593_v25, 3  ;;  %v5054_v60 = vor.u32 %v5053_v35, %v5050_v32 }
  0xe9   : > { %v6704_v28 = vcombine.low %v3791_v8, %v3792_v24  ;;  %v3959_v30 = vshrl.u32 %v6696_v22, 16  ;;  %v3962_v31 = vshll.u32 %v6696_v22, 16  ;;  %2355 = vrot.lane.b32.xlu1 %v2300_v29, %s7406_s9  ;;  %v7598_v34 = vld [vmem:[#allocation2 + $0xa8] sm:$0xf]  ;;  %v2274_v45 = vrot.slane %v7129_v26, 3 }
  0xea   : > { %v946_v36 = vld [vmem:[#allocation2 + $0x28] sm:$0xf]  ;;  %v945_v46 = vld [vmem:[#allocation2 + $0x24] sm:$0xf]  ;;  %v4863_v49 = vrot.slane %v4862_v27, 4  ;;  %v7609_v54 = vrot.slane %v4865_v33, 5 }
  0xeb   : > { %v3961_v39 = vrot.slane %v3959_v30, 4  ;;  %v3964_v40 = vrot.slane %v3962_v31, 5  ;;  %v4023_v42 = vshrl.u32 %v6704_v28, 16  ;;  %v4026_v43 = vshll.u32 %v6704_v28, 16  ;;  %2357 = vrot.lane.b32.xlu0 %v2299_v21, %s7406_s9  ;;  %v7134_v51 = vld [vmem:[#allocation2 + $0x24] sm:$0xff]  }
  0xec   : > { %v6410_v50 = vcombine.low %v945_v46, %v946_v36  ;;  %v2276_v53 = vsel %vm2270_vm8, %v2274_v45, %v2275_v15  ;;  %v5057_v55 = vshll.u32 %v7598_v34, 16  ;;  %v640_v1 = vmax.f32 %v582_v48, 0.0  ;;  %v7137_v3 = vld [vmem:[#allocation2 + $0xa4] sm:$0xff]   ;;  %926 = vst.msk [vmem:[#allocation2 + $0xb4] sm:$0xf] %vm665_vm1, %v6885_v0 }
  0xed   : > { %2321 = vrot.lane.b32.xlu1 %v2272_v44, %s7406_s9  ;;  %v3965_v57 = vor.u32 %v3964_v40, %v3961_v39  ;;  %v4025_v58 = vrot.slane %v4023_v42, 4  ;;  %v4028_v59 = vrot.slane %v4026_v43, 5  ;;  %v3315_v2 = vshll.u32 %v7134_v51, 16  ;;  %v7138_v7 = vld [vmem:[#allocation2 + $0xac] ss:$0 sps:$4 sm:$0x11]  }
  0xee   : > { %v1147_v62 = vshrl.u32 %v6410_v50, 16  ;;  %v1150_v63 = vshll.u32 %v6410_v50, 16  ;;  %v6888_v6 = vpack.c.bf16 %v640_v1, %v640_v1  ;;  %v638_v8 = vmax.f32 %v574_v52, 0.0  ;;  %v4809_v13 = vld [vmem:[#allocation2 + $0x2c] sm:$0x1]  ;;  %v7142_v1 = vld [vmem:[#allocation2 + $0x14] sm:$0xff]  }
  0xef   : > { %2323 = vrot.lane.b32.xlu0 %v2276_v53, %s7406_s9  ;;  %v4868_v9 = vsel %vm7615_vm11, %v4863_v49, %v7609_v54  ;;  %v4869_v10 = vshrl.u32 %v7590_v23, 16  ;;  %v5055_v11 = vrot.slane %v5054_v60, 4  ;;  %v7625_v12 = vrot.slane %v5057_v55, 5  ;;  %v7133_v17 = vld [vmem:[#allocation2 + $0x98] ss:$0 sps:$4 sm:$0xff]  }
  0xf0   : > { %v4029_v14 = vor.u32 %v4028_v59, %v4025_v58  ;;  %v1149_v15 = vrot.slane %v1147_v62, 4  ;;  %v1152_v16 = vrot.slane %v1150_v63, 5  ;;  %929 = vst.msk [vmem:[#allocation2 + $0xc8] sm:$0xf] %vm665_vm1, %v6888_v6  ;;  %v6886_v19 = vpack.c.bf16 %v638_v8, %v638_v8  ;;  %v4828_v20 = vld [vmem:[#allocation2 + $0x94] sm:$0xf] }
  0xf1   : > { %4086 = vrot.lane.b32.xlu1 %v3965_v57, %s7406_s9  ;;  %v3317_v21 = vrot.slane %v3315_v2, 1  ;;  %v3411_v22 = vshll.u32 %v7137_v3, 16  ;;  %v3322_v23 = vrot.slane %v3320_v5, 1  ;;  %v3416_v24 = vshll.u32 %v7138_v7, 16  ;;  %v7136_v35 = vld [vmem:[#allocation2 + $0x10] sm:$0xf8]  }
  0xf2   : > { %927 = vst.msk [vmem:[#allocation2 + $0xb8] sm:$0xf] %vm665_vm1, %v6886_v19  ;;  %v4875_v26 = vshll.u32 %v4809_v13, 16  ;;  %v5060_v27 = vsel %vm7615_vm11, %v5055_v11, %v7625_v12  ;;  %v3313_v28 = vshrl.u32 %v7134_v51, 16  ;;  %v5024_v29 = vshrl.u32 %v4828_v20, 16 }
  0xf3   : > { %5239 = vrot.lane.b32.xlu0 %v4868_v9, %s7407_s12  ;;  %v5027_v30 = vshll.u32 %v4828_v20, 16  ;;  %v5061_v31 = vshrl.u32 %v7598_v34, 16  ;;  %v1153_v32 = vor.u32 %v1152_v16, %v1149_v15  ;;  %v2296_v33 = vrot.slane %v7133_v17, 3  ;;  %v7139_v39 = vld [vmem:[#allocation2 + $0x90] sm:$0xf8]  }
  0xf4   : > { %v3318_v36 = vor.u32 %v3317_v21, %v3313_v28  ;;  %v3409_v37 = vshrl.u32 %v7137_v3, 16  ;;  %v3413_v38 = vrot.slane %v3411_v22, 1  ;;  %v4871_v40 = vrot.slane %v4869_v10, 4  ;;  %v7637_v42 = vld [vmem:[#allocation2 + $0x98] sm:$0xf]  ;;  %v6994_v3 = vpop.f32.mrf.mxu0 }
  0xf5   : > { %4102 = vrot.lane.b32.xlu1 %v4029_v14, %s7406_s9  ;;  %v969_v43 = vld [vmem:[#allocation2 + $0xa4] sm:$0xf]  ;;  %v5026_v45 = vrot.slane %v5024_v29, 4  ;;  %v5029_v46 = vrot.slane %v5027_v30, 5  ;;  %v970_v47 = vld [vmem:[#allocation2 + $0xa8] sm:$0xf] }
  0xf6   : > { %v3789_v48 = vld [vmem:[#allocation2 + $0x98] sm:$0xf]  ;;  %v2271_v34 = vrot.slane %v7136_v35, 3  ;;  %v3418_v49 = vrot.slane %v3416_v24, 1  ;;  %v4833_v50 = vld [vmem:[#allocation2 + $0xac] sm:$0x1]  ;;  %v3323_v51 = vsel %vm3299_vm12, %v3318_v36, %v3322_v23  ;;  %v3414_v52 = vor.u32 %v3413_v38, %v3409_v37  ;;  %v522_v21 = vpop.f32.mrf.mxu0 }
  0xf7   : > { %5271 = vrot.lane.b32.xlu0 %v5060_v27, %s7407_s12  ;;  %v4872_v53 = vor.u32 %v4871_v40, %v7609_v54  ;;  %v5063_v55 = vrot.slane %v5061_v31, 4  ;;  %v3788_v56 = vld [vmem:[#allocation2 + $0x94] sm:$0xf]  ;;  %v5033_v57 = vshll.u32 %v7637_v42, 16  ;;  %v6418_v58 = vcombine.low %v969_v43, %v970_v47  ;;  %v943_v5 = vld [vmem:[#allocation2 + $0x18] sm:$0xf] }
  0xf8   : > { %v6703_v59 = vcombine.low %v3788_v56, %v3789_v48  ;;  %v2273_v60 = vsel %vm2270_vm8, %v2271_v34, %v2272_v44  ;;  %v2295_v62 = vrot.slane %v7139_v39, 3  ;;  %v4877_v63 = vrot.slane %v4875_v26, 5  ;;  %v7143_v2 = vld [vmem:[#allocation2 + $0x1c] ss:$0 sps:$4 sm:$0x11]   ;;  %v7145_v10 = vld [vmem:[#allocation2 + $0x94] sm:$0xff]   ;;  %v6995_v40 = vpop.f32.mrf.mxu0 }
  0xf9   : > { %1262 = vrot.lane.b32.xlu1 %v1153_v32, %s7406_s9  ;;  %v5030_v0 = vor.u32 %v5029_v46, %v5026_v45  ;;  %v5067_v54 = vshll.u32 %v4833_v50, 16  ;;  %v7146_v6 = vld [vmem:[#allocation2 + $0x9c] ss:$0 sps:$4 sm:$0x11]   ;;  %v3419_v7 = vsel %vm3299_vm12, %v3414_v52, %v3418_v49  ;;  %v4873_v9 = vrot.slane %v4872_v53, 4 }
  0xfa   : > { %v2297_v8 = vsel %vm2270_vm8, %v2295_v62, %v2296_v33  ;;  %v5064_v25 = vor.u32 %v5063_v55, %v7625_v12  ;;  %v7652_v44 = vrot.slane %v5033_v57, 5  ;;  %v1211_v11 = vshrl.u32 %v6418_v58, 16  ;;  %v942_v15 = vld [vmem:[#allocation2 + $0x14] sm:$0xf]  ;;  %v7010_v12 = vpop.f32.mrf.mxu1  ;;  %v967_v29 = vld [vmem:[#allocation2 + $0x98] sm:$0xf] }
  0xfb   : > { %2353 = vrot.lane.b32.xlu0 %v2296_v33, %s7406_s9  ;;  %v1214_v13 = vshll.u32 %v6418_v58, 16  ;;  %v4015_v14 = vshrl.u32 %v6703_v59, 16  ;;  %v5031_v16 = vrot.slane %v5030_v0, 4  ;;  %v4018_v17 = vshll.u32 %v6703_v59, 16  ;;  %v966_v39 = vld [vmem:[#allocation2 + $0x94] sm:$0xf] }
  0xfc   : > { %v3303_v19 = vshll.u32 %v7142_v1, 16  ;;  %v6409_v20 = vcombine.low %v942_v15, %v943_v5  ;;  %v5069_v22 = vrot.slane %v5067_v54, 5  ;;  %v3308_v23 = vshll.u32 %v7143_v2, 16  ;;  %v7663_v47 = vld [vmem:[#allocation2 + $0x9c] sm:$0x1]  ;;  %v586_v48 = vpop.f32.mrf.mxu1 }
  0xfd   : > { %3494 = vrot.lane.b32.xlu1 %v3323_v51, %s7406_s9  ;;  %v3404_v24 = vshll.u32 %v7146_v6, 16  ;;  %v4878_v26 = vsel %vm7615_vm11, %v4873_v9, %v4877_v63  ;;  %v5065_v27 = vrot.slane %v5064_v25, 4  ;;  %v3399_v28 = vshll.u32 %v7145_v10, 16  ;;  %v4813_v55 = vld [vmem:[#allocation2 + $0x44] sm:$0xf]  ;;  %v525_v63 = vpop.f32.mrf.mxu0 }
  0xfe   : > { %v5037_v30 = vshrl.u32 %v7637_v42, 16  ;;  %v1213_v31 = vrot.slane %v1211_v11, 4  ;;  %v1216_v32 = vrot.slane %v1214_v13, 5  ;;  %v4017_v33 = vrot.slane %v4015_v14, 4  ;;  %v7011_v54 = vpop.f32.mrf.mxu1 }
  0xff   : > { %2319 = vrot.lane.b32.xlu0 %v2273_v60, %s7406_s9  ;;  %v5036_v35 = vsel %vm7615_vm11, %v5031_v16, %v7652_v44  ;;  %v4020_v36 = vrot.slane %v4018_v17, 5  ;;  %v3305_v37 = vrot.slane %v3303_v19, 1  ;;  %v1139_v38 = vshrl.u32 %v6409_v20, 16 }
 0x100   : > { %v3310_v43 = vrot.slane %v3308_v23, 1  ;;  %v1142_v45 = vshll.u32 %v6409_v20, 16  ;;  %v6417_v46 = vcombine.low %v966_v39, %v967_v29  ;;  %v531_v42 = vadd.f32 %v6994_v3, %v7556_v4  ;;  %v589_v23 = vpop.f32.mrf.mxu1 }
 0x101   : > { %3510 = vrot.lane.b32.xlu1 %v3419_v7, %s7406_s9  ;;  %v5070_v34 = vsel %vm7615_vm11, %v5065_v27, %v5069_v22  ;;  %v3301_v49 = vshrl.u32 %v7142_v1, 16  ;;  %v3401_v50 = vrot.slane %v3399_v28, 1  ;;  %v3406_v51 = vrot.slane %v3404_v24, 1  ;;  %v7686_v28 = vld [vmem:[#allocation2 + $0x48] sm:$0xf] }
 0x102   : > { %v1217_v52 = vor.u32 %v1216_v32, %v1213_v31  ;;  %v3397_v53 = vshrl.u32 %v7145_v10, 16  ;;  %v523_v56 = vadd.f32 %v7556_v4, %v522_v21  ;;  %v534_v57 = vadd.f32 %v6995_v40, %v7556_v4  ;;  %v4837_v21 = vld [vmem:[#allocation2 + $0xc4] sm:$0xf] }
 0x103   : > { %2351 = vrot.lane.b32.xlu0 %v2297_v8, %s7406_s9  ;;  %v4021_v58 = vor.u32 %v4020_v36, %v4017_v33  ;;  %v3306_v59 = vor.u32 %v3305_v37, %v3301_v49  ;;  %v1141_v60 = vrot.slane %v1139_v38, 4  ;;  %v5039_v62 = vrot.slane %v5037_v30, 4  ;;  %v3773_v36 = vld [vmem:[#allocation2 + $0x44] sm:$0xf]  ;;  %v3774_v37 = vld [vmem:[#allocation2 + $0x48] sm:$0xf] }
 0x104   : > { %v1144_v0 = vrot.slane %v1142_v45, 5  ;;  %v1203_v1 = vshrl.u32 %v6417_v46, 16  ;;  %v1206_v2 = vshll.u32 %v6417_v46, 16  ;;  %v627_v3 = vmax.f32 %v531_v42, 0.0 }
 0x105   : > { %5241 = vrot.lane.b32.xlu1 %v4878_v26, %s7407_s12  ;;  %v3402_v5 = vor.u32 %v3401_v50, %v3397_v53  ;;  %v5043_v6 = vshll.u32 %v7663_v47, 16  ;;  %v4904_v7 = vshrl.u32 %v4813_v55, 16  ;;  %v595_v8 = vadd.f32 %v7010_v12, %v7556_v4  ;;  %v7683_v12 = vld [vmem:[#allocation2 + $0x48] ss:$0 sps:$4 sm:$0xff]  }
 0x106   : > { %v4907_v9 = vshll.u32 %v4813_v55, 16  ;;  %v6875_v25 = vpack.c.bf16 %v627_v3, %v627_v3  ;;  %v526_v10 = vadd.f32 %v7556_v4, %v525_v63  ;;  %v587_v11 = vadd.f32 %v7556_v4, %v586_v48  ;;  %v7698_v55 = vld [vmem:[#allocation2 + $0xc8] sm:$0xf] }
 0x107   : > { %5267 = vrot.lane.b32.xlu0 %v5036_v35, %s7407_s12  ;;  %v3311_v13 = vsel %vm3299_vm12, %v3306_v59, %v3310_v43  ;;  %v5040_v14 = vor.u32 %v5039_v62, %v7652_v44  ;;  %v625_v15 = vmax.f32 %v523_v56, 0.0  ;;  %v598_v16 = vadd.f32 %v7011_v54, %v7556_v4  ;;  %v7150_v43 = vld [vmem:[#allocation2 + $0x40] sm:$0xf8]  }
 0x108   : > { %v1145_v17 = vor.u32 %v1144_v0, %v1141_v60  ;;  %v1205_v19 = vrot.slane %v1203_v1, 4  ;;  %v1208_v20 = vrot.slane %v1206_v2, 5  ;;  %916 = vst.msk [vmem:[#allocation2 + $0x64] sm:$0xf] %vm665_vm1, %v6875_v25  ;;  %v628_v22 = vmax.f32 %v534_v57, 0.0 }
 0x109   : > { %5273 = vrot.lane.b32.xlu1 %v5070_v34, %s7407_s12  ;;  %v3407_v24 = vsel %vm3299_vm12, %v3402_v5, %v3406_v51  ;;  %v4906_v26 = vrot.slane %v4904_v7, 4  ;;  %v6873_v27 = vpack.c.bf16 %v625_v15, %v625_v15  ;;  %v643_v44 = vmax.f32 %v595_v8, 0.0  ;;  %v7149_v34 = vld [vmem:[#allocation2 + $0xc8] ss:$0 sps:$4 sm:$0xff]   ;;  %v7151_v60 = vld [vmem:[#allocation2 + $0xc0] sm:$0xf8]  }
 0x10a   : > { %v4909_v29 = vrot.slane %v4907_v9, 5  ;;  %v6876_v30 = vpack.c.bf16 %v628_v22, %v628_v22  ;;  %v626_v31 = vmax.f32 %v526_v10, 0.0  ;;  %v641_v32 = vmax.f32 %v587_v11, 0.0  ;;  %v7157_v51 = vld [vmem:[#allocation2 + $0x4c] ss:$0 sps:$4 sm:$0x11]  }
 0x10b   : > { %1278 = vrot.lane.b32.xlu0 %v1217_v52, %s7406_s9  ;;  %v5096_v33 = vshrl.u32 %v4837_v21, 16  ;;  %v5099_v35 = vshll.u32 %v4837_v21, 16  ;;  %914 = vst.msk [vmem:[#allocation2 + $0x54] sm:$0xf] %vm665_vm1, %v6873_v27  ;;  %v6891_v38 = vpack.c.bf16 %v643_v44, %v643_v44  ;;  %v590_v39 = vadd.f32 %v7556_v4, %v589_v23  ;;  %v3797_v0 = vld [vmem:[#allocation2 + $0xc4] sm:$0xf] }
 0x10c   : > { %v1209_v40 = vor.u32 %v1208_v20, %v1205_v19  ;;  %917 = vst.msk [vmem:[#allocation2 + $0x68] sm:$0xf] %vm665_vm1, %v6876_v30  ;;  %v6874_v45 = vpack.c.bf16 %v626_v31, %v626_v31  ;;  %v6889_v46 = vpack.c.bf16 %v641_v32, %v641_v32  ;;  %v5041_v47 = vrot.slane %v5040_v14, 4  ;;  %v3798_v1 = vld [vmem:[#allocation2 + $0xc8] sm:$0xf] }
 0x10d   : > { %4100 = vrot.lane.b32.xlu1 %v4021_v58, %s7406_s9  ;;  %v5045_v42 = vrot.slane %v5043_v6, 5  ;;  %932 = vst.msk [vmem:[#allocation2 + $0xe4] sm:$0xf] %vm665_vm1, %v6891_v38  ;;  %v2281_v48 = vrot.slane %v7683_v12, 3  ;;  %v4913_v49 = vshll.u32 %v7686_v28, 16  ;;  %v6698_v50 = vcombine.low %v3773_v36, %v3774_v37  ;;  %v7156_v14 = vld [vmem:[#allocation2 + $0x44] sm:$0xff]  }
 0x10e   : > { %915 = vst.msk [vmem:[#allocation2 + $0x58] sm:$0xf] %vm665_vm1, %v6874_v45  ;;  %930 = vst.msk [vmem:[#allocation2 + $0xd4] sm:$0xf] %vm665_vm1, %v6889_v46  ;;  %v644_v52 = vmax.f32 %v598_v16, 0.0  ;;  %v4910_v53 = vor.u32 %v4909_v29, %v4906_v26  ;;  %v5098_v56 = vrot.slane %v5096_v33, 4  ;;  %v6706_v25 = vcombine.low %v3797_v0, %v3798_v1 }
 0x10f   : > { %3492 = vrot.lane.b32.xlu0 %v3311_v13, %s7406_s9  ;;  %v5101_v57 = vrot.slane %v5099_v35, 5  ;;  %v642_v58 = vmax.f32 %v590_v39, 0.0  ;;  %v2280_v59 = vrot.slane %v7150_v43, 3  ;;  %v5046_v63 = vsel %vm7615_vm11, %v5041_v47, %v5045_v42  ;;  %v7160_v16 = vld [vmem:[#allocation2 + $0xcc] ss:$0 sps:$4 sm:$0x11]  }
 0x110   : > { %v6892_v62 = vpack.c.bf16 %v644_v52, %v644_v52  ;;  %v2305_v3 = vrot.slane %v7149_v34, 3  ;;  %v7704_v54 = vrot.slane %v4913_v49, 5  ;;  %v5105_v5 = vshll.u32 %v7698_v55, 16  ;;  %v4815_v22 = vld [vmem:[#allocation2 + $0x4c] sm:$0x1]  ;;  %v7159_v30 = vld [vmem:[#allocation2 + $0xc4] sm:$0xff]  }
 0x111   : > { %1260 = vrot.lane.b32.xlu1 %v1145_v17, %s7406_s9  ;;  %v6890_v2 = vpack.c.bf16 %v642_v58, %v642_v58  ;;  %v3975_v6 = vshrl.u32 %v6698_v50, 16  ;;  %v4911_v7 = vrot.slane %v4910_v53, 4  ;;  %v5102_v8 = vor.u32 %v5101_v57, %v5098_v56  ;;  %v4839_v26 = vld [vmem:[#allocation2 + $0xcc] sm:$0x1]  ;;  %v4810_v31 = vld [vmem:[#allocation2 + $0x34] sm:$0xf] }
 0x112   : > { %933 = vst.msk [vmem:[#allocation2 + $0xe8] sm:$0xf] %vm665_vm1, %v6892_v62  ;;  %v3978_v9 = vshll.u32 %v6698_v50, 16  ;;  %v3344_v10 = vshll.u32 %v7157_v51, 16  ;;  %v2282_v11 = vsel %vm2270_vm8, %v2280_v59, %v2281_v48  ;;  %v2304_v13 = vrot.slane %v7151_v60, 3 }
 0x113   : > { %3508 = vrot.lane.b32.xlu0 %v3407_v24, %s7406_s9  ;;  %931 = vst.msk [vmem:[#allocation2 + $0xd8] sm:$0xf] %vm665_vm1, %v6890_v2  ;;  %v7712_v15 = vrot.slane %v5105_v5, 5  ;;  %v4916_v17 = vsel %vm7615_vm11, %v4911_v7, %v7704_v54  ;;  %v5103_v19 = vrot.slane %v5102_v8, 4  ;;  %v3977_v20 = vrot.slane %v3975_v6, 4 }
 0x114   : > { %v3980_v21 = vrot.slane %v3978_v9, 5  ;;  %v4039_v23 = vshrl.u32 %v6706_v25, 16  ;;  %v4042_v24 = vshll.u32 %v6706_v25, 16  ;;  %v3346_v12 = vrot.slane %v3344_v10, 1  ;;  %v7153_v32 = vld [vmem:[#allocation2 + $0x38] ss:$0 sps:$4 sm:$0xff]  }
 0x115   : > { %1276 = vrot.lane.b32.xlu1 %v1209_v40, %s7406_s9  ;;  %v7718_v27 = vld [vmem:[#allocation2 + $0x3c] ss:$0 sps:$4 sm:$0x11]   ;;  %v2306_v44 = vsel %vm2270_vm8, %v2304_v13, %v2305_v3  ;;  %v3339_v29 = vshll.u32 %v7156_v14, 16  ;;  %v3440_v33 = vshll.u32 %v7160_v16, 16  ;;  %v4923_v35 = vshll.u32 %v4815_v22, 16 }
 0x116   : > { %v4917_v36 = vshrl.u32 %v7686_v28, 16  ;;  %v5108_v37 = vsel %vm7615_vm11, %v5103_v19, %v7712_v15  ;;  %v3981_v38 = vor.u32 %v3980_v21, %v3977_v20  ;;  %v5115_v39 = vshll.u32 %v4839_v26, 16  ;;  %v7729_v49 = vld [vmem:[#allocation2 + $0xb8] ss:$0 sps:$4 sm:$0xff]   ;;  %v7158_v50 = vld [vmem:[#allocation2 + $0x30] sm:$0xf8]   ;;  %v6998_v21 = vpop.f32.mrf.mxu0 }
 0x117   : > { %2333 = vrot.lane.b32.xlu0 %v2281_v48, %s7406_s9  ;;  %v4041_v40 = vrot.slane %v4039_v23, 4  ;;  %v4044_v43 = vrot.slane %v4042_v24, 5  ;;  %v4880_v45 = vshrl.u32 %v4810_v31, 16  ;;  %v4883_v46 = vshll.u32 %v4810_v31, 16  ;;  %v4834_v58 = vld [vmem:[#allocation2 + $0xb4] sm:$0xf] }
 0x118   : > { %v5109_v47 = vshrl.u32 %v7698_v55, 16  ;;  %v3337_v42 = vshrl.u32 %v7156_v14, 16  ;;  %v3341_v48 = vrot.slane %v3339_v29, 1  ;;  %v3435_v34 = vshll.u32 %v7159_v30, 16  ;;  %v7161_v60 = vld [vmem:[#allocation2 + $0xb0] sm:$0xf8]  }
 0x119   : > { %5269 = vrot.lane.b32.xlu1 %v5046_v63, %s7407_s12  ;;  %v2278_v28 = vrot.slane %v7153_v32, 3  ;;  %v3332_v51 = vshll.u32 %v7718_v27, 16  ;;  %v3442_v52 = vrot.slane %v3440_v33, 1  ;;  %v4919_v53 = vrot.slane %v4917_v36, 4  ;;  %v7737_v2 = vld [vmem:[#allocation2 + $0x38] sm:$0xf] }
 0x11a   : > { %v7732_v56 = vrot.slane %v4923_v35, 5  ;;  %v7734_v57 = vrot.slane %v5115_v39, 5  ;;  %v4045_v55 = vor.u32 %v4044_v43, %v4041_v40  ;;  %v3433_v59 = vshrl.u32 %v7159_v30, 16  ;;  %v727_v9 = vld [vmem:[#allocation2 + $0xe0] sm:$0x8]  ;;  %v538_v39 = vpop.f32.mrf.mxu0 }
 0x11b   : > { %2365 = vrot.lane.b32.xlu0 %v2305_v3, %s7406_s9  ;;  %v4882_v62 = vrot.slane %v4880_v45, 4  ;;  %v4885_v63 = vrot.slane %v4883_v46, 5  ;;  %v3342_v0 = vor.u32 %v3341_v48, %v3337_v42  ;;  %v3437_v1 = vrot.slane %v3435_v34, 1  ;;  %v7742_v10 = vld [vmem:[#allocation2 + $0xb8] sm:$0xf] }
 0x11c   : > { %v5111_v3 = vrot.slane %v5109_v47, 4  ;;  %v2302_v5 = vrot.slane %v7729_v49, 3  ;;  %v2277_v6 = vrot.slane %v7158_v50, 3  ;;  %v5072_v7 = vshrl.u32 %v4834_v58, 16  ;;  %v3771_v13 = vld [vmem:[#allocation2 + $0x38] sm:$0xf] }
 0x11d   : > { %2331 = vrot.lane.b32.xlu1 %v2282_v11, %s7406_s9  ;;  %v5075_v8 = vshll.u32 %v4834_v58, 16  ;;  %v4920_v25 = vor.u32 %v4919_v53, %v7704_v54  ;;  %v3770_v11 = vld [vmem:[#allocation2 + $0x34] sm:$0xf]  ;;  %v2301_v14 = vrot.slane %v7161_v60, 3  ;;  %v4886_v16 = vor.u32 %v4885_v63, %v4882_v62  ;;  %v951_v19 = vld [vmem:[#allocation2 + $0x44] sm:$0xf]  ;;  %v6999_v62 = vpop.f32.mrf.mxu0 }
 0x11e   : > { %v952_v20 = vld [vmem:[#allocation2 + $0x48] sm:$0xf]  ;;  %v3347_v22 = vsel %vm3299_vm12, %v3342_v0, %v3346_v12  ;;  %v3438_v23 = vor.u32 %v3437_v1, %v3433_v59  ;;  %v5112_v24 = vor.u32 %v5111_v3, %v7712_v15  ;;  %v3794_v26 = vld [vmem:[#allocation2 + $0xb4] sm:$0xf]  ;;  %v3795_v54 = vld [vmem:[#allocation2 + $0xb8] sm:$0xf]  ;;  %v547_v32 = vadd.f32 %v6998_v21, %v7556_v4 }
 0x11f   : > { %5247 = vrot.lane.b32.xlu0 %v4916_v17, %s7407_s12  ;;  %v4889_v17 = vshll.u32 %v7737_v2, 16  ;;  %v5074_v29 = vrot.slane %v5072_v7, 4  ;;  %v5077_v30 = vrot.slane %v5075_v8, 5  ;;  %v672_v31 = vld [vmem:[#allocation2 + $0xc] sm:$0x1]  ;;  %v4921_v33 = vrot.slane %v4920_v25, 4 }
 0x120   : > { %v5081_v35 = vshll.u32 %v7742_v10, 16  ;;  %v6697_v36 = vcombine.low %v3770_v11, %v3771_v13  ;;  %v728_v12 = vsel %vm7510_vm4, 0, %v727_v9  ;;  %v4887_v15 = vrot.slane %v4886_v16, 4  ;;  %v976_v4 = vld [vmem:[#allocation2 + $0xc8] sm:$0xf] }
 0x121   : > { %2363 = vrot.lane.b32.xlu1 %v2306_v44, %s7406_s9  ;;  %v2279_v44 = vsel %vm2270_vm8, %v2277_v6, %v2278_v28  ;;  %729 = vst [vmem:[#allocation2 + $0xe0] sm:$0x8] %v728_v12  ;;  %v3443_v40 = vsel %vm3299_vm12, %v3438_v23, %v3442_v52  ;;  %v5113_v43 = vrot.slane %v5112_v24, 4  ;;  %v6412_v45 = vcombine.low %v951_v19, %v952_v20  ;;  %v700_v53 = vld [vmem:[#allocation2 + $0x50] sm:$0x8] }
 0x122   : > { %v673_v46 = vsel %vm7523_vm7, 0, %v672_v31  ;;  %v2303_v47 = vsel %vm2270_vm8, %v2301_v14, %v2302_v5  ;;  %v5078_v42 = vor.u32 %v5077_v30, %v5074_v29  ;;  %v6705_v48 = vcombine.low %v3794_v26, %v3795_v54  ;;  %v757_v60 = vld [vmem:[#allocation2 + $0x6c] sm:$0x1]  ;;  %v948_v3 = vld [vmem:[#allocation2 + $0x34] sm:$0xf]  ;;  %v7014_v14 = vpop.f32.mrf.mxu1 }
 0x123   : > { %5279 = vrot.lane.b32.xlu0 %v5108_v37, %s7407_s12  ;;  %v7755_v37 = vrot.slane %v4889_v17, 5  ;;  %v7764_v34 = vrot.slane %v3332_v51, 1  ;;  %674 = vst [vmem:[#allocation2 + $0xc] sm:$0x1] %v673_v46  ;;  %v7769_v49 = vrot.slane %v5081_v35, 5  ;;  %v3967_v50 = vshrl.u32 %v6697_v36, 16 }
 0x124   : > { %v631_v52 = vmax.f32 %v547_v32, 0.0  ;;  %v7777_v51 = vld [vmem:[#allocation2 + $0x34] sm:$0xff]   ;;  %v5118_v63 = vsel %vm7615_vm11, %v5113_v43, %v7734_v57  ;;  %v1163_v0 = vshrl.u32 %v6412_v45, 16  ;;  %v1166_v1 = vshll.u32 %v6412_v45, 16  ;;  %v724_v13 = vld [vmem:[#allocation2 + $0xd0] sm:$0x8] }
 0x125   : > { %4090 = vrot.lane.b32.xlu1 %v3981_v38, %s7406_s9  ;;  %v975_v38 = vld [vmem:[#allocation2 + $0xc4] sm:$0xf]  ;;  %v4892_v58 = vsel %vm7615_vm11, %v4887_v15, %v7755_v37  ;;  %v5079_v7 = vrot.slane %v5078_v42, 4  ;;  %v4031_v8 = vshrl.u32 %v6705_v48, 16  ;;  %v701_v11 = vsel %vm7510_vm4, 0, %v700_v53  ;;  %v602_v15 = vpop.f32.mrf.mxu1 }
 0x126   : > { %v7775_v27 = vcombine.low %v975_v38, %v976_v4  ;;  %v6879_v6 = vpack.c.bf16 %v631_v52, %v631_v52  ;;  %v7789_v9 = vld [vmem:[#allocation2 + $0xbc] ss:$0 sps:$4 sm:$0x11]   ;;  %v3969_v16 = vrot.slane %v3967_v50, 4  ;;  %v4034_v17 = vshll.u32 %v6705_v48, 16  ;;  %v541_v52 = vpop.f32.mrf.mxu0 }
 0x127   : > { %2329 = vrot.lane.b32.xlu0 %v2278_v28, %s7406_s9  ;;  %v4926_v28 = vsel %vm7615_vm11, %v4921_v33, %v7732_v56  ;;  %v7782_v56 = vld [vmem:[%s10564_s2] ss:$0 sm:$0xff]  ;;  %702 = vst [vmem:[#allocation2 + $0x50] sm:$0x8] %v701_v11  ;;  %v758_v57 = vsel %vm7523_vm7, 0, %v757_v60  ;;  %v1165_v54 = vrot.slane %v1163_v0, 4  ;;  %v5084_v32 = vsel %vm7615_vm11, %v5079_v7, %v7769_v49 }
 0x128   : > { %v539_v59 = vadd.f32 %v7782_v56, %v538_v39  ;;  %920 = vst.msk [vmem:[#allocation2 + $0x84] sm:$0xf] %vm665_vm1, %v6879_v6  ;;  %v550_v19 = vadd.f32 %v7782_v56, %v6999_v62  ;;  %v1227_v21 = vshrl.u32 %v7775_v27, 16  ;;  %v972_v23 = vld [vmem:[#allocation2 + $0xb4] sm:$0xf]  ;;  %v725_v31 = vsel %vm7510_vm4, 0, %v724_v13 }
 0x129   : > { %4106 = vrot.lane.b32.xlu1 %v4045_v55, %s7406_s9  ;;  %v3970_v55 = vshll.u32 %v6697_v36, 16  ;;  %v973_v24 = vld [vmem:[#allocation2 + $0xb8] sm:$0xf]  ;;  %759 = vst [vmem:[#allocation2 + $0x6c] sm:$0x1] %v758_v57  ;;  %v1230_v33 = vshll.u32 %v7775_v27, 16  ;;  %v611_v50 = vadd.f32 %v7782_v56, %v7014_v14  ;;  %v542_v6 = vadd.f32 %v7782_v56, %v541_v52 }
 0x12a   : > { %v629_v25 = vmax.f32 %v539_v59, 0.0  ;;  %v739_v29 = vld [vmem:[#allocation2 + $0xc] sm:$0x1]  ;;  %v632_v30 = vmax.f32 %v550_v19, 0.0  ;;  %v3327_v35 = vshll.u32 %v7777_v51, 16  ;;  %v7807_v36 = vld [vmem:[#allocation2 + $0xb4] sm:$0xff]   ;;  %v7015_v59 = vpop.f32.mrf.mxu1 }
 0x12b   : > { %2361 = vrot.lane.b32.xlu0 %v2302_v5, %s7406_s9  ;;  %v949_v5 = vld [vmem:[#allocation2 + $0x38] sm:$0xf]  ;;  %v3972_v20 = vrot.slane %v3970_v55, 5  ;;  %v740_v12 = vsel %vm7523_vm7, 0, %v739_v29  ;;  %726 = vst [vmem:[#allocation2 + $0xd0] sm:$0x8] %v725_v31  ;;  %v614_v19 = vadd.f32 %v7782_v56, %v7015_v59 }
 0x12c   : > { %v6877_v26 = vpack.c.bf16 %v629_v25, %v629_v25  ;;  %v4033_v38 = vrot.slane %v4031_v8, 4  ;;  %v4036_v39 = vrot.slane %v4034_v17, 5  ;;  %741 = vst [vmem:[#allocation2 + $0xc] sm:$0x1] %v740_v12  ;;  %v6880_v43 = vpack.c.bf16 %v632_v30, %v632_v30  ;;  %v763_v8 = vld [vmem:[#allocation2 + $0x8c] sm:$0x1]  ;;  %v605_v14 = vpop.f32.mrf.mxu1 }
 0x12d   : > { %3498 = vrot.lane.b32.xlu1 %v3347_v22, %s7406_s9  ;;  %v6411_v22 = vcombine.low %v948_v3, %v949_v5  ;;  %v3973_v45 = vor.u32 %v3972_v20, %v3969_v16  ;;  %v4893_v42 = vshrl.u32 %v7737_v2, 16  ;;  %v1232_v53 = vrot.slane %v1230_v33, 5  ;;  %v4812_v3 = vld [vmem:[#allocation2 + $0x3c] sm:$0x1]  ;;  %v4819_v57 = vld [vmem:[#allocation2 + $0x64] sm:$0xf] }
 0x12e   : > { %918 = vst.msk [vmem:[#allocation2 + $0x74] sm:$0xf] %vm665_vm1, %v6877_v26  ;;  %921 = vst.msk [vmem:[#allocation2 + $0x88] sm:$0xf] %vm665_vm1, %v6880_v43  ;;  %v3329_v55 = vrot.slane %v3327_v35, 1  ;;  %v3423_v27 = vshll.u32 %v7807_v36, 16  ;;  %v4037_v62 = vor.u32 %v4036_v39, %v4033_v38  ;;  %v606_v29 = vadd.f32 %v7782_v56, %v605_v14 }
 0x12f   : > { %2327 = vrot.lane.b32.xlu0 %v2279_v44, %s7406_s9  ;;  %v1168_v44 = vrot.slane %v1166_v1, 5  ;;  %v1155_v4 = vshrl.u32 %v6411_v22, 16  ;;  %v1158_v46 = vshll.u32 %v6411_v22, 16  ;;  %v5085_v60 = vshrl.u32 %v7742_v10, 16  ;;  %v4836_v26 = vld [vmem:[#allocation2 + $0xbc] sm:$0x1] }
 0x130   : > { %v647_v5 = vmax.f32 %v611_v50, 0.0  ;;  %v3421_v7 = vshrl.u32 %v7807_v36, 16  ;;  %v3425_v11 = vrot.slane %v3423_v27, 1  ;;  %v4899_v17 = vshll.u32 %v4812_v3, 16  ;;  %v781_v52 = vld [vmem:[#allocation2 + $0xec] sm:$0x1]  ;;  %v7854_v3 = vpop.permute.xlu1 %1258 }
 0x131   : > { %3514 = vrot.lane.b32.xlu1 %v3443_v40, %s7406_s9  ;;  %v6419_v40 = vcombine.low %v972_v23, %v973_v24  ;;  %v1169_v48 = vor.u32 %v1168_v44, %v1165_v54  ;;  %v1157_v0 = vrot.slane %v1155_v4, 4  ;;  %v1160_v1 = vrot.slane %v1158_v46, 5  ;;  %v7174_v46 = vld [vmem:[#allocation2 + $0x60] sm:$0xf8]   ;;  %v7173_v27 = vld [vmem:[#allocation2 + $0xe8] ss:$0 sps:$4 sm:$0xff]  }
 0x132   : > { %v6895_v13 = vpack.c.bf16 %v647_v5, %v647_v5  ;;  %v764_v22 = vsel %vm7523_vm7, 0, %v763_v8  ;;  %v630_v23 = vmax.f32 %v542_v6, 0.0  ;;  %v5087_v54 = vrot.slane %v5085_v60, 4  ;;  %v7175_v5 = vld [vmem:[#allocation2 + $0xe0] sm:$0xf8]  }
 0x133   : > { %2359 = vrot.lane.b32.xlu0 %v2303_v47, %s7406_s9  ;;  %v3428_v47 = vshll.u32 %v7789_v9, 16  ;;  %v1219_v2 = vshrl.u32 %v6419_v40, 16  ;;  %v603_v9 = vadd.f32 %v7782_v56, %v602_v15  ;;  %v1161_v20 = vor.u32 %v1160_v1, %v1157_v0  ;;  %765 = vst [vmem:[#allocation2 + $0x8c] sm:$0x1] %v764_v22  ;;  %v3803_v0 = vld [vmem:[#allocation2 + $0xe4] sm:$0xf] }
 0x134   : > { %936 = vst.msk [vmem:[#allocation2 + $0x104] sm:$0xf] %vm665_vm1, %v6895_v13  ;;  %v3426_v31 = vor.u32 %v3425_v11, %v3421_v7  ;;  %v6878_v33 = vpack.c.bf16 %v630_v23, %v630_v23  ;;  %v4952_v35 = vshrl.u32 %v4819_v57, 16  ;;  %v4955_v36 = vshll.u32 %v4819_v57, 16  ;;  %v3804_v6 = vld [vmem:[#allocation2 + $0xe8] sm:$0xf] }
 0x135   : > { %5249 = vrot.lane.b32.xlu1 %v4926_v28, %s7407_s12  ;;  %v1229_v28 = vrot.slane %v1227_v21, 4  ;;  %v1221_v16 = vrot.slane %v1219_v2, 4  ;;  %v645_v44 = vmax.f32 %v603_v9, 0.0  ;;  %v648_v15 = vmax.f32 %v614_v19, 0.0  ;;  %v778_v9 = vld [vmem:[#allocation2 + $0xdc] sm:$0x1] }
 0x136   : > { %v4901_v38 = vrot.slane %v4899_v17, 5  ;;  %v5091_v39 = vshll.u32 %v4836_v26, 16  ;;  %919 = vst.msk [vmem:[#allocation2 + $0x78] sm:$0xf] %vm665_vm1, %v6878_v33  ;;  %v646_v43 = vmax.f32 %v606_v29, 0.0  ;;  %v782_v1 = vsel %vm7523_vm7, 0, %v781_v52 }
 0x137   : > { %5243 = vrot.lane.b32.xlu0 %v4892_v58, %s7407_s12  ;;  %v3325_v58 = vshrl.u32 %v7777_v51, 16  ;;  %v4895_v51 = vrot.slane %v4893_v42, 4  ;;  %v1233_v10 = vor.u32 %v1232_v53, %v1229_v28  ;;  %v6893_v12 = vpack.c.bf16 %v645_v44, %v645_v44  ;;  %v3779_v28 = vld [vmem:[#allocation2 + $0x64] sm:$0xf]  ;;  %783 = vst [vmem:[#allocation2 + $0xec] sm:$0x1] %v782_v1  ;;  %v7872_v44 = vpop.permute.xlu1 %4116 }
 0x138   : > { %v4954_v42 = vrot.slane %v4952_v35, 4  ;;  %v6894_v50 = vpack.c.bf16 %v646_v43, %v646_v43  ;;  %v2311_v11 = vrot.slane %v7173_v27, 3  ;;  %v6708_v17 = vcombine.low %v3803_v0, %v3804_v6  ;;  %v709_v57 = vld [vmem:[#allocation2 + $0x80] sm:$0x8]  ;;  %10656 = vst [vmem:[#allocation5_spill] sm:$0xff] %v7872_v44 }
 0x139   : > { %5281 = vrot.lane.b32.xlu1 %v5118_v63, %s7407_s12  ;;  %v1222_v63 = vshll.u32 %v6419_v40, 16  ;;  %v3330_v25 = vor.u32 %v3329_v55, %v3325_v58  ;;  %v4896_v24 = vor.u32 %v4895_v51, %v7755_v37  ;;  %v5088_v40 = vor.u32 %v5087_v54, %v7769_v49  ;;  %934 = vst.msk [vmem:[#allocation2 + $0xf4] sm:$0xf] %vm665_vm1, %v6893_v12  ;;  %v3780_v49 = vld [vmem:[#allocation2 + $0x68] sm:$0xf] }
 0x13a   : > { %v5093_v55 = vrot.slane %v5091_v39, 5  ;;  %935 = vst.msk [vmem:[#allocation2 + $0xf8] sm:$0xf] %vm665_vm1, %v6894_v50  ;;  %v2286_v51 = vrot.slane %v7174_v46, 3  ;;  %v2310_v23 = vrot.slane %v7175_v5, 3  ;;  %v4058_v12 = vshll.u32 %v6708_v17, 16 }
 0x13b   : > { %5275 = vrot.lane.b32.xlu0 %v5084_v32, %s7407_s12  ;;  %v1224_v21 = vrot.slane %v1222_v63, 5  ;;  %v3335_v30 = vsel %vm3299_vm12, %v3330_v25, %v7764_v34  ;;  %v3430_v32 = vrot.slane %v3428_v47, 1  ;;  %v4897_v56 = vrot.slane %v4896_v24, 4  ;;  %v7842_v47 = vld [vmem:[#allocation2 + $0x68] sm:$0xf] }
 0x13c   : > { %v6896_v34 = vpack.c.bf16 %v648_v15, %v648_v15  ;;  %v5089_v58 = vrot.slane %v5088_v40, 4  ;;  %v4961_v60 = vshll.u32 %v7842_v47, 16  ;;  %v6700_v63 = vcombine.low %v3779_v28, %v3780_v49  ;;  %v4816_v24 = vld [vmem:[#allocation2 + $0x54] sm:$0xf]  ;;  %v733_v26 = vld [vmem:[#allocation2 + $0x100] sm:$0x8] }
 0x13d   : > { %4088 = vrot.lane.b32.xlu1 %v3973_v45, %s7406_s9  ;;  %v1225_v37 = vor.u32 %v1224_v21, %v1221_v16  ;;  %v7172_v45 = vld [vmem:[#allocation2 + $0x68] ss:$0 sps:$4 sm:$0xff]   ;;  %v3431_v4 = vsel %vm3299_vm12, %v3426_v31, %v3430_v32  ;;  %v4902_v53 = vsel %vm7615_vm11, %v4897_v56, %v4901_v38  ;;  %v779_v21 = vsel %vm7523_vm7, 0, %v778_v9  ;;  %v7877_v31 = vld [vmem:[#allocation2 + $0xd8] ss:$0 sps:$4 sm:$0xff]  }
 0x13e   : > { %937 = vst.msk [vmem:[#allocation2 + $0x108] sm:$0xf] %vm665_vm1, %v6896_v34  ;;  %v2287_v59 = vrot.slane %v7172_v45, 3  ;;  %v5094_v7 = vsel %vm7615_vm11, %v5089_v58, %v5093_v55  ;;  %v7861_v13 = vrot.slane %v4961_v60, 5  ;;  %v3991_v16 = vshrl.u32 %v6700_v63, 16 }
 0x13f   : > { %1266 = vrot.lane.b32.xlu0 %v1169_v48, %s7406_s9  ;;  %v4957_v48 = vrot.slane %v4955_v36, 5  ;;  %v3994_v19 = vshll.u32 %v6700_v63, 16  ;;  %780 = vst [vmem:[#allocation2 + $0xdc] sm:$0x1] %v779_v21  ;;  %v4965_v29 = vshrl.u32 %v7842_v47, 16  ;;  %v710_v32 = vsel %vm7510_vm4, 0, %v709_v57 }
 0x140   : > { %v2288_v22 = vsel %vm2270_vm8, %v2286_v51, %v2287_v59  ;;  %v3993_v35 = vrot.slane %v3991_v16, 4  ;;  %v4055_v36 = vshrl.u32 %v6708_v17, 16  ;;  %711 = vst [vmem:[#allocation2 + $0x80] sm:$0x8] %v710_v32  ;;  %v4928_v38 = vshrl.u32 %v4816_v24, 16 }
 0x141   : > { %4104 = vrot.lane.b32.xlu1 %v4037_v62, %s7406_s9  ;;  %v754_v62 = vld [vmem:[#allocation2 + $0x5c] sm:$0x1]  ;;  %v4958_v2 = vor.u32 %v4957_v48, %v4954_v42  ;;  %v3996_v15 = vrot.slane %v3994_v19, 5  ;;  %v734_v39 = vsel %vm7510_vm4, 0, %v733_v26  ;;  %v2312_v56 = vsel %vm2270_vm8, %v2310_v23, %v2311_v11  ;;  %v7185_v42 = vld [vmem:[#allocation2 + $0x50] sm:$0xf8]  }
 0x142   : > { %v755_v8 = vsel %vm7523_vm7, 0, %v754_v62  ;;  %v7187_v40 = vld [vmem:[#allocation2 + $0x6c] ss:$0 sps:$4 sm:$0x11]   ;;  %v4931_v34 = vshll.u32 %v4816_v24, 16  ;;  %v2308_v46 = vrot.slane %v7877_v31, 3 }
 0x143   : > { %1282 = vrot.lane.b32.xlu0 %v1233_v10, %s7406_s9  ;;  %v7301_v10 = vld [vmem:[#allocation2 + $0x8] sm:$0xf]  ;;  %756 = vst [vmem:[#allocation2 + $0x5c] sm:$0x1] %v755_v8  ;;  %v4959_v14 = vrot.slane %v4958_v2, 4  ;;  %v4057_v47 = vrot.slane %v4055_v36, 4  ;;  %v3997_v49 = vor.u32 %v3996_v15, %v3993_v35 }
 0x144   : > { %v6377_v25 = vcombine.low %v7301_v10, %v7301_v10  ;;  %735 = vst [vmem:[#allocation2 + $0x100] sm:$0x8] %v734_v39  ;;  %v3776_v48 = vld [vmem:[#allocation2 + $0x54] sm:$0xf]  ;;  %v4060_v52 = vrot.slane %v4058_v12, 5  ;;  %v3368_v27 = vshll.u32 %v7187_v40, 16 }
 0x145   : > { %1264 = vrot.lane.b32.xlu1 %v1161_v20, %s7406_s9  ;;  %v7864_v20 = vld [vmem:[#allocation2 + $0x64] sm:$0xff]   ;;  %v4964_v33 = vsel %vm7615_vm11, %v4959_v14, %v7861_v13  ;;  %v4840_v28 = vld [vmem:[#allocation2 + $0xd4] sm:$0xf]  ;;  %v938_v55 = vld [vmem:[#allocation2] sm:$0x8]  ;;  %v4930_v62 = vrot.slane %v4928_v38, 4 }
 0x146   : > { %v1295_v54 = vsel %vm1290_vm13, %v6377_v25, %v7854_v3  ;;  %v7900_v60 = vld [vmem:[#allocation2 + $0x58] sm:$0xf]  ;;  %v4933_v2 = vrot.slane %v4931_v34, 5  ;;  %v7188_v1 = vld [vmem:[#allocation2 + $0xd0] sm:$0xf8]   ;;  %v5120_v51 = vshrl.u32 %v4840_v28, 16  ;;  %v4061_v10 = vor.u32 %v4060_v52, %v4057_v47 }
 0x147   : > { %3496 = vrot.lane.b32.xlu0 %v3335_v30, %s7406_s9  ;;  %v7875_v30 = vld [vmem:[#allocation2 + $0x58] ss:$0 sps:$4 sm:$0xff]   ;;  %v4821_v5 = vld [vmem:[#allocation2 + $0x6c] sm:$0x1]  ;;  %v5123_v8 = vshll.u32 %v4840_v28, 16  ;;  %v3370_v17 = vrot.slane %v3368_v27, 1 }
 0x148   : > { %v2284_v45 = vrot.slane %v7875_v30, 3  ;;  %v3777_v63 = vld [vmem:[#allocation2 + $0x58] sm:$0xf]  ;;  %v4971_v19 = vshll.u32 %v4821_v5, 16  ;;  %v2307_v23 = vrot.slane %v7188_v1, 3  ;;  %v4934_v24 = vor.u32 %v4933_v2, %v4930_v62 }
 0x149   : > { %1280 = vrot.lane.b32.xlu1 %v1225_v37, %s7406_s9  ;;  %v3363_v37 = vshll.u32 %v7864_v20, 16  ;;  %v6699_v25 = vcombine.low %v3776_v48, %v3777_v63  ;;  %v3801_v14 = vld [vmem:[#allocation2 + $0xd8] sm:$0xf]  ;;  %v4937_v26 = vshll.u32 %v7900_v60, 16  ;;  %v958_v30 = vld [vmem:[#allocation2 + $0x68] sm:$0xf] }
 0x14a   : > { %v5125_v35 = vrot.slane %v5123_v8, 5  ;;  %v954_v36 = vld [vmem:[#allocation2 + $0x54] sm:$0xf]  ;;  %v955_v12 = vld [vmem:[#allocation2 + $0x58] sm:$0xf]  ;;  %v4973_v40 = vrot.slane %v4971_v19, 5  ;;  %v2309_v48 = vsel %vm2270_vm8, %v2307_v23, %v2308_v46 }
 0x14b   : > { %3512 = vrot.lane.b32.xlu0 %v3431_v4, %s7406_s9  ;;  %v7893_v4 = vcombine.low %v1295_v54, %v1295_v54  ;;  %v3365_v58 = vrot.slane %v3363_v37, 1  ;;  %v7916_v54 = vld [vmem:[#allocation2 + $0xd8] sm:$0xf]  ;;  %v3983_v37 = vshrl.u32 %v6699_v25, 16  ;;  %v3986_v38 = vshll.u32 %v6699_v25, 16  ;;  %v7198_v19 = vld [vmem:[#allocation2 + $0xe4] sm:$0xff]  }
 0x14c   : > { %v981_v47 = vld [vmem:[#allocation2 + $0xe4] sm:$0xf]  ;;  %v4935_v28 = vrot.slane %v4934_v24, 4  ;;  %v982_v52 = vld [vmem:[#allocation2 + $0xe8] sm:$0xf]  ;;  %v6413_v2 = vcombine.low %v954_v36, %v955_v12  ;;  %vm1885_vm1 = vcmask 60416  }
 0x14d   : > { %5245 = vrot.lane.b32.xlu1 %v4902_v53, %s7407_s12  ;;  %v3361_v53 = vshrl.u32 %v7864_v20, 16  ;;  %v1516_v6 = vshrl.u32 %v7893_v4, 16  ;;  %v7302_v20 = vld [vmem:[#allocation2 + $0x4] sm:$0xf]  ;;  %v3988_v62 = vrot.slane %v3986_v38, 5  ;;  %v6422_v1 = vcombine.low %v981_v47, %v982_v52 }
 0x14e   : > { %v6376_v21 = vcombine.low %v938_v55, %v7302_v20  ;;  %v978_v5 = vld [vmem:[#allocation2 + $0xd4] sm:$0xf]  ;;  %v1174_v23 = vshll.u32 %v6413_v2, 16  ;;  %v7199_v36 = vld [vmem:[#allocation2 + $0xec] ss:$0 sps:$4 sm:$0x11]  }
 0x14f   : > { %2341 = vrot.lane.b32.xlu0 %v2287_v59, %s7406_s9  ;;  %v4967_v59 = vrot.slane %v4965_v29, 4  ;;  %v3366_v16 = vor.u32 %v3365_v58, %v3361_v53  ;;  %v957_v29 = vld [vmem:[#allocation2 + $0x64] sm:$0xf]  ;;  %v5129_v58 = vshll.u32 %v7916_v54, 16  ;;  %v7945_v8 = vrot.slane %v1516_v6, 7 }
 0x150   : > { %v6414_v34 = vcombine.low %v957_v29, %v958_v30 }
 0x151   : > { %5277 = vrot.lane.b32.xlu1 %v5094_v7, %s7407_s12  ;;  %v2283_v7 = vrot.slane %v7185_v42, 3  ;;  %v4968_v57 = vor.u32 %v4967_v59, %v7861_v13  ;;  %v3371_v39 = vsel %vm3299_vm12, %v3366_v16, %v3370_v17  ;;  %v7954_v16 = vrot.slane %v5129_v58, 5  ;;  %v7974_v58 = vld [vmem:[#allocation2 + $0xd4] sm:$0xff]  }
 0x152   : > { %v1182_v63 = vshll.u32 %v6414_v34, 16 }
 0x153   : > { %2373 = vrot.lane.b32.xlu0 %v2311_v11, %s7406_s9  ;;  %v3800_v11 = vld [vmem:[#allocation2 + $0xd4] sm:$0xf]  ;;  %v2285_v32 = vsel %vm2270_vm8, %v2283_v7, %v2284_v45  ;;  %v979_v7 = vld [vmem:[#allocation2 + $0xd8] sm:$0xf] }
 0x154   : > { %v6707_v13 = vcombine.low %v3800_v11, %v3801_v14  ;;  %v6421_v24 = vcombine.low %v978_v5, %v979_v7  ;;  %v1184_v30 = vrot.slane %v1182_v63, 5 }
 0x155   : > { %2339 = vrot.lane.b32.xlu1 %v2288_v22, %s7406_s9 }
 0x156   : > { %v4047_v55 = vshrl.u32 %v6707_v13, 16  ;;  %v4050_v27 = vshll.u32 %v6707_v13, 16  ;;  %v1246_v13 = vshll.u32 %v6422_v1, 16  ;;  %v1238_v47 = vshll.u32 %v6421_v24, 16 }
 0x157   : > { %5255 = vrot.lane.b32.xlu0 %v4964_v33, %s7407_s12  ;;  %v5122_v33 = vrot.slane %v5120_v51, 4 }
 0x158   : > { %v4049_v17 = vrot.slane %v4047_v55, 4 }
 0x159   : > { %2371 = vrot.lane.b32.xlu1 %v2312_v56, %s7406_s9  ;;  %v7890_v43 = vpop.permute.xlu0 %2325  ;;  %v4969_v56 = vrot.slane %v4968_v57, 4  ;;  %v5126_v53 = vor.u32 %v5125_v35, %v5122_v33  ;;  %v4052_v57 = vrot.slane %v4050_v27, 5  ;;  %v7960_v33 = vld [vmem:[#allocation2 + $0x54] sm:$0xff]  }
 0x15b   : > { %v7896_v50 = vpop.permute.xlu1 %2355  ;;  %2337 = vrot.lane.b32.xlu0 %v2284_v45, %s7406_s9  ;;  %v7925_v45 = vsel %vm1290_vm13, %v6376_v21, %v7854_v3  ;;  %v3985_v3 = vrot.slane %v3983_v37, 4  ;;  %v4974_v31 = vsel %vm7615_vm11, %v4969_v56, %v4973_v40  ;;  %v5127_v14 = vrot.slane %v5126_v53, 4 }
 0x15c   : > { %v7943_v51 = vcombine.high %v7925_v45, %v7925_v45  ;;  %v1171_v21 = vshrl.u32 %v6413_v2, 16  ;;  %v4053_v38 = vor.u32 %v4052_v57, %v4049_v17  ;;  %v1176_v40 = vrot.slane %v1174_v23, 5 }
 0x15d   : > { %4094 = vrot.lane.b32.xlu1 %v3997_v49, %s7406_s9  ;;  %v7903_v0 = vpop.permute.xlu0 %2357  ;;  %v7933_v49 = vrot.slane %v4937_v26, 5  ;;  %v3989_v6 = vor.u32 %v3988_v62, %v3985_v3  ;;  %v4941_v26 = vshrl.u32 %v7900_v60, 16  ;;  %v5132_v37 = vsel %vm7615_vm11, %v5127_v14, %v7954_v16 }
 0x15e   : > { %v1507_v12 = vshrl.u32 %v7943_v51, 16  ;;  %v1173_v56 = vrot.slane %v1171_v21, 4  ;;  %v3351_v53 = vshll.u32 %v7960_v33, 16  ;;  %v1248_v3 = vrot.slane %v1246_v13, 5 }
 0x15f   : > { %v7906_v9 = vpop.permute.xlu1 %2321  ;;  %2369 = vrot.lane.b32.xlu0 %v2308_v46, %s7406_s9  ;;  %v1179_v46 = vshrl.u32 %v6414_v34, 16  ;;  %v4940_v11 = vsel %vm7615_vm11, %v4935_v28, %v7933_v49  ;;  %v1235_v34 = vshrl.u32 %v6421_v24, 16  ;;  %v4943_v52 = vrot.slane %v4941_v26, 4  ;;  %v4842_v24 = vld [vmem:[#allocation2 + $0xdc] sm:$0x1] }
 0x160   : > { %v3457_v62 = vshrl.u32 %v7198_v19, 16  ;;  %v3464_v2 = vshll.u32 %v7199_v36, 16  ;;  %v1177_v5 = vor.u32 %v1176_v40, %v1173_v56  ;;  %v3349_v14 = vshrl.u32 %v7960_v33, 16  ;;  %v7203_v13 = vld [vmem:[#allocation2 + $0xdc] ss:$0 sps:$4 sm:$0x11]  }
 0x161   : > { %4110 = vrot.lane.b32.xlu1 %v4061_v10, %s7406_s9  ;;  %v7913_v22 = vpop.permute.xlu0 %2323  ;;  %v1519_v10 = vshll.u32 %v7893_v4, 16  ;;  %v1181_v29 = vrot.slane %v1179_v46, 4  ;;  %v6424_v46 = vcombine.low %v7925_v45, %v7925_v45  ;;  %v1237_v7 = vrot.slane %v1235_v34, 4  ;;  %v7177_v34 = vld [vmem:[#allocation2 + $0x94] sm:$0xff]  }
 0x162   : > { %v4944_v17 = vor.u32 %v4943_v52, %v7933_v49  ;;  %v3466_v23 = vrot.slane %v3464_v2, 1  ;;  %v3447_v26 = vshll.u32 %v7974_v58, 16  ;;  %v5139_v52 = vshll.u32 %v4842_v24, 16  ;;  %v3785_v2 = vld [vmem:[#allocation2 + $0x84] sm:$0xf] }
 0x163   : > { %v7919_v15 = vpop.permute.xlu1 %4086  ;;  %2335 = vrot.lane.b32.xlu0 %v2285_v32, %s7406_s9  ;;  %v1243_v32 = vshrl.u32 %v6422_v1, 16  ;;  %v1185_v28 = vor.u32 %v1184_v30, %v1181_v29  ;;  %v7990_v29 = vld [vmem:[#allocation2 + $0x118] sm:$0xf]  ;;  %v7996_v36 = vshrl.u32 %v6424_v46, 16  ;;  %v8020_v46 = vld [vmem:[#allocation2 + $0xa0] sm:$0x8] }
 0x164   : > { %10659 = vst [vmem:[#allocation8_spill] sm:$0xff] %v7990_v29  ;;  %v5141_v24 = vrot.slane %v5139_v52, 5  ;;  %v8060_v30 = vld [vmem:[#allocation2 + $0xa4] sm:$0xf]  ;;  %v8112_v29 = vld [vmem:[#allocation2 + $0x10] sm:$0x8] }
 0x165   : > { %3502 = vrot.lane.b32.xlu1 %v3371_v39, %s7406_s9  ;;  %v7928_v42 = vpop.permute.xlu0 %5239  ;;  %v3459_v39 = vshll.u32 %v7198_v19, 16  ;;  %v1245_v27 = vrot.slane %v1243_v32, 4  ;;  %v3353_v19 = vrot.slane %v3351_v53, 1  ;;  %v7994_v32 = vld [vmem:[#allocation2 + $0x20] sm:$0x8]  ;;  %10660 = vst [vmem:[#allocation9_spill] sm:$0xff] %v7996_v36 }
 0x166   : > { %10657 = vst [vmem:[#allocation6_spill] sm:$0xff] %v7928_v42  ;;  %v8007_v53 = vld [vmem:[#allocation2 + $0x88] ss:$0 sps:$4 sm:$0xff]  }
 0x167   : > { %v7936_v59 = vpop.permute.xlu1 %4102  ;;  %2367 = vrot.lane.b32.xlu0 %v2309_v48, %s7406_s9  ;;  %v5133_v48 = vshrl.u32 %v7916_v54, 16  ;;  %v3461_v63 = vrot.slane %v3459_v39, 1  ;;  %v7201_v54 = vld [vmem:[#allocation2 + $0x5c] ss:$0 sps:$4 sm:$0x11]   ;;  %v1249_v45 = vor.u32 %v1248_v3, %v1245_v27  ;;  %v3354_v27 = vor.u32 %v3353_v19, %v3349_v14 }
 0x168   : > { %v3356_v33 = vshll.u32 %v7201_v54, 16  ;;  %v8001_v39 = vld [vmem:[#allocation2 + $0x110] sm:$0x8]  ;;  %v3445_v3 = vshrl.u32 %v7974_v58, 16  ;;  %v7204_v54 = vld [vmem:[#allocation2 + $0x80] sm:$0xf8]  }
 0x169   : > { %5257 = vrot.lane.b32.xlu1 %v4974_v31, %s7407_s12  ;;  %v7949_v25 = vpop.permute.xlu0 %5271  ;;  %v4818_v31 = vld [vmem:[#allocation2 + $0x5c] sm:$0x1]  ;;  %v3462_v49 = vor.u32 %v3461_v63, %v3457_v62  ;;  %10662 = vst [vmem:[#allocation11_spill] sm:$0xff] %v8001_v39  ;;  %v3449_v62 = vrot.slane %v3447_v26, 1  ;;  %v8022_v63 = vld [vmem:[#allocation2 + $0x20] sm:$0x8] }
 0x16a   : > { %10658 = vst [vmem:[#allocation7_spill] sm:$0xff] %v7949_v25  ;;  %v4947_v57 = vshll.u32 %v4818_v31, 16  ;;  %v3786_v31 = vld [vmem:[#allocation2 + $0x88] sm:$0xf]  ;;  %v8029_v58 = vld [vmem:[#allocation2 + $0x114] sm:$0xf] }
 0x16b   : > { %v7956_v20 = vpop.permute.xlu1 %1262  ;;  %5251 = vrot.lane.b32.xlu0 %v4940_v11, %s7407_s12  ;;  %v1240_v11 = vrot.slane %v1238_v47, 5  ;;  %v4945_v47 = vrot.slane %v4944_v17, 4  ;;  %v3467_v4 = vsel %vm3299_vm12, %v3462_v49, %v3466_v23  ;;  %10667 = vst [vmem:[#allocation16_spill] sm:$0xff] %v8029_v58  ;;  %v8047_v49 = vld [vmem:[#allocation2 + $0x28] sm:$0xf]  ;;  %v2292_v52 = vrot.slane %v7204_v54, 3 }
 0x16c   : > { %v8068_v14 = vld [vmem:[#allocation2 + $0x24] sm:$0xf]  ;;  %v8083_v19 = vld [vmem:[#allocation2 + $0xa8] sm:$0xf]  ;;  %v8108_v39 = vld [vmem:[#allocation2 + $0x94] sm:$0xf] }
 0x16d   : > { %4092 = vrot.lane.b32.xlu1 %v3989_v6, %s7406_s9  ;;  %v7963_v35 = vpop.permute.xlu0 %2353  ;;  %v5135_v6 = vrot.slane %v5133_v48, 4  ;;  %v1241_v40 = vor.u32 %v1240_v11, %v1237_v7  ;;  %v4949_v48 = vrot.slane %v4947_v57, 5  ;;  %v8040_v57 = vld [vmem:[#allocation2 + $0xa0] sm:$0x8] }
 0x16e   : > { %v7180_v11 = vld [vmem:[#allocation2 + $0x9c] ss:$0 sps:$4 sm:$0x11]  }
 0x16f   : > { %v7969_v60 = vpop.permute.xlu1 %3494  ;;  %5283 = vrot.lane.b32.xlu0 %v5132_v37, %s7407_s12  ;;  %v7998_v37 = vrot.slane %v1507_v12, 7  ;;  %v8012_v12 = vor.u32 %v1519_v10, %v7945_v8  ;;  %v3358_v8 = vrot.slane %v3356_v33, 1  ;;  %v3452_v10 = vshll.u32 %v7203_v13, 16  ;;  %v7181_v33 = vld [vmem:[#allocation2 + $0xc] ss:$0 sps:$4 sm:$0x11]  }
 0x171   : > { %4108 = vrot.lane.b32.xlu1 %v4053_v38, %s7406_s9  ;;  %v7977_v55 = vpop.permute.xlu0 %2319  ;;  %10661 = vst [vmem:[#allocation10_spill] sm:$0xff] %v7998_v37  ;;  %v1510_v38 = vshll.u32 %v7943_v51, 16  ;;  %10664 = vst [vmem:[#allocation13_spill] sm:$0xff] %v8012_v12 }
 0x173   : > { %v7981_v1 = vpop.permute.xlu1 %3510  ;;  %1270 = vrot.lane.b32.xlu0 %v1185_v28, %s7406_s9  ;;  %v5136_v28 = vor.u32 %v5135_v6, %v7954_v16  ;;  %v2439_v16 = vsel %vm1290_vm13, %v7177_v34, %v7896_v50  ;;  %v8027_v7 = vor.u32 %v1510_v38, %v7998_v37  ;;  %v8033_v50 = vld [vmem:[#allocation2 + $0x24] sm:$0xf]  ;;  %v7176_v6 = vld [vmem:[#allocation2 + $0x1c] ss:$0 sps:$4 sm:$0x11]   ;;  %v8057_v34 = vcombine.low %v3785_v2, %v3786_v31 }
 0x174   : > { %v8045_v26 = vcombine.low %v2439_v16, %v2439_v16  ;;  %v6580_v31 = vcombine.high %v2439_v16, %v2439_v16 }
 0x175   : > { %1268 = vrot.lane.b32.xlu1 %v1177_v5, %s7406_s9  ;;  %v7987_v21 = vpop.permute.xlu0 %2351  ;;  %10666 = vst [vmem:[#allocation15_spill] sm:$0xff] %v8027_v7  ;;  %v5137_v23 = vrot.slane %v5136_v28, 4  ;;  %v3454_v28 = vrot.slane %v3452_v10, 1  ;;  %v8064_v5 = vld [vmem:[#allocation2 + $0xa8] sm:$0xf] }
 0x176   : > { %v8079_v10 = vld [vmem:[#allocation2 + $0xa4] sm:$0xf]  ;;  %v2827_v16 = vshrl.u32 %v8045_v26, 16 }
 0x177   : > { %v8003_v56 = vpop.permute.xlu1 %5241  ;;  %1286 = vrot.lane.b32.xlu0 %v1249_v45, %s7406_s9  ;;  %v4950_v45 = vsel %vm7615_vm11, %v4945_v47, %v4949_v48  ;;  %v3359_v47 = vsel %vm3299_vm12, %v3354_v27, %v3358_v8  ;;  %v3450_v48 = vor.u32 %v3449_v62, %v3445_v3  ;;  %v8072_v3 = vld [vmem:[#allocation2 + $0x28] sm:$0xf]  ;;  %v7184_v8 = vld [vmem:[#allocation2 + $0x14] sm:$0xff]   ;;  %v5142_v62 = vsel %vm7615_vm11, %v5137_v23, %v5141_v24 }
 0x178   : > { %10663 = vst [vmem:[#allocation12_spill] sm:$0xff] %v8003_v56  ;;  %v2391_v27 = vsel %vm1290_vm13, %v7184_v8, %v7913_v22  ;;  %v10669_v23 = vrot.slane %v8007_v53, 3  ;;  %v2830_v24 = vshll.u32 %v8045_v26, 16  ;;  %v8126_v8 = vld [vmem:[#allocation2 + $0x90] sm:$0x8]  ;;  %v2829_v44 = vrot.slane %v2827_v16, 4 }
 0x179   : > { %1284 = vrot.lane.b32.xlu1 %v1241_v40, %s7406_s9  ;;  %v8015_v51 = vpop.permute.xlu0 %5267  ;;  %v8055_v40 = vld [vmem:[#allocation2 + $0x108] ss:$0 sps:$4 sm:$0xff]   ;;  %v3455_v58 = vsel %vm3299_vm12, %v3450_v48, %v3454_v28  ;;  %v4010_v48 = vshll.u32 %v8057_v34, 16  ;;  %v8134_v56 = vld [vmem:[#allocation2 + $0x14] sm:$0xf] }
 0x17a   : > { %10665 = vst [vmem:[#allocation14_spill] sm:$0xff] %v8015_v51  ;;  %v2317_v54 = vrot.slane %v8055_v40, 3  ;;  %v4007_v51 = vshrl.u32 %v8057_v34, 16  ;;  %v6555_v40 = vcombine.low %v2391_v27, %v2391_v27  ;;  %v8138_v26 = vld [vmem:[#allocation2 + $0x94] sm:$0xf] }
 0x17b   : > { %v8037_v17 = vpop.permute.xlu1 %5273  ;;  %3518 = vrot.lane.b32.xlu0 %v3467_v4, %s7406_s9  ;;  %v7206_v4 = vld [vmem:[#allocation2 + $0x100] sm:$0xf8]  }
 0x17c   : > { %10668 = vst [vmem:[#allocation17_spill] sm:$0xff] %v8037_v17  ;;  %v2832_v17 = vrot.slane %v2830_v24, 5  ;;  %v2635_v36 = vshrl.u32 %v6555_v40, 16  ;;  %v2638_v7 = vshll.u32 %v6555_v40, 16 }
 0x17d   : > { %5253 = vrot.lane.b32.xlu1 %v4950_v45, %s7407_s12  ;;  %v8052_v13 = vpop.permute.xlu0 %1278  ;;  %v8087_v45 = vld [vmem:[#allocation2 + $0x90] sm:$0x8] }
 0x17f   : > { %v8076_v2 = vpop.permute.xlu1 %4100  ;;  %3500 = vrot.lane.b32.xlu0 %v3359_v47, %s7406_s9  ;;  %v2394_v47 = vsel %vm1290_vm13, %v7176_v6, %v7890_v43  ;;  %v2294_v43 = vsel %vm2270_vm8, %v2292_v52, %v10669_v23  ;;  %v2316_v6 = vrot.slane %v7206_v4, 3  ;;  %v2836_v52 = vshll.u32 %v6580_v31, 16  ;;  %v8118_v4 = vld [vmem:[#allocation2 + $0x98] sm:$0xf] }
 0x180   : > { %v6557_v28 = vcombine.low %v2394_v47, %v2394_v47  ;;  %v2840_v23 = vshrl.u32 %v6580_v31, 16  ;;  %v4009_v47 = vrot.slane %v4007_v51, 4  ;;  %v10670_v51 = vrot.slane %v8007_v53, 3 }
 0x181   : > { %5285 = vrot.lane.b32.xlu1 %v5142_v62, %s7407_s12  ;;  %v8095_v38 = vpop.permute.xlu0 %3492  ;;  %v2442_v62 = vsel %vm1290_vm13, %v7180_v11, %v7903_v0  ;;  %v8122_v11 = vld [vmem:[#allocation2 + $0x18] sm:$0xf]  ;;  %v6556_v0 = vcombine.high %v2391_v27, %v2391_v27  ;;  %v2318_v42 = vsel %vm2270_vm8, %v2316_v6, %v2317_v54  ;;  %v4012_v27 = vrot.slane %v4010_v48, 5 }
 0x182   : > { %v6581_v25 = vcombine.low %v2442_v62, %v2442_v62  ;;  %v8147_v16 = vrot.slane %v2836_v52, 5  ;;  %v10672_v6 = vcombine.low %v8047_v49, %v8047_v49  ;;  %v8154_v62 = vld [vmem:[#allocation2 + $0x98] sm:$0xf]  ;;  %v2842_v31 = vrot.slane %v2840_v23, 4  ;;  %v8166_v49 = vld [vmem:[#allocation2 + $0x84] sm:$0xff]  }
 0x183   : > { %v8114_v22 = vpop.permute.xlu1 %1260  ;;  %3516 = vrot.lane.b32.xlu0 %v3455_v58, %s7406_s9  ;;  %v2388_v58 = vsel %vm1290_vm13, %v7181_v33, %v7906_v9  ;;  %v10673_v53 = vcombine.low %v7994_v32, %v8033_v50  ;;  %v2648_v23 = vshrl.u32 %v6556_v0, 16  ;;  %v2833_v9 = vor.u32 %v2832_v17, %v2829_v44 }
 0x184   : > { %10671 = vst [vmem:[#allocation18_spill] sm:$0xff] %v8147_v16  ;;  %v4122_v24 = vsel %vm1290_vm13, %v10672_v6, %v7919_v15  ;;  %v2644_v6 = vshll.u32 %v6556_v0, 16  ;;  %v8184_v0 = vld [vmem:[#allocation2 + $0xc8] sm:$0xf]  ;;  %v2843_v17 = vor.u32 %v2842_v31, %v8147_v16 }
 0x185   : > { %2347 = vrot.lane.b32.xlu1 %v2294_v43, %s7406_s9  ;;  %v8131_v34 = vpop.permute.xlu0 %3508  ;;  %v6554_v43 = vcombine.low %v2388_v58, %v2388_v58  ;;  %v4120_v48 = vsel %vm1290_vm13, %v10673_v53, %v7919_v15  ;;  %v8168_v58 = vshll.u32 %v6557_v28, 16  ;;  %v8172_v40 = vcombine.low %v4122_v24, %v4122_v24  ;;  %v4825_v53 = vld [vmem:[#allocation2 + $0x84] sm:$0xf]  ;;  %v8180_v28 = vld [vmem:[#allocation2 + $0x48] sm:$0xf] }
 0x186   : > { %v4013_v15 = vor.u32 %v4012_v27, %v4009_v47  ;;  %v6712_v50 = vcombine.low %v4120_v48, %v4120_v48  ;;  %v2640_v47 = vrot.slane %v2638_v7, 5  ;;  %v8189_v27 = vcombine.high %v4120_v48, %v4120_v48  ;;  %v8208_v48 = vld [vmem:[#allocation2 + $0x88] sm:$0xf] }
 0x187   : > { %v8142_v33 = vpop.permute.xlu1 %1276  ;;  %2349 = vrot.lane.b32.xlu0 %v10670_v51, %s7406_s9  ;;  %10674 = vst [vmem:[#allocation19_spill] sm:$0xff] %v8168_v58  ;;  %v8170_v51 = vshll.u32 %v6581_v25, 16  ;;  %v8178_v32 = vshll.u32 %v6554_v43, 16  ;;  %v8196_v25 = vrot.slane %v2644_v6, 5  ;;  %v8198_v12 = vrot.slane %v2833_v9, 4  ;;  %v7192_v58 = vld [vmem:[#allocation2 + $0x4] sm:$0xff]  }
 0x188   : > { %10678 = vst [vmem:[#allocation23_spill] sm:$0xff] %v8189_v27  ;;  %v4341_v44 = vshrl.u32 %v8172_v40, 16  ;;  %v8211_v6 = vshrl.u32 %v6712_v50, 16  ;;  %v8217_v24 = vld [vmem:[#allocation2 + $0x48] sm:$0xf]  ;;  %v10686_v50 = vcombine.low %v8064_v5, %v8064_v5 }
 0x189   : > { %2379 = vrot.lane.b32.xlu1 %v2318_v42, %s7406_s9  ;;  %v8164_v52 = vpop.permute.xlu0 %2333  ;;  %10675 = vst [vmem:[#allocation20_spill] sm:$0xff] %v8170_v51  ;;  %10677 = vst [vmem:[#allocation22_spill] sm:$0xff] %v8178_v32  ;;  %v5003_v51 = vshll.u32 %v4825_v53, 16  ;;  %v4344_v32 = vshll.u32 %v8172_v40, 16 }
 0x18a   : > { %10679 = vst [vmem:[#allocation24_spill] sm:$0xff] %v8196_v25  ;;  %10680 = vst [vmem:[#allocation25_spill] sm:$0xff] %v8198_v12  ;;  %v4332_v12 = vshrl.u32 %v8189_v27, 16  ;;  %v4162_v42 = vsel %vm1290_vm13, %v10686_v50, %v7936_v59 }
 0x18b   : > { %v8174_v37 = vpop.permute.xlu1 %5269  ;;  %2381 = vrot.lane.b32.xlu0 %v2317_v54, %s7406_s9  ;;  %v2637_v54 = vrot.slane %v2635_v36, 4  ;;  %v10681_v36 = vcombine.low %v8020_v46, %v8060_v30  ;;  %10682 = vst [vmem:[#allocation26_spill] sm:$0xff] %v8211_v6  ;;  %10684 = vst [vmem:[#allocation28_spill] sm:$0xff] %v8217_v24  ;;  %v8221_v46 = vrot.slane %v2843_v17, 4  ;;  %v3809_v30 = vld [vmem:[#allocation2 + $0x104] sm:$0xf] }
 0x18c   : > { %10676 = vst [vmem:[#allocation21_spill] sm:$0xff] %v8174_v37  ;;  %v2650_v37 = vrot.slane %v2648_v23, 4  ;;  %v8213_v23 = vld [vmem:[#allocation2 + $0x38] sm:$0xf]  ;;  %v3810_v17 = vld [vmem:[#allocation2 + $0x108] sm:$0xf] }
 0x18d   : > { %4098 = vrot.lane.b32.xlu1 %v4013_v15, %s7406_s9  ;;  %v8192_v43 = vpop.permute.xlu0 %2365  ;;  %v4160_v7 = vsel %vm1290_vm13, %v10681_v36, %v7936_v59  ;;  %v5000_v15 = vshrl.u32 %v4825_v53, 16  ;;  %10683 = vst [vmem:[#allocation27_spill] sm:$0xff] %v8213_v23  ;;  %10685 = vst [vmem:[#allocation29_spill] sm:$0xff] %v8221_v46  ;;  %v2641_v36 = vor.u32 %v2640_v47, %v2637_v54  ;;  %v4343_v24 = vrot.slane %v4341_v44, 7 }
 0x18e   : > { %v2651_v9 = vor.u32 %v2650_v37, %v8196_v25  ;;  %v6736_v23 = vcombine.low %v4160_v7, %v4160_v7  ;;  %v10688_v54 = vcombine.low %v8022_v63, %v8068_v14  ;;  %v5009_v59 = vshll.u32 %v8208_v48, 16 }
 0x18f   : > { %v8206_v31 = vpop.permute.xlu1 %2331  ;;  %v5002_v5 = vrot.slane %v5000_v15, 4  ;;  %v6738_v53 = vcombine.low %v4162_v42, %v4162_v42  ;;  %v8245_v27 = vrot.slane %v2641_v36, 4  ;;  %v8247_v44 = vrot.slane %v4332_v12, 7 }
 0x190   : > { %v1303_v47 = vsel %vm1290_vm13, %v10688_v54, %v7956_v20  ;;  %v5005_v25 = vrot.slane %v5003_v51, 5  ;;  %v6710_v63 = vcombine.low %v3809_v30, %v3810_v17  ;;  %v8251_v15 = vrot.slane %v2651_v9, 4 }
 0x191   : > { %v8229_v16 = vpop.permute.xlu0 %5247  ;;  %10690 = vst [vmem:[#allocation32_spill] sm:$0xff] %v8245_v27  ;;  %10691 = vst [vmem:[#allocation33_spill] sm:$0xff] %v8247_v44  ;;  %v8253_v54 = vshrl.u32 %v6736_v23, 16  ;;  %v6430_v46 = vcombine.low %v1303_v47, %v1303_v47  ;;  %v8255_v37 = vrot.slane %v5009_v59, 5  ;;  %v8257_v40 = vor.u32 %v4344_v32, %v4343_v24  ;;  %v7195_v24 = vld [vmem:[#allocation2 + $0x84] sm:$0xff]  }
 0x192   : > { %10687 = vst [vmem:[#allocation30_spill] sm:$0xff] %v8229_v16  ;;  %v8243_v16 = vcombine.high %v4160_v7, %v4160_v7  ;;  %10693 = vst [vmem:[#allocation35_spill] sm:$0xff] %v8251_v15  ;;  %v7190_v7 = vld [vmem:[#allocation2 + $0x8c] ss:$0 sps:$4 sm:$0x11]   ;;  %v5006_v42 = vor.u32 %v5005_v25, %v5002_v5  ;;  %v4071_v36 = vshrl.u32 %v6710_v63, 16  ;;  %v10696_v23 = vcombine.low %v8072_v3, %v8072_v3 }
 0x193   : > { %v8239_v50 = vpop.permute.xlu1 %2363  ;;  %10694 = vst [vmem:[#allocation36_spill] sm:$0xff] %v8253_v54  ;;  %10695 = vst [vmem:[#allocation37_spill] sm:$0xff] %v8257_v40  ;;  %v4074_v6 = vshll.u32 %v6710_v63, 16  ;;  %v4517_v9 = vshrl.u32 %v6738_v53, 16  ;;  %v4520_v32 = vshll.u32 %v6738_v53, 16  ;;  %v8271_v40 = vcombine.high %v1303_v47, %v1303_v47 }
 0x194   : > { %10689 = vst [vmem:[#allocation31_spill] sm:$0xff] %v8243_v16  ;;  %v4508_v51 = vshrl.u32 %v8243_v16, 16  ;;  %v1305_v17 = vsel %vm1290_vm13, %v10696_v23, %v7956_v20  ;;  %v7216_v59 = vld [vmem:[#allocation2 + $0x8c] ss:$0 sps:$4 sm:$0x11]   ;;  %v4073_v25 = vrot.slane %v4071_v36, 4  ;;  %v2385_v16 = vsel %vm1290_vm13, %v7192_v58, %v7977_v55 }
 0x195   : > { %v8249_v14 = vpop.permute.xlu0 %5279  ;;  %v4076_v5 = vrot.slane %v4074_v6, 5  ;;  %v8273_v30 = vshrl.u32 %v6430_v46, 16  ;;  %v8277_v3 = vld [vmem:[#allocation2 + $0x78] ss:$0 sps:$4 sm:$0xff]   ;;  %v8279_v20 = vcombine.low %v1305_v17, %v1305_v17  ;;  %v5013_v6 = vshrl.u32 %v8208_v48, 16  ;;  %v7323_v17 = vld [vmem:[#allocation2 + $0x24] sm:$0xff]  }
 0x196   : > { %10692 = vst [vmem:[#allocation34_spill] sm:$0xff] %v8249_v14  ;;  %v5007_v14 = vrot.slane %v5006_v42, 4  ;;  %v8287_v47 = vrot.slane %v4508_v51, 7  ;;  %v4519_v46 = vrot.slane %v4517_v9, 7  ;;  %v3387_v55 = vshll.u32 %v8166_v49, 16 }
 0x197   : > { %v8259_v12 = vpop.permute.xlu1 %4090  ;;  %10697 = vst [vmem:[#allocation38_spill] sm:$0xff] %v8273_v30  ;;  %v4077_v42 = vor.u32 %v4076_v5, %v4073_v25  ;;  %v3392_v58 = vshll.u32 %v7216_v59, 16  ;;  %v2436_v23 = vsel %vm1290_vm13, %v7190_v7, %v7963_v35  ;;  %v6552_v48 = vcombine.low %v2385_v16, %v2385_v16  ;;  %v8304_v35 = vld [vmem:[#allocation2 + $0xf8] ss:$0 sps:$4 sm:$0xff]   ;;  %v4827_v9 = vld [vmem:[#allocation2 + $0x8c] sm:$0x1] }
 0x198   : > { %v5012_v53 = vsel %vm7615_vm11, %v5007_v14, %v8255_v37  ;;  %10698 = vst [vmem:[#allocation39_spill] sm:$0xff] %v8287_v47  ;;  %v8295_v14 = vsel %vm1290_vm13, %v7323_v17, %v7969_v60  ;;  %v2433_v25 = vsel %vm1290_vm13, %v7195_v24, %v7987_v21  ;;  %v10593_v59 = vrot.slane %v8277_v3, 3  ;;  %v706_v44 = vld [vmem:[#allocation2 + $0x70] sm:$0x8] }
 0x199   : > { %v8268_v63 = vpop.permute.xlu0 %2329  ;;  %5263 = vrot.lane.b32.xlu0 %v5012_v53, %s7407_s12  ;;  %4114 = vrot.lane.b32.xlu1 %v4077_v42, %s7406_s9  ;;  %v3389_v5 = vrot.slane %v3387_v55, 1  ;;  %v3394_v53 = vrot.slane %v3392_v58, 1  ;;  %v1551_v7 = vshrl.u32 %v8271_v40, 16  ;;  %v1554_v60 = vshll.u32 %v8271_v40, 16 }
 0x19a   : > { %v6553_v17 = vcombine.high %v2385_v16, %v2385_v16  ;;  %v5015_v27 = vrot.slane %v5013_v6, 4  ;;  %v8310_v21 = vor.u32 %v4520_v32, %v4519_v46  ;;  %v1560_v24 = vshrl.u32 %v8279_v20, 16 }
 0x19b   : > { %v8285_v36 = vpop.permute.xlu1 %4106  ;;  %v6576_v42 = vcombine.low %v2433_v25, %v2433_v25  ;;  %v10702_v55 = vshrl.u32 %v8166_v49, 16  ;;  %v1563_v30 = vshll.u32 %v8279_v20, 16  ;;  %v6578_v40 = vcombine.low %v2436_v23, %v2436_v23  ;;  %v3783_v23 = vld [vmem:[#allocation2 + $0x78] sm:$0xf] }
 0x19c   : > { %10701 = vst [vmem:[#allocation42_spill] sm:$0xff] %v8310_v21  ;;  %v2611_v16 = vshrl.u32 %v6552_v48, 16  ;;  %v5016_v6 = vor.u32 %v5015_v27, %v8255_v37  ;;  %v2614_v32 = vshll.u32 %v6552_v48, 16  ;;  %v6577_v46 = vcombine.high %v2433_v25, %v2433_v25 }
 0x19d   : > { %v8300_v51 = vpop.permute.xlu0 %2361  ;;  %2345 = vrot.lane.b32.xlu0 %v10593_v59, %s7406_s9  ;;  %v3390_v58 = vor.u32 %v3389_v5, %v10702_v55  ;;  %v3782_v59 = vld [vmem:[#allocation2 + $0x74] sm:$0xf]  ;;  %v2624_v49 = vshrl.u32 %v6553_v17, 16  ;;  %v5019_v20 = vshll.u32 %v4827_v9, 16  ;;  %v8327_v27 = vrot.slane %v1551_v7, 7 }
 0x19e   : > { %10699 = vst [vmem:[#allocation40_spill] sm:$0xff] %v8300_v51  ;;  %v2620_v51 = vshll.u32 %v6553_v17, 16  ;;  %v5017_v5 = vrot.slane %v5016_v6, 4  ;;  %v2803_v48 = vshrl.u32 %v6576_v42, 16  ;;  %v2806_v25 = vshll.u32 %v6576_v42, 16 }
 0x19f   : > { %v8308_v54 = vpop.permute.xlu1 %3498  ;;  %v3395_v21 = vsel %vm3299_vm12, %v3390_v58, %v3394_v53  ;;  %10705 = vst [vmem:[#allocation45_spill] sm:$0xff] %v8327_v27  ;;  %v1562_v53 = vrot.slane %v1560_v24, 7  ;;  %v2613_v17 = vrot.slane %v2611_v16, 4  ;;  %v5021_v58 = vrot.slane %v5019_v20, 5  ;;  %v3807_v42 = vld [vmem:[#allocation2 + $0xf8] sm:$0xf] }
 0x1a0   : > { %10700 = vst [vmem:[#allocation41_spill] sm:$0xff] %v8308_v54  ;;  %v10594_v54 = vrot.slane %v8304_v35, 3  ;;  %3506 = vrot.lane.b32.xlu1 %v3395_v21, %s7406_s9  ;;  %v707_v9 = vsel %vm7510_vm4, 0, %v706_v44  ;;  %v2616_v6 = vrot.slane %v2614_v32, 5  ;;  %v2812_v7 = vshll.u32 %v6577_v46, 16 }
 0x1a1   : > { %v8320_v47 = vpop.permute.xlu0 %2327  ;;  %708 = vst [vmem:[#allocation2 + $0x70] sm:$0x8] %v707_v9  ;;  %v6701_v15 = vcombine.low %v3782_v59, %v3783_v23  ;;  %v8340_v37 = vrot.slane %v2620_v51, 5  ;;  %v5022_v24 = vsel %vm7615_vm11, %v5017_v5, %v5021_v58  ;;  %v8346_v20 = vshll.u32 %v6578_v40, 16  ;;  %v730_v23 = vld [vmem:[#allocation2 + $0xf0] sm:$0x8] }
 0x1a2   : > { %10703 = vst [vmem:[#allocation43_spill] sm:$0xff] %v8320_v47  ;;  %2377 = vrot.lane.b32.xlu0 %v10594_v54, %s7406_s9  ;;  %v2626_v47 = vrot.slane %v2624_v49, 4  ;;  %v2805_v44 = vrot.slane %v2803_v48, 4  ;;  %v2808_v54 = vrot.slane %v2806_v25, 5  ;;  %v8350_v59 = vor.u32 %v1554_v60, %v8327_v27  ;;  %v3806_v48 = vld [vmem:[#allocation2 + $0xf4] sm:$0xf] }
 0x1a3   : > { %v8325_v55 = vpop.permute.xlu1 %3514  ;;  %v3999_v32 = vshrl.u32 %v6701_v15, 16  ;;  %v10708_v49 = vcombine.low %v8040_v57, %v8079_v10  ;;  %v4002_v5 = vshll.u32 %v6701_v15, 16  ;;  %v2617_v58 = vor.u32 %v2616_v6, %v2613_v17 }
 0x1a4   : > { %10704 = vst [vmem:[#allocation44_spill] sm:$0xff] %v8325_v55  ;;  %v2816_v55 = vshrl.u32 %v6577_v46, 16  ;;  %5265 = vrot.lane.b32.xlu1 %v5022_v24, %s7407_s12  ;;  %10707 = vst [vmem:[#allocation47_spill] sm:$0xff] %v8350_v59  ;;  %v7324_v46 = vld [vmem:[#allocation2 + $0xa4] sm:$0xff]   ;;  %v8363_v9 = vrot.slane %v2812_v7, 5  ;;  %v2809_v15 = vor.u32 %v2808_v54, %v2805_v44 }
 0x1a5   : > { %v8336_v21 = vpop.permute.xlu0 %2359  ;;  %v8354_v51 = vsel %vm1290_vm13, %v7324_v46, %v7981_v1  ;;  %v1343_v40 = vsel %vm1290_vm13, %v10708_v49, %v8052_v13  ;;  %v4001_v24 = vrot.slane %v3999_v32, 4  ;;  %v8366_v46 = vor.u32 %v1563_v30, %v1562_v53 }
 0x1a6   : > { %v2818_v60 = vrot.slane %v2816_v55, 4  ;;  %v4004_v57 = vrot.slane %v4002_v5, 5  ;;  %v10712_v49 = vcombine.low %v8083_v19, %v8083_v19  ;;  %v6454_v6 = vcombine.low %v1343_v40, %v1343_v40  ;;  %v4822_v5 = vld [vmem:[#allocation2 + $0x74] sm:$0xf] }
 0x1a7   : > { %v8344_v16 = vpop.permute.xlu1 %5249  ;;  %10710 = vst [vmem:[#allocation49_spill] sm:$0xff] %v8366_v46  ;;  %v731_v55 = vsel %vm7510_vm4, 0, %v730_v23  ;;  %v6709_v32 = vcombine.low %v3806_v48, %v3807_v42  ;;  %v8383_v44 = vrot.slane %v2617_v58, 4  ;;  %v8388_v18 = vcombine.high %v1343_v40, %v1343_v40  ;;  %v8393_v42 = vld [vmem:[#allocation2 + $0x78] sm:$0xf] }
 0x1a8   : > { %10706 = vst [vmem:[#allocation46_spill] sm:$0xff] %v8344_v16  ;;  %v2627_v16 = vor.u32 %v2626_v47, %v8340_v37  ;;  %v1345_v17 = vsel %vm1290_vm13, %v10712_v49, %v8052_v13  ;;  %v7219_v47 = vld [vmem:[#allocation2 + $0x70] sm:$0xf8]   ;;  %v4005_v53 = vor.u32 %v4004_v57, %v4001_v24  ;;  %732 = vst [vmem:[#allocation2 + $0xf0] sm:$0x8] %v731_v55  ;;  %v8399_v1 = vrot.slane %v2809_v15, 4 }
 0x1a9   : > { %v8361_v25 = vpop.permute.xlu0 %5243  ;;  %v2819_v13 = vor.u32 %v2818_v60, %v8363_v9  ;;  %v8390_v23 = vcombine.low %v1345_v17, %v1345_v17  ;;  %v2289_v49 = vrot.slane %v7219_v47, 3  ;;  %v4063_v24 = vshrl.u32 %v6709_v32, 16  ;;  %v960_v48 = vld [vmem:[#allocation2 + $0x74] sm:$0xf]  ;;  %v961_v47 = vld [vmem:[#allocation2 + $0x78] sm:$0xf] }
 0x1aa   : > { %10709 = vst [vmem:[#allocation48_spill] sm:$0xff] %v8361_v25  ;;  %4096 = vrot.lane.b32.xlu1 %v4005_v53, %s7406_s9  ;;  %v4066_v57 = vshll.u32 %v6709_v32, 16  ;;  %v8397_v55 = vrot.slane %v2627_v16, 4  ;;  %10714 = vst [vmem:[#allocation52_spill] sm:$0xff] %v8399_v1  ;;  %v8401_v60 = vshrl.u32 %v6454_v6, 16  ;;  %v10716_v40 = vcombine.low %v8087_v45, %v8108_v39  ;;  %v8466_v1 = vld [vmem:[#allocation2 + $0x104] sm:$0xff]  }
 0x1ab   : > { %v8369_v10 = vpop.permute.xlu1 %5281  ;;  %v10717_v53 = vrot.slane %v8277_v3, 3  ;;  %v4065_v7 = vrot.slane %v4063_v24, 4  ;;  %v4976_v19 = vshrl.u32 %v4822_v5, 16  ;;  %v963_v16 = vld [vmem:[#allocation2 + $0x84] sm:$0xf]  ;;  %v8413_v15 = vrot.slane %v2819_v13, 4 }
 0x1ac   : > { %10711 = vst [vmem:[#allocation50_spill] sm:$0xff] %v8369_v10  ;;  %10715 = vst [vmem:[#allocation53_spill] sm:$0xff] %v8401_v60  ;;  %v4155_v17 = vsel %vm1290_vm13, %v10716_v40, %v8076_v2  ;;  %v4068_v30 = vrot.slane %v4066_v57, 5  ;;  %v1727_v6 = vshrl.u32 %v8388_v18, 16  ;;  %v1730_v25 = vshll.u32 %v8388_v18, 16 }
 0x1ad   : > { %v8381_v54 = vpop.permute.xlu0 %5275  ;;  %v2291_v32 = vsel %vm2270_vm8, %v2289_v49, %v10717_v53  ;;  %v10718_v39 = vcombine.low %v8118_v4, %v8118_v4  ;;  %v964_v3 = vld [vmem:[#allocation2 + $0x88] sm:$0xf]  ;;  %v1736_v49 = vshrl.u32 %v8390_v23, 16  ;;  %v4978_v57 = vrot.slane %v4976_v19, 4 }
 0x1ae   : > { %10713 = vst [vmem:[#allocation51_spill] sm:$0xff] %v8381_v54  ;;  %2343 = vrot.lane.b32.xlu0 %v2291_v32, %s7406_s9  ;;  %v4069_v24 = vor.u32 %v4068_v30, %v4065_v7  ;;  %v4979_v40 = vshll.u32 %v4822_v5, 16  ;;  %v1739_v53 = vshll.u32 %v8390_v23, 16  ;;  %v6733_v10 = vcombine.low %v4155_v17, %v4155_v17  ;;  %v7325_v5 = vld [vmem:[#allocation2 + $0x14] sm:$0xff]  }
 0x1af   : > { %v8395_v58 = vpop.permute.xlu1 %4088  ;;  %v4157_v45 = vsel %vm1290_vm13, %v10718_v39, %v8076_v2  ;;  %v7222_v18 = vld [vmem:[#allocation2 + $0xf0] sm:$0xf8]   ;;  %v4985_v59 = vshll.u32 %v8393_v42, 16  ;;  %v6415_v27 = vcombine.low %v960_v48, %v961_v47  ;;  %v8429_v2 = vcombine.high %v4155_v17, %v4155_v17 }
 0x1b0   : > { %4112 = vrot.lane.b32.xlu1 %v4069_v24, %s7406_s9  ;;  %v4981_v32 = vrot.slane %v4979_v40, 5  ;;  %v6416_v39 = vcombine.low %v963_v16, %v964_v3  ;;  %v8434_v30 = vrot.slane %v1727_v6, 7  ;;  %v8436_v19 = vcombine.low %v4157_v45, %v4157_v45  ;;  %v984_v40 = vld [vmem:[#allocation2 + $0xf4] sm:$0xf] }
 0x1b1   : > { %v8411_v54 = vpop.permute.xlu0 %1266  ;;  %10719 = vst [vmem:[#allocation54_spill] sm:$0xff] %v8429_v2  ;;  %v8440_v23 = vsel %vm1290_vm13, %v7325_v5, %v8095_v38  ;;  %v2313_v48 = vrot.slane %v7222_v18, 3  ;;  %v1738_v47 = vrot.slane %v1736_v49, 7  ;;  %v1187_v17 = vshrl.u32 %v6415_v27, 16 }
 0x1b2   : > { %10720 = vst [vmem:[#allocation55_spill] sm:$0xff] %v8434_v30  ;;  %v4982_v4 = vor.u32 %v4981_v32, %v4978_v57  ;;  %v1190_v60 = vshll.u32 %v6415_v27, 16  ;;  %v8444_v24 = vshrl.u32 %v6733_v10, 16  ;;  %v10722_v16 = vrot.slane %v8304_v35, 3  ;;  %v985_v27 = vld [vmem:[#allocation2 + $0xf8] sm:$0xf] }
 0x1b3   : > { %v8424_v13 = vpop.permute.xlu1 %4104  ;;  %v8449_v45 = vrot.slane %v4985_v59, 5  ;;  %v1195_v3 = vshrl.u32 %v6416_v39, 16  ;;  %v4486_v38 = vshrl.u32 %v8429_v2, 16  ;;  %v1189_v57 = vrot.slane %v1187_v17, 4  ;;  %v760_v2 = vld [vmem:[#allocation2 + $0x7c] sm:$0x1] }
 0x1b4   : > { %10721 = vst [vmem:[#allocation56_spill] sm:$0xff] %v8444_v24  ;;  %v2315_v6 = vsel %vm2270_vm8, %v2313_v48, %v10722_v16  ;;  %v4983_v49 = vrot.slane %v4982_v4, 4  ;;  %v1192_v18 = vrot.slane %v1190_v60, 5  ;;  %v8456_v10 = vor.u32 %v1730_v25, %v8434_v30  ;;  %v787_v48 = vld [vmem:[#allocation2 + $0x10c] sm:$0x1] }
 0x1b5   : > { %v8432_v7 = vpop.permute.xlu0 %1282  ;;  %2375 = vrot.lane.b32.xlu0 %v2315_v6, %s7406_s9  ;;  %v4495_v5 = vshrl.u32 %v8436_v19, 16  ;;  %v10724_v16 = vcombine.low %v8112_v29, %v8134_v56  ;;  %v1197_v17 = vrot.slane %v1195_v3, 4  ;;  %v1198_v6 = vshll.u32 %v6416_v39, 16 }
 0x1b6   : > { %10723 = vst [vmem:[#allocation57_spill] sm:$0xff] %v8456_v10  ;;  %v1193_v60 = vor.u32 %v1192_v18, %v1189_v57  ;;  %v4498_v35 = vshll.u32 %v8436_v19, 16  ;;  %v4988_v59 = vsel %vm7615_vm11, %v4983_v49, %v8449_v45  ;;  %v4989_v10 = vshrl.u32 %v8393_v42, 16 }
 0x1b7   : > { %v8442_v46 = vpop.permute.xlu1 %1264  ;;  %v1298_v4 = vsel %vm1290_vm13, %v10724_v16, %v8114_v22  ;;  %v6423_v30 = vcombine.low %v984_v40, %v985_v27  ;;  %v8475_v29 = vor.u32 %v1739_v53, %v1738_v47  ;;  %v1200_v39 = vrot.slane %v1198_v6, 5 }
 0x1b8   : > { %1272 = vrot.lane.b32.xlu1 %v1193_v60, %s7406_s9  ;;  %v788_v19 = vsel %vm7523_vm7, 0, %v787_v48  ;;  %v10726_v42 = vcombine.low %v8122_v11, %v8122_v11  ;;  %v6427_v53 = vcombine.low %v1298_v4, %v1298_v4  ;;  %v4497_v57 = vrot.slane %v4495_v5, 7  ;;  %v8492_v48 = vld [vmem:[#allocation2 + $0x74] sm:$0xff]  }
 0x1b9   : > { %v8453_v32 = vpop.permute.xlu0 %3496  ;;  %10725 = vst [vmem:[#allocation58_spill] sm:$0xff] %v8475_v29  ;;  %5259 = vrot.lane.b32.xlu0 %v4988_v59, %s7407_s12  ;;  %v1251_v47 = vshrl.u32 %v6423_v30, 16  ;;  %v1254_v49 = vshll.u32 %v6423_v30, 16  ;;  %789 = vst [vmem:[#allocation2 + $0x10c] sm:$0x1] %v788_v19  ;;  %v1201_v18 = vor.u32 %v1200_v39, %v1197_v17  ;;  %v3483_v27 = vshll.u32 %v8466_v1, 16 }
 0x1ba   : > { %v1300_v40 = vsel %vm1290_vm13, %v10726_v42, %v8114_v22  ;;  %v761_v59 = vsel %vm7523_vm7, 0, %v760_v2  ;;  %v8496_v60 = vcombine.high %v1298_v4, %v1298_v4  ;;  %v4991_v11 = vrot.slane %v4989_v10, 4  ;;  %v7326_v17 = vld [vmem:[#allocation2 + $0x94] sm:$0xff]  }
 0x1bb   : > { %v8468_v25 = vpop.permute.xlu1 %1280  ;;  %v1253_v6 = vrot.slane %v1251_v47, 4  ;;  %v1256_v22 = vrot.slane %v1254_v49, 5  ;;  %762 = vst [vmem:[#allocation2 + $0x7c] sm:$0x1] %v761_v59  ;;  %v8498_v42 = vrot.slane %v4486_v38, 7  ;;  %v8502_v5 = vcombine.low %v1300_v40, %v1300_v40 }
 0x1bc   : > { %v8506_v2 = vsel %vm1290_vm13, %v7326_v17, %v8131_v34  ;;  %v8513_v39 = vshrl.u32 %v6427_v53, 16  ;;  %v10729_v38 = vcombine.low %v8126_v8, %v8138_v26  ;;  %v8520_v47 = vor.u32 %v4498_v35, %v4497_v57  ;;  %v7211_v8 = vld [vmem:[#allocation2 + $0x34] sm:$0xff]  }
 0x1bd   : > { %v8482_v3 = vpop.permute.xlu0 %3512  ;;  %1274 = vrot.lane.b32.xlu0 %v1201_v18, %s7406_s9  ;;  %v1257_v40 = vor.u32 %v1256_v22, %v1253_v6  ;;  %v3481_v34 = vshrl.u32 %v8466_v1, 16  ;;  %v3485_v49 = vrot.slane %v3483_v27, 1  ;;  %v3375_v18 = vshll.u32 %v8492_v48, 16 }
 0x1be   : > { %10728 = vst [vmem:[#allocation60_spill] sm:$0xff] %v8513_v39  ;;  %v1338_v19 = vsel %vm1290_vm13, %v10729_v38, %v8142_v33  ;;  %v1529_v17 = vshrl.u32 %v8496_v60, 16  ;;  %v4992_v6 = vor.u32 %v4991_v11, %v8449_v45  ;;  %v1538_v1 = vshrl.u32 %v8502_v5, 16  ;;  %v7208_v38 = vld [vmem:[#allocation2 + $0x3c] ss:$0 sps:$4 sm:$0x11]  }
 0x1bf   : > { %v8494_v16 = vpop.permute.xlu1 %5245  ;;  %1288 = vrot.lane.b32.xlu1 %v1257_v40, %s7406_s9  ;;  %v10731_v35 = vcombine.low %v8154_v62, %v8154_v62  ;;  %v6451_v27 = vcombine.low %v1338_v19, %v1338_v19  ;;  %v8539_v22 = vcombine.high %v1338_v19, %v1338_v19  ;;  %v1532_v45 = vshll.u32 %v8496_v60, 16  ;;  %v7213_v40 = vld [vmem:[#allocation2 + $0xb4] sm:$0xff]  }
 0x1c0   : > { %10727 = vst [vmem:[#allocation59_spill] sm:$0xff] %v8494_v16  ;;  %v7230_v56 = vld [vmem:[#allocation2 + $0x10c] ss:$0 sps:$4 sm:$0x11]   ;;  %v3373_v26 = vshrl.u32 %v8492_v48, 16  ;;  %v2403_v62 = vsel %vm1290_vm13, %v7211_v8, %v8206_v31  ;;  %v3377_v10 = vrot.slane %v3375_v18, 1 }
 0x1c1   : > { %v8509_v4 = vpop.permute.xlu0 %2341  ;;  %v1340_v57 = vsel %vm1290_vm13, %v10731_v35, %v8142_v33  ;;  %v3486_v33 = vor.u32 %v3485_v49, %v3481_v34  ;;  %v3488_v35 = vshll.u32 %v7230_v56, 16  ;;  %v8551_v16 = vrot.slane %v1529_v17, 7  ;;  %v3772_v8 = vld [vmem:[#allocation2 + $0x40] sm:$0x8] }
 0x1c2   : > { %v4824_v19 = vld [vmem:[#allocation2 + $0x7c] sm:$0x1]  ;;  %v8553_v29 = vcombine.low %v1340_v57, %v1340_v57  ;;  %v4993_v30 = vrot.slane %v4992_v6, 4  ;;  %v8555_v11 = vrot.slane %v1538_v1, 7  ;;  %v8557_v24 = vshrl.u32 %v6451_v27, 16 }
 0x1c3   : > { %v8524_v59 = vpop.permute.xlu1 %5277  ;;  %10733 = vst [vmem:[#allocation63_spill] sm:$0xff] %v8551_v16  ;;  %v4995_v60 = vshll.u32 %v4824_v19, 16  ;;  %v7232_v39 = vld [vmem:[#allocation2 + $0x7c] ss:$0 sps:$4 sm:$0x11]   ;;  %v1705_v48 = vshrl.u32 %v8539_v22, 16  ;;  %v6561_v56 = vcombine.low %v2403_v62, %v2403_v62  ;;  %v2451_v49 = vsel %vm1290_vm13, %v7213_v40, %v8239_v50 }
 0x1c4   : > { %10730 = vst [vmem:[#allocation61_spill] sm:$0xff] %v8524_v59  ;;  %10734 = vst [vmem:[#allocation64_spill] sm:$0xff] %v8557_v24  ;;  %v3490_v31 = vrot.slane %v3488_v35, 1  ;;  %v3380_v17 = vshll.u32 %v7232_v39, 16  ;;  %v2406_v6 = vsel %vm1290_vm13, %v7208_v38, %v8164_v52  ;;  %v3378_v27 = vor.u32 %v3377_v10, %v3373_v26  ;;  %v784_v19 = vld [vmem:[#allocation2 + $0xfc] sm:$0x1] }
 0x1c5   : > { %v8541_v53 = vpop.permute.xlu0 %2373  ;;  %v4997_v18 = vrot.slane %v4995_v60, 5  ;;  %v7210_v1 = vld [vmem:[#allocation2 + $0xbc] ss:$0 sps:$4 sm:$0x11]   ;;  %v1714_v35 = vshrl.u32 %v8553_v29, 16  ;;  %v8574_v40 = vld [vmem:[#allocation2 + $0xf4] sm:$0xff]   ;;  %v8577_v52 = vor.u32 %v1532_v45, %v8551_v16  ;;  %v6585_v26 = vcombine.low %v2451_v49, %v2451_v49 }
 0x1c6   : > { %10732 = vst [vmem:[#allocation62_spill] sm:$0xff] %v8541_v53  ;;  %v3491_v57 = vsel %vm3299_vm12, %v3486_v33, %v3490_v31  ;;  %v3382_v39 = vrot.slane %v3380_v17, 1  ;;  %v6563_v60 = vcombine.low %v2406_v6, %v2406_v6  ;;  %v2683_v31 = vshrl.u32 %v6561_v56, 16 }
 0x1c7   : > { %v8549_v59 = vpop.permute.xlu1 %2339  ;;  %3522 = vrot.lane.b32.xlu0 %v3491_v57, %s7406_s9  ;;  %v4998_v50 = vsel %vm7615_vm11, %v4993_v30, %v4997_v18  ;;  %10736 = vst [vmem:[#allocation66_spill] sm:$0xff] %v8577_v52  ;;  %v785_v30 = vsel %vm7523_vm7, 0, %v784_v19  ;;  %v2454_v45 = vsel %vm1290_vm13, %v7210_v1, %v8192_v43  ;;  %v2686_v18 = vshll.u32 %v6561_v56, 16 }
 0x1c8   : > { %5261 = vrot.lane.b32.xlu1 %v4998_v50, %s7407_s12  ;;  %v6586_v17 = vcombine.high %v2451_v49, %v2451_v49  ;;  %v3383_v57 = vsel %vm3299_vm12, %v3378_v27, %v3382_v39  ;;  %786 = vst [vmem:[#allocation2 + $0xfc] sm:$0x1] %v785_v30  ;;  %v1716_v50 = vrot.slane %v1714_v35, 7  ;;  %v1717_v38 = vshll.u32 %v8553_v29, 16 }
 0x1c9   : > { %v8560_v34 = vpop.permute.xlu0 %5255  ;;  %v3471_v6 = vshll.u32 %v8574_v40, 16  ;;  %v2875_v41 = vshrl.u32 %v6585_v26, 16  ;;  %v2878_v24 = vshll.u32 %v6585_v26, 16  ;;  %v10740_v43 = vcombine.low %v8180_v28, %v8180_v28  ;;  %v7327_v28 = vld [vmem:[#allocation2 + $0x44] sm:$0xf] }
 0x1ca   : > { %10735 = vst [vmem:[#allocation65_spill] sm:$0xff] %v8560_v34  ;;  %v6562_v34 = vcombine.high %v2403_v62, %v2403_v62  ;;  %v8584_v62 = vrot.slane %v1705_v48, 7  ;;  %v10741_v29 = vcombine.high %v8295_v14, %v8295_v14  ;;  %v8608_v27 = vshll.u32 %v6563_v60, 16 }
 0x1cb   : > { %v8568_v53 = vpop.permute.xlu1 %2371  ;;  %3504 = vrot.lane.b32.xlu0 %v3383_v57, %s7406_s9  ;;  %v4132_v56 = vsel %vm1290_vm13, %v10740_v43, %v8259_v12  ;;  %v2685_v35 = vrot.slane %v2683_v31, 4  ;;  %v2688_v39 = vrot.slane %v2686_v18, 5  ;;  %v2884_v26 = vshll.u32 %v6586_v17, 16  ;;  %v7218_v43 = vld [vmem:[#allocation2 + $0x2c] ss:$0 sps:$4 sm:$0x11]  }
 0x1cc   : > { %10738 = vst [vmem:[#allocation68_spill] sm:$0xff] %v8584_v62  ;;  %v2692_v48 = vshll.u32 %v6562_v34, 16  ;;  %v2696_v19 = vshrl.u32 %v6562_v34, 16  ;;  %3642 = vrot.lane.b32.xlu1 %v10741_v29, %s7408_s15  ;;  %v6587_v34 = vcombine.low %v2454_v45, %v2454_v45  ;;  %v2888_v30 = vshrl.u32 %v6586_v17, 16  ;;  %v3796_v45 = vld [vmem:[#allocation2 + $0xc0] sm:$0x8] }
 0x1cd   : > { %v8582_v33 = vpop.permute.xlu0 %2337  ;;  %v6668_v57 = vcombine.low %v3772_v8, %v7327_v28  ;;  %v3469_v29 = vshrl.u32 %v8574_v40, 16  ;;  %v2877_v60 = vrot.slane %v2875_v41, 4  ;;  %v10743_v8 = vcombine.high %v8354_v51, %v8354_v51 }
 0x1ce   : > { %10737 = vst [vmem:[#allocation67_spill] sm:$0xff] %v8582_v33  ;;  %v8612_v16 = vrot.slane %v2692_v48, 5  ;;  %v2698_v1 = vrot.slane %v2696_v19, 4  ;;  %v2880_v33 = vrot.slane %v2878_v24, 5  ;;  %v10744_v18 = vshll.u32 %v8502_v5, 16 }
 0x1cf   : > { %v8591_v10 = vpop.permute.xlu1 %4094  ;;  %v4130_v31 = vsel %vm1290_vm13, %v6668_v57, %v8259_v12  ;;  %v10746_v40 = vshll.u32 %v8539_v22, 16  ;;  %v8633_v41 = vor.u32 %v1717_v38, %v1716_v50  ;;  %v8635_v24 = vshll.u32 %v6587_v34, 16  ;;  %v7234_v12 = vld [vmem:[#allocation2 + $0xfc] ss:$0 sps:$4 sm:$0x11]  }
 0x1d0   : > { %10739 = vst [vmem:[#allocation69_spill] sm:$0xff] %v8591_v10  ;;  %v8614_v10 = vcombine.low %v4132_v56, %v4132_v56  ;;  %3674 = vrot.lane.b32.xlu1 %v10743_v8, %s7408_s15  ;;  %v8626_v17 = vor.u32 %v10744_v18, %v8555_v11  ;;  %v8637_v19 = vrot.slane %v2884_v26, 5  ;;  %v2890_v56 = vrot.slane %v2888_v30, 4 }
 0x1d1   : > { %v8605_v49 = vpop.permute.xlu0 %2369  ;;  %v8631_v48 = vor.u32 %v10746_v40, %v8584_v62  ;;  %10748 = vst [vmem:[#allocation73_spill] sm:$0xff] %v8633_v41  ;;  %v2400_v28 = vsel %vm1290_vm13, %v7218_v43, %v8268_v63  ;;  %v6718_v57 = vcombine.low %v4130_v31, %v4130_v31  ;;  %v3476_v38 = vshll.u32 %v7234_v12, 16  ;;  %v7224_v40 = vld [vmem:[#allocation2 + $0x24] sm:$0xff]  }
 0x1d2   : > { %10742 = vst [vmem:[#allocation70_spill] sm:$0xff] %v8605_v49  ;;  %v3473_v49 = vrot.slane %v3471_v6, 1  ;;  %10745 = vst [vmem:[#allocation71_spill] sm:$0xff] %v8626_v17  ;;  %v2689_v6 = vor.u32 %v2688_v39, %v2685_v35  ;;  %v4385_v22 = vshrl.u32 %v8614_v10, 16  ;;  %v2699_v50 = vor.u32 %v2698_v1, %v8612_v16  ;;  %v7328_v35 = vld [vmem:[#allocation2 + $0xc4] sm:$0xf] }
 0x1d3   : > { %v8610_v52 = vpop.permute.xlu1 %4110  ;;  %10747 = vst [vmem:[#allocation72_spill] sm:$0xff] %v8631_v48  ;;  %10749 = vst [vmem:[#allocation74_spill] sm:$0xff] %v8637_v19  ;;  %v2881_v34 = vor.u32 %v2880_v33, %v2877_v60  ;;  %v8647_v18 = vcombine.high %v4130_v31, %v4130_v31  ;;  %v6684_v39 = vcombine.low %v3796_v45, %v7328_v35  ;;  %v8667_v12 = vshrl.u32 %v6718_v57, 16  ;;  %v10764_v48 = vld [vmem:[#allocation35_spill] sm:$0xff]  ;;  %v10771_v41 = vld [vmem:[#allocation29_spill] sm:$0xff] }
 0x1d4   : > { %v3474_v8 = vor.u32 %v3473_v49, %v3469_v29  ;;  %v10752_v63 = vcombine.high %v8440_v23, %v8440_v23  ;;  %v6560_v43 = vcombine.low %v2400_v28, %v2400_v28  ;;  %v3478_v49 = vrot.slane %v3476_v38, 1  ;;  %v7221_v38 = vld [vmem:[#allocation2 + $0xac] ss:$0 sps:$4 sm:$0x11]  }
 0x1d5   : > { %v8641_v5 = vpop.permute.xlu0 %2335  ;;  %10751 = vst [vmem:[#allocation76_spill] sm:$0xff] %v8647_v18  ;;  %v8655_v29 = vrot.slane %v2689_v6, 4  ;;  %v2891_v33 = vor.u32 %v2890_v56, %v8637_v19  ;;  %v4170_v1 = vsel %vm1290_vm13, %v6684_v39, %v8285_v36  ;;  %v10753_v60 = vcombine.low %v8184_v0, %v8184_v0  ;;  %10755 = vst [vmem:[#allocation78_spill] sm:$0xff] %v8667_v12  ;;  %v10756_v6 = vld [vmem:[#allocation43_spill] sm:$0xff]  ;;  %v7226_v56 = vld [vmem:[#allocation2 + $0xa4] sm:$0xff]  }
 0x1d6   : > { %3638 = vrot.lane.b32.xlu1 %v10752_v63, %s7408_s15  ;;  %v4387_v28 = vrot.slane %v4385_v22, 7  ;;  %v2397_v35 = vsel %vm1290_vm13, %v7224_v40, %v10756_v6  ;;  %v3479_v63 = vsel %vm3299_vm12, %v3474_v8, %v3478_v49  ;;  %v8672_v39 = vrot.slane %v2699_v50, 4  ;;  %v950_v12 = vld [vmem:[#allocation2 + $0x40] sm:$0x8] }
 0x1d7   : > { %v8643_v11 = vpop.permute.xlu1 %3502  ;;  %v4172_v31 = vsel %vm1290_vm13, %v10753_v60, %v8285_v36  ;;  %v8674_v30 = vrot.slane %v2881_v34, 4  ;;  %v4376_v0 = vshrl.u32 %v8647_v18, 16  ;;  %v4388_v36 = vshll.u32 %v8614_v10, 16  ;;  %3520 = vrot.lane.b32.xlu0 %v3479_v63, %s7406_s9 }
 0x1d8   : > { %10750 = vst [vmem:[#allocation75_spill] sm:$0xff] %v8643_v11  ;;  %v10758_v57 = vcombine.high %v8506_v2, %v8506_v2  ;;  %v8685_v40 = vshll.u32 %v6560_v43, 16  ;;  %v6742_v8 = vcombine.low %v4170_v1, %v4170_v1  ;;  %v8687_v50 = vcombine.low %v4172_v31, %v4172_v31 }
 0x1d9   : > { %10757 = vst [vmem:[#allocation43_spill] sm:$0xff] %v8674_v30  ;;  %v8683_v22 = vpop.permute.xlu0 %2367  ;;  %v2445_v34 = vsel %vm1290_vm13, %v7226_v56, %v8336_v21  ;;  %v8691_v49 = vrot.slane %v2891_v33, 4  ;;  %v6558_v60 = vcombine.low %v2397_v35, %v2397_v35  ;;  %v6559_v6 = vcombine.high %v2397_v35, %v2397_v35  ;;  %v10765_v56 = vld [vmem:[#allocation40_spill] sm:$0xff]  ;;  %v10782_v30 = vld [vmem:[#allocation39_spill] sm:$0xff] }
 0x1da   : > { %3670 = vrot.lane.b32.xlu1 %v10758_v57, %s7408_s15  ;;  %10759 = vst [vmem:[#allocation79_spill] sm:$0xff] %v8685_v40  ;;  %v8697_v26 = vor.u32 %v4388_v36, %v4387_v28  ;;  %v8699_v43 = vcombine.high %v4170_v1, %v4170_v1  ;;  %v8706_v33 = vrot.slane %v4376_v0, 7  ;;  %v2448_v10 = vsel %vm1290_vm13, %v7221_v38, %v10765_v56  ;;  %v10769_v57 = vld [vmem:[#allocation20_spill] sm:$0xff]  ;;  %v10772_v1 = vld [vmem:[#allocation33_spill] sm:$0xff] }
 0x1db   : > { %v8665_v45 = vpop.permute.xlu1 %5257  ;;  %v6582_v35 = vcombine.low %v2445_v34, %v2445_v34  ;;  %v6583_v62 = vcombine.high %v2445_v34, %v2445_v34  ;;  %v10766_v28 = vcombine.low %v8295_v14, %v8295_v14  ;;  %v4564_v0 = vshll.u32 %v8687_v50, 16 }
 0x1dc   : > { %10754 = vst [vmem:[#allocation77_spill] sm:$0xff] %v8665_v45  ;;  %10761 = vst [vmem:[#allocation81_spill] sm:$0xff] %v8699_v43  ;;  %v10762_v45 = vld [vmem:[#allocation19_spill] sm:$0xff]  ;;  %v2659_v36 = vshrl.u32 %v6558_v60, 16  ;;  %v2662_v38 = vshll.u32 %v6558_v60, 16  ;;  %v2672_v34 = vshrl.u32 %v6559_v6, 16 }
 0x1dd   : > { %v10763_v31 = vrot.slane %v10762_v45, 5  ;;  %3640 = vrot.lane.b32.xlu0 %v10766_v28, %s7408_s15  ;;  %v8716_v45 = vshrl.u32 %v6742_v8, 16  ;;  %v8720_v56 = vpop.permute.xlu0 %5251  ;;  %v4552_v14 = vshrl.u32 %v8699_v43, 16  ;;  %v4339_v17 = vrot.slane %v10772_v1, 4  ;;  %v10775_v43 = vld [vmem:[#allocation41_spill] sm:$0xff] }
 0x1de   : > { %10768 = vst [vmem:[#allocation35_spill] sm:$0xff] %v8720_v56  ;;  %v2851_v40 = vshrl.u32 %v6582_v35, 16  ;;  %v2860_v11 = vshll.u32 %v6583_v62, 16  ;;  %v2864_v60 = vshrl.u32 %v6583_v62, 16  ;;  %v4515_v19 = vrot.slane %v10782_v30, 4 }
 0x1df   : > { %v8694_v63 = vpop.permute.xlu1 %4092  ;;  %v2657_v21 = vsel %vm7615_vm11, %v10764_v48, %v10763_v31  ;;  %10767 = vst [vmem:[#allocation19_spill] sm:$0xff] %v8716_v45  ;;  %v4561_v48 = vshrl.u32 %v8687_v50, 16  ;;  %v2668_v31 = vshll.u32 %v6559_v6, 16  ;;  %v2854_v50 = vshll.u32 %v6582_v35, 16 }
 0x1e0   : > { %10760 = vst [vmem:[#allocation80_spill] sm:$0xff] %v8694_v63  ;;  %3000 = vrot.lane.b32.xlu1 %v2657_v21, %s7409_s16  ;;  %v10770_v21 = vrot.slane %v10769_v57, 5  ;;  %v3769_v63 = vld [vmem:[#allocation2 + $0x30] sm:$0x8]  ;;  %v10773_v6 = vcombine.low %v8354_v51, %v8354_v51  ;;  %v2661_v51 = vrot.slane %v2659_v36, 4  ;;  %v2853_v36 = vrot.slane %v2851_v40, 4 }
 0x1e1   : > { %v4563_v56 = vrot.slane %v4561_v48, 7  ;;  %v7330_v57 = vld [vmem:[#allocation2 + $0x34] sm:$0xf]  ;;  %v7331_v40 = vld [vmem:[#allocation2 + $0x44] sm:$0xf]  ;;  %vm5335_vm4 = vcmask 290048  }
 0x1e2   : > { %v2849_v8 = vsel %vm7615_vm11, %v10771_v41, %v10770_v21  ;;  %3672 = vrot.lane.b32.xlu0 %v10773_v6, %s7408_s15  ;;  %v6584_v41 = vcombine.low %v2448_v10, %v2448_v10  ;;  %v7329_v21 = vld [vmem:[#allocation2 + $0x44] sm:$0xff]   ;;  %v2664_v6 = vrot.slane %v2662_v38, 5  ;;  %v6666_v48 = vcombine.low %v3769_v63, %v7330_v57  ;;  %v10779_v10 = vld [vmem:[#allocation27_spill] sm:$0xff] }
 0x1e3   : > { %v8735_v28 = vpop.permute.xlu1 %4108  ;;  %v8740_v35 = vsel %vm1290_vm13, %v7329_v21, %v10775_v43  ;;  %v10780_v45 = vcombine.low %v10779_v10, %v10779_v10  ;;  %v10781_v21 = vld [vmem:[#allocation37_spill] sm:$0xff]  ;;  %v2856_v38 = vrot.slane %v2854_v50, 5  ;;  %v10784_v63 = vcombine.low %v8440_v23, %v8440_v23 }
 0x1e4   : > { %3032 = vrot.lane.b32.xlu1 %v2849_v8, %s7409_s16  ;;  %10774 = vst [vmem:[#allocation40_spill] sm:$0xff] %v8735_v28  ;;  %v8748_v8 = vrot.slane %v2668_v31, 5  ;;  %v2674_v28 = vrot.slane %v2672_v34, 4  ;;  %v4347_v18 = vsel %vm8744_vm15, %v4339_v17, %v10781_v21  ;;  %v8759_v31 = vrot.slane %v2860_v11, 5  ;;  %v7332_v23 = vld [vmem:[#allocation2 + $0xc4] sm:$0xff]  }
 0x1e5   : > { %v4127_v43 = vsel %vm1290_vm13, %v10780_v45, %v8395_v58  ;;  %v2866_v34 = vrot.slane %v2864_v60, 4  ;;  %v8766_v45 = vpop.permute.xlu0 %5283  ;;  %v8768_v57 = vshll.u32 %v6584_v41, 16  ;;  %v4125_v11 = vsel %vm1290_vm13, %v6666_v48, %v8395_v58  ;;  %v10786_v21 = vld [vmem:[#allocation44_spill] sm:$0xff] }
 0x1e6   : > { %10778 = vst [vmem:[#allocation20_spill] sm:$0xff] %v8748_v8  ;;  %10783 = vst [vmem:[#allocation29_spill] sm:$0xff] %v8759_v31  ;;  %3636 = vrot.lane.b32.xlu0 %v10784_v63, %s7408_s15  ;;  %v6384_v50 = vcombine.low %v950_v12, %v7331_v40  ;;  %v8774_v60 = vor.u32 %v4564_v0, %v4563_v56  ;;  %v2665_v10 = vor.u32 %v2664_v6, %v2661_v51  ;;  %v10788_v12 = vld [vmem:[#allocation42_spill] sm:$0xff]  ;;  %v10795_v40 = vld [vmem:[#allocation32_spill] sm:$0xff] }
 0x1e7   : > { %10785 = vst [vmem:[#allocation33_spill] sm:$0xff] %v8766_v45  ;;  %v8778_v63 = vsel %vm1290_vm13, %v7332_v23, %v10786_v21  ;;  %v8782_v41 = vpop.permute.xlu1 %1268  ;;  %v2675_v45 = vor.u32 %v2674_v28, %v8748_v8  ;;  %v4523_v0 = vsel %vm8744_vm15, %v4515_v19, %v10788_v12  ;;  %v8792_v56 = vrot.slane %v4552_v14, 7  ;;  %v10794_v28 = vld [vmem:[#allocation24_spill] sm:$0xff]  ;;  %v10796_v19 = vld [vmem:[#allocation22_spill] sm:$0xff] }
 0x1e8   : > { %4680 = vrot.lane.b32.xlu1 %v4347_v18, %s7410_s17  ;;  %v8780_v18 = vcombine.low %v4127_v43, %v4127_v43  ;;  %10787 = vst [vmem:[#allocation41_spill] sm:$0xff] %v8782_v41  ;;  %v1313_v58 = vsel %vm1290_vm13, %v6384_v50, %v8411_v54  ;;  %v2857_v51 = vor.u32 %v2856_v38, %v2853_v36  ;;  %v3793_v36 = vld [vmem:[#allocation2 + $0xb0] sm:$0x8]  ;;  %v8807_v38 = vrot.slane %v2665_v10, 4 }
 0x1e9   : > { %v2867_v6 = vor.u32 %v2866_v34, %v8759_v31  ;;  %v6715_v48 = vcombine.low %v4125_v11, %v4125_v11  ;;  %v10789_v43 = vcombine.low %v8506_v2, %v8506_v2  ;;  %v8805_v14 = vcombine.high %v4125_v11, %v4125_v11  ;;  %v10791_v2 = vld [vmem:[#allocation28_spill] sm:$0xff]  ;;  %v8817_v12 = vpop.permute.xlu0 %1270 }
 0x1ea   : > { %10790 = vst [vmem:[#allocation27_spill] sm:$0xff] %v8807_v38  ;;  %v4363_v34 = vshrl.u32 %v8780_v18, 16  ;;  %v10792_v50 = vcombine.low %v10791_v2, %v10791_v2  ;;  %v8815_v21 = vcombine.high %v1313_v58, %v1313_v58  ;;  %10793 = vst [vmem:[#allocation37_spill] sm:$0xff] %v8817_v12  ;;  %v2647_v10 = vsel %vm7615_vm11, %v10795_v40, %v10794_v28  ;;  %v10801_v38 = vld [vmem:[#allocation25_spill] sm:$0xff] }
 0x1eb   : > { %3668 = vrot.lane.b32.xlu0 %v10789_v43, %s7408_s15  ;;  %v7333_v43 = vld [vmem:[#allocation2 + $0xb8] sm:$0xf]  ;;  %v10797_v17 = vrot.slane %v10796_v19, 5  ;;  %v8834_v31 = vshrl.u32 %v6715_v48, 16  ;;  %v8838_v28 = vpop.permute.xlu1 %1284  ;;  %v4354_v40 = vshrl.u32 %v8805_v14, 16  ;;  %v4366_v19 = vshll.u32 %v8780_v18, 16 }
 0x1ec   : > { %4712 = vrot.lane.b32.xlu1 %v4523_v0, %s7410_s17  ;;  %v1315_v23 = vsel %vm1290_vm13, %v10792_v50, %v8411_v54  ;;  %v8819_v0 = vrot.slane %v2675_v45, 4  ;;  %v6683_v11 = vcombine.low %v7333_v43, %v7333_v43  ;;  %v8830_v54 = vrot.slane %v2857_v51, 4  ;;  %v7334_v45 = vld [vmem:[#allocation2 + $0xb4] sm:$0xf]  ;;  %v974_v43 = vld [vmem:[#allocation2 + $0xc0] sm:$0x8] }
 0x1ed   : > { %v2633_v2 = vsel %vm7615_vm11, %v8397_v55, %v10797_v17  ;;  %v8832_v50 = vrot.slane %v2867_v6, 4  ;;  %v6682_v41 = vcombine.low %v3793_v36, %v7334_v45  ;;  %10799 = vst [vmem:[#allocation44_spill] sm:$0xff] %v8838_v28  ;;  %v6438_v55 = vcombine.low %v1315_v23, %v1315_v23  ;;  %v7335_v45 = vld [vmem:[#allocation2 + $0xc4] sm:$0xf]  ;;  %v10802_v23 = vld [vmem:[#allocation23_spill] sm:$0xff] }
 0x1ee   : > { %10798 = vst [vmem:[#allocation39_spill] sm:$0xff] %v8830_v54  ;;  %v4167_v17 = vsel %vm1290_vm13, %v6683_v11, %v8424_v13  ;;  %v4365_v51 = vrot.slane %v4363_v34, 7  ;;  %v6436_v6 = vcombine.low %v1313_v58, %v1313_v58  ;;  %v1595_v48 = vshrl.u32 %v8815_v21, 16  ;;  %v10800_v54 = vld [vmem:[#allocation18_spill] sm:$0xff]  ;;  %v7336_v12 = vld [vmem:[#allocation2 + $0xc8] sm:$0xf] }
 0x1ef   : > { %2998 = vrot.lane.b32.xlu0 %v2647_v10, %s7409_s16  ;;  %v4165_v36 = vsel %vm1290_vm13, %v6682_v41, %v8424_v13  ;;  %v947_v10 = vld [vmem:[#allocation2 + $0x30] sm:$0x8]  ;;  %v6400_v28 = vcombine.low %v974_v43, %v7335_v45  ;;  %v2839_v18 = vsel %vm7615_vm11, %v10801_v38, %v10800_v54  ;;  %v10803_v11 = vshll.u32 %v10802_v23, 16  ;;  %v8864_v45 = vpop.permute.xlu0 %1286 }
 0x1f0   : > { %2996 = vrot.lane.b32.xlu1 %v2633_v2, %s7409_s16  ;;  %v8856_v8 = vcombine.low %v4167_v17, %v4167_v17  ;;  %v6401_v13 = vcombine.low %v7336_v12, %v7336_v12  ;;  %v10804_v41 = vrot.slane %v8346_v20, 5  ;;  %v8866_v38 = vrot.slane %v4354_v40, 7  ;;  %v7337_v17 = vld [vmem:[#allocation2 + $0x34] sm:$0xf] }
 0x1f1   : > { %v4337_v34 = vor.u32 %v10803_v11, %v10772_v1  ;;  %v1604_v54 = vshrl.u32 %v6438_v55, 16  ;;  %v1353_v1 = vsel %vm1290_vm13, %v6400_v28, %v8432_v7  ;;  %v6382_v23 = vcombine.low %v947_v10, %v7337_v17  ;;  %v8879_v11 = vpop.permute.xlu1 %5253  ;;  %v10808_v28 = vld [vmem:[#allocation26_spill] sm:$0xff] }
 0x1f2   : > { %v2825_v43 = vsel %vm7615_vm11, %v8413_v15, %v10804_v41  ;;  %v8871_v12 = vor.u32 %v4366_v19, %v4365_v51  ;;  %v8875_v20 = vrot.slane %v1595_v48, 7  ;;  %v1355_v15 = vsel %vm1290_vm13, %v6401_v13, %v8432_v7  ;;  %10807 = vst [vmem:[#allocation24_spill] sm:$0xff] %v8879_v11  ;;  %v10810_v19 = vld [vmem:[#allocation31_spill] sm:$0xff] }
 0x1f3   : > { %3030 = vrot.lane.b32.xlu0 %v2839_v18, %s7409_s16  ;;  %v8873_v18 = vshrl.u32 %v6436_v6, 16  ;;  %v6739_v40 = vcombine.low %v4165_v36, %v4165_v36  ;;  %v1308_v41 = vsel %vm1290_vm13, %v6382_v23, %v8442_v46  ;;  %v10809_v58 = vrot.slane %v10808_v28, 11  ;;  %v7338_v13 = vld [vmem:[#allocation2 + $0x38] sm:$0xf] }
 0x1f4   : > { %3028 = vrot.lane.b32.xlu1 %v2825_v43, %s7409_s16  ;;  %10806 = vst [vmem:[#allocation28_spill] sm:$0xff] %v8875_v20  ;;  %v10811_v51 = vshll.u32 %v10810_v19, 16  ;;  %v8890_v48 = vcombine.high %v4165_v36, %v4165_v36  ;;  %v4539_v43 = vshrl.u32 %v8856_v8, 16  ;;  %v8893_v7 = vcombine.high %v1353_v1, %v1353_v1 }
 0x1f5   : > { %10805 = vst [vmem:[#allocation42_spill] sm:$0xff] %v8873_v18  ;;  %v4338_v10 = vsel %vm8744_vm15, %v10809_v58, %v4337_v34  ;;  %v6383_v17 = vcombine.low %v7338_v13, %v7338_v13  ;;  %v1598_v23 = vshll.u32 %v8815_v21, 16  ;;  %v1606_v28 = vrot.slane %v1604_v54, 7 }
 0x1f6   : > { %v4513_v6 = vor.u32 %v10811_v51, %v10782_v30  ;;  %10812 = vst [vmem:[#allocation32_spill] sm:$0xff] %v8890_v48  ;;  %v1607_v2 = vshll.u32 %v6438_v55, 16  ;;  %v6462_v11 = vcombine.low %v1355_v15, %v1355_v15  ;;  %v10813_v34 = vcombine.high %v8740_v35, %v8740_v35  ;;  %v8906_v51 = vpop.permute.xlu0 %3518  ;;  %v10816_v15 = vld [vmem:[#allocation36_spill] sm:$0xff]  ;;  %v8921_v30 = vpop.permute.xlu1 %5285 }
 0x1f7   : > { %4678 = vrot.lane.b32.xlu0 %v4338_v10, %s7410_s17  ;;  %v6460_v36 = vcombine.low %v1353_v1, %v1353_v1  ;;  %v1310_v58 = vsel %vm1290_vm13, %v6383_v17, %v8442_v46  ;;  %v8904_v19 = vcombine.high %v1308_v41, %v1308_v41  ;;  %v8909_v21 = vor.u32 %v1598_v23, %v8875_v20  ;;  %v3778_v20 = vld [vmem:[#allocation2 + $0x60] sm:$0x8] }
 0x1f8   : > { %3650 = vrot.lane.b32.xlu1 %v10813_v34, %s7408_s15  ;;  %v8912_v54 = vshrl.u32 %v6739_v40, 16  ;;  %v10817_v10 = vrot.slane %v10816_v15, 11  ;;  %v4530_v1 = vshrl.u32 %v8890_v48, 16  ;;  %v4541_v34 = vrot.slane %v4539_v43, 7  ;;  %10818 = vst [vmem:[#allocation25_spill] sm:$0xff] %v8921_v30 }
 0x1f9   : > { %10814 = vst [vmem:[#allocation22_spill] sm:$0xff] %v8909_v21  ;;  %v1771_v46 = vshrl.u32 %v8893_v7, 16  ;;  %v6433_v17 = vcombine.low %v1308_v41, %v1308_v41  ;;  %v8923_v23 = vor.u32 %v1607_v2, %v1606_v28  ;;  %v1780_v55 = vshrl.u32 %v6462_v11, 16  ;;  %v971_v41 = vld [vmem:[#allocation2 + $0xb0] sm:$0x8]  ;;  %v7339_v21 = vld [vmem:[#allocation2 + $0x34] sm:$0xff]  }
 0x1fa   : > { %10815 = vst [vmem:[#allocation18_spill] sm:$0xff] %v8912_v54  ;;  %v4514_v13 = vsel %vm8744_vm15, %v10817_v10, %v4513_v6  ;;  %v8925_v40 = vcombine.low %v1310_v58, %v1310_v58  ;;  %v4493_v15 = vrot.slane %v8498_v42, 4  ;;  %v4542_v6 = vshll.u32 %v8856_v8, 16 }
 0x1fb   : > { %4710 = vrot.lane.b32.xlu0 %v4514_v13, %s7410_s17  ;;  %10819 = vst [vmem:[#allocation23_spill] sm:$0xff] %v8923_v23  ;;  %v8930_v10 = vshrl.u32 %v6460_v36, 16  ;;  %v1573_v43 = vshrl.u32 %v8904_v19, 16  ;;  %v8936_v2 = vsel %vm1290_vm13, %v7339_v21, %v8453_v32  ;;  %v2623_v28 = vsel %vm7615_vm11, %v8383_v44, %v8340_v37  ;;  %v8955_v32 = vpop.permute.xlu0 %3500  ;;  %v10837_v23 = vld [vmem:[#allocation56_spill] sm:$0xff] }
 0x1fc   : > { %v4501_v8 = vsel %vm8744_vm15, %v4493_v15, %v8520_v47  ;;  %v8945_v36 = vrot.slane %v4530_v1, 7  ;;  %v8947_v58 = vor.u32 %v4542_v6, %v4541_v34  ;;  %v8949_v18 = vrot.slane %v1771_v46, 7  ;;  %v7340_v47 = vld [vmem:[#allocation2 + $0xb4] sm:$0xf] }
 0x1fd   : > { %10820 = vst [vmem:[#allocation26_spill] sm:$0xff] %v8930_v10  ;;  %v8951_v13 = vshrl.u32 %v6433_v17, 16  ;;  %4708 = vrot.lane.b32.xlu1 %v4501_v8, %s7410_s17  ;;  %v1774_v37 = vshll.u32 %v8893_v7, 16  ;;  %v1782_v44 = vrot.slane %v1780_v55, 7  ;;  %v1582_v21 = vshrl.u32 %v8925_v40, 16  ;;  %v7237_v15 = vld [vmem:[#allocation2 + $0x54] sm:$0xff]  }
 0x1fe   : > { %10821 = vst [vmem:[#allocation31_spill] sm:$0xff] %v8949_v18  ;;  %v6398_v1 = vcombine.low %v971_v41, %v7340_v47  ;;  %v1783_v46 = vshll.u32 %v6462_v11, 16  ;;  %v8960_v6 = vrot.slane %v1573_v43, 7  ;;  %v7341_v8 = vld [vmem:[#allocation2 + $0xb8] sm:$0xf]  ;;  %v2415_v55 = vsel %vm1290_vm13, %v7237_v15, %v8549_v59  ;;  %v10824_v47 = vld [vmem:[#allocation52_spill] sm:$0xff] }
 0x1ff   : > { %10822 = vst [vmem:[#allocation36_spill] sm:$0xff] %v8951_v13  ;;  %2994 = vrot.lane.b32.xlu0 %v2623_v28, %s7409_s16  ;;  %v8964_v28 = vpop.permute.xlu1 %2347  ;;  %v6399_v30 = vcombine.low %v7341_v8, %v7341_v8  ;;  %v7238_v41 = vld [vmem:[#allocation2 + $0xd4] sm:$0xff]   ;;  %v2815_v11 = vsel %vm7615_vm11, %v10824_v47, %v8363_v9  ;;  %v8975_v43 = vor.u32 %v1774_v37, %v8949_v18  ;;  %v1576_v8 = vshll.u32 %v8904_v19, 16  ;;  %v7235_v37 = vld [vmem:[#allocation2 + $0x5c] ss:$0 sps:$4 sm:$0x11]  }
 0x200   : > { %10823 = vst [vmem:[#allocation82_spill] sm:$0xff] %v8960_v6  ;;  %v1348_v7 = vsel %vm1290_vm13, %v6398_v1, %v8468_v25  ;;  %v10826_v59 = vcombine.high %v8778_v63, %v8778_v63  ;;  %v8985_v1 = vor.u32 %v1783_v46, %v1782_v44  ;;  %v1584_v15 = vrot.slane %v1582_v21, 7  ;;  %v8997_v46 = vpop.permute.xlu0 %3516 }
 0x201   : > { %10825 = vst [vmem:[#allocation52_spill] sm:$0xff] %v8975_v43  ;;  %v1350_v9 = vsel %vm1290_vm13, %v6399_v30, %v8468_v25  ;;  %v2463_v47 = vsel %vm1290_vm13, %v7238_v41, %v8568_v53  ;;  %v6637_v19 = vcombine.high %v8936_v2, %v8936_v2  ;;  %v6457_v34 = vcombine.low %v1348_v7, %v1348_v7  ;;  %v10830_v53 = vld [vmem:[#allocation54_spill] sm:$0xff] }
 0x202   : > { %3682 = vrot.lane.b32.xlu1 %v10826_v59, %s7408_s15  ;;  %10827 = vst [vmem:[#allocation83_spill] sm:$0xff] %v8985_v1  ;;  %v7236_v59 = vld [vmem:[#allocation2 + $0xdc] ss:$0 sps:$4 sm:$0x11]   ;;  %v6567_v44 = vcombine.low %v2415_v55, %v2415_v55  ;;  %10828 = vst [vmem:[#allocation84_spill] sm:$0xff] %v8997_v46  ;;  %v9000_v21 = vor.u32 %v1576_v8, %v8960_v6  ;;  %v1585_v25 = vshll.u32 %v8925_v40, 16 }
 0x203   : > { %3026 = vrot.lane.b32.xlu0 %v2815_v11, %s7409_s16  ;;  %v7342_v11 = vld [vmem:[#allocation2 + $0xb4] sm:$0xff]   ;;  %v6568_v30 = vcombine.high %v2415_v55, %v2415_v55  ;;  %v10831_v41 = vshll.u32 %v10830_v53, 16  ;;  %v9007_v18 = vcombine.high %v1348_v7, %v1348_v7  ;;  %v10832_v1 = vcombine.low %v8740_v35, %v8740_v35  ;;  %v9016_v40 = vpop.permute.xlu1 %2379  ;;  %v10842_v46 = vld [vmem:[#allocation69_spill] sm:$0xff] }
 0x204   : > { %v8995_v17 = vsel %vm1290_vm13, %v7342_v11, %v8482_v3  ;;  %10829 = vst [vmem:[#allocation85_spill] sm:$0xff] %v9000_v21  ;;  %v9009_v3 = vcombine.low %v1350_v9, %v1350_v9  ;;  %v6591_v11 = vcombine.low %v2463_v47, %v2463_v47  ;;  %10833 = vst [vmem:[#allocation54_spill] sm:$0xff] %v9016_v40  ;;  %v9024_v9 = vshrl.u32 %v6457_v34, 16  ;;  %v10836_v35 = vld [vmem:[#allocation62_spill] sm:$0xff]  ;;  %v7343_v21 = vld [vmem:[#allocation2 + $0x68] sm:$0xf] }
 0x205   : > { %v4491_v10 = vor.u32 %v10831_v41, %v8498_v42  ;;  %v9018_v55 = vor.u32 %v1585_v25, %v1584_v15  ;;  %v2418_v7 = vsel %vm1290_vm13, %v7235_v37, %v8509_v4  ;;  %v6592_v8 = vcombine.high %v2463_v47, %v2463_v47  ;;  %v7239_v41 = vld [vmem:[#allocation2 + $0x4c] ss:$0 sps:$4 sm:$0x11]   ;;  %v7344_v40 = vld [vmem:[#allocation2 + $0x64] sm:$0xf] }
 0x206   : > { %3646 = vrot.lane.b32.xlu1 %v6637_v19, %s7408_s15  ;;  %10835 = vst [vmem:[#allocation87_spill] sm:$0xff] %v9024_v9  ;;  %v6653_v53 = vcombine.high %v8995_v17, %v8995_v17  ;;  %v2731_v19 = vshrl.u32 %v6567_v44, 16  ;;  %v2734_v43 = vshll.u32 %v6567_v44, 16  ;;  %v2740_v15 = vshll.u32 %v6568_v30, 16 }
 0x207   : > { %3648 = vrot.lane.b32.xlu0 %v10832_v1, %s7408_s15  ;;  %10834 = vst [vmem:[#allocation86_spill] sm:$0xff] %v9018_v55  ;;  %v2466_v1 = vsel %vm1290_vm13, %v7236_v59, %v10836_v35  ;;  %v2744_v25 = vshrl.u32 %v6568_v30, 16  ;;  %v10838_v42 = vrot.slane %v10837_v23, 11  ;;  %v1749_v34 = vshrl.u32 %v9007_v18, 16  ;;  %v9038_v59 = vpop.permute.xlu0 %2349 }
 0x208   : > { %v1758_v37 = vshrl.u32 %v9009_v3, 16  ;;  %v6569_v47 = vcombine.low %v2418_v7, %v2418_v7  ;;  %v2923_v13 = vshrl.u32 %v6591_v11, 16  ;;  %10839 = vst [vmem:[#allocation62_spill] sm:$0xff] %v9038_v59  ;;  %v2926_v44 = vshll.u32 %v6591_v11, 16  ;;  %v9042_v7 = vpop.permute.xlu1 %4098 }
 0x209   : > { %v4492_v4 = vsel %vm8744_vm15, %v10838_v42, %v4491_v10  ;;  %v2932_v30 = vshll.u32 %v6592_v8, 16  ;;  %v2936_v35 = vshrl.u32 %v6592_v8, 16  ;;  %v6673_v23 = vcombine.low %v7343_v21, %v7343_v21  ;;  %v10840_v10 = vld [vmem:[#allocation67_spill] sm:$0xff]  ;;  %10841 = vst [vmem:[#allocation56_spill] sm:$0xff] %v9042_v7  ;;  %v10845_v7 = vld [vmem:[#allocation70_spill] sm:$0xff] }
 0x20a   : > { %3678 = vrot.lane.b32.xlu1 %v6653_v53, %s7408_s15  ;;  %v6593_v6 = vcombine.low %v2466_v1, %v2466_v1  ;;  %v2733_v55 = vrot.slane %v2731_v19, 4  ;;  %v2412_v42 = vsel %vm1290_vm13, %v7239_v41, %v10840_v10  ;;  %v6672_v54 = vcombine.low %v3778_v20, %v7344_v40  ;;  %v7240_v59 = vld [vmem:[#allocation2 + $0xcc] ss:$0 sps:$4 sm:$0x11]  }
 0x20b   : > { %4706 = vrot.lane.b32.xlu0 %v4492_v4, %s7410_s17  ;;  %v2736_v48 = vrot.slane %v2734_v43, 5  ;;  %v9044_v4 = vrot.slane %v2740_v15, 5  ;;  %v2746_v53 = vrot.slane %v2744_v25, 4  ;;  %v4142_v11 = vsel %vm1290_vm13, %v6673_v23, %v10842_v46 }
 0x20c   : > { %v9048_v8 = vrot.slane %v1749_v34, 7  ;;  %v1752_v21 = vshll.u32 %v9007_v18, 16  ;;  %v2925_v1 = vrot.slane %v2923_v13, 4  ;;  %v4140_v19 = vsel %vm1290_vm13, %v6672_v54, %v10842_v46  ;;  %v9063_v13 = vpop.permute.xlu0 %2381 }
 0x20d   : > { %v10844_v20 = vcombine.low %v8778_v63, %v8778_v63  ;;  %v2928_v43 = vrot.slane %v2926_v44, 5  ;;  %v9057_v40 = vrot.slane %v2932_v30, 5  ;;  %v2938_v41 = vrot.slane %v2936_v35, 4 }
 0x20e   : > { %10843 = vst [vmem:[#allocation67_spill] sm:$0xff] %v9048_v8  ;;  %v6566_v15 = vcombine.low %v2412_v42, %v2412_v42  ;;  %v1760_v25 = vrot.slane %v1758_v37, 7  ;;  %v9059_v23 = vshll.u32 %v6569_v47, 16  ;;  %v9061_v34 = vshll.u32 %v6593_v6, 16 }
 0x20f   : > { %3680 = vrot.lane.b32.xlu0 %v10844_v20, %s7408_s15  ;;  %v6726_v18 = vcombine.low %v4142_v11, %v4142_v11  ;;  %v2737_v10 = vor.u32 %v2736_v48, %v2733_v55  ;;  %v2747_v54 = vor.u32 %v2746_v53, %v9044_v4  ;;  %v6724_v46 = vcombine.low %v4140_v19, %v4140_v19  ;;  %v9078_v48 = vpop.permute.xlu1 %4114  ;;  %v7241_v20 = vld [vmem:[#allocation2 + $0x44] sm:$0xff]  }
 0x210   : > { %v2460_v63 = vsel %vm1290_vm13, %v7240_v59, %v10845_v7  ;;  %v9070_v30 = vor.u32 %v1752_v21, %v9048_v8  ;;  %v1761_v6 = vshll.u32 %v9009_v3, 16  ;;  %v10847_v47 = vcombine.low %v8936_v2, %v8936_v2  ;;  %10848 = vst [vmem:[#allocation70_spill] sm:$0xff] %v9078_v48  ;;  %v3802_v7 = vld [vmem:[#allocation2 + $0xe0] sm:$0x8] }
 0x211   : > { %v2929_v55 = vor.u32 %v2928_v43, %v2925_v1  ;;  %v2939_v35 = vor.u32 %v2938_v41, %v9057_v40  ;;  %v9081_v59 = vshll.u32 %v6566_v15, 16  ;;  %v9083_v42 = vcombine.high %v4140_v19, %v4140_v19  ;;  %v7345_v43 = vld [vmem:[#allocation2 + $0xe4] sm:$0xf]  ;;  %v7346_v19 = vld [vmem:[#allocation2 + $0xe8] sm:$0xf] }
 0x212   : > { %10846 = vst [vmem:[#allocation69_spill] sm:$0xff] %v9070_v30  ;;  %v9085_v53 = vor.u32 %v1761_v6, %v1760_v25  ;;  %v4429_v3 = vshrl.u32 %v6726_v18, 16  ;;  %v6590_v21 = vcombine.low %v2460_v63, %v2460_v63  ;;  %v9091_v44 = vrot.slane %v2747_v54, 4  ;;  %v9106_v54 = vpop.permute.xlu0 %5263 }
 0x213   : > { %3644 = vrot.lane.b32.xlu0 %v10847_v47, %s7408_s15  ;;  %v9089_v47 = vrot.slane %v2737_v10, 4  ;;  %v9093_v1 = vshrl.u32 %v6724_v46, 16  ;;  %v6688_v41 = vcombine.low %v3802_v7, %v7345_v43  ;;  %v6689_v15 = vcombine.low %v7346_v19, %v7346_v19  ;;  %10852 = vst [vmem:[#allocation89_spill] sm:$0xff] %v9106_v54 }
 0x214   : > { %10849 = vst [vmem:[#allocation88_spill] sm:$0xff] %v9085_v53  ;;  %v2409_v25 = vsel %vm1290_vm13, %v7241_v20, %v8641_v5  ;;  %v10850_v6 = vrot.slane %v8608_v27, 5  ;;  %v10851_v10 = vcombine.low %v8995_v17, %v8995_v17  ;;  %v9108_v46 = vrot.slane %v2929_v55, 4  ;;  %v7242_v27 = vld [vmem:[#allocation2 + $0xc4] sm:$0xff]   ;;  %v9121_v55 = vpop.permute.xlu1 %3506 }
 0x215   : > { %v9110_v7 = vrot.slane %v2939_v35, 4  ;;  %v4420_v5 = vshrl.u32 %v9083_v42, 16  ;;  %v4431_v20 = vrot.slane %v4429_v3, 7  ;;  %v4180_v17 = vsel %vm1290_vm13, %v6688_v41, %v8610_v52  ;;  %v10856_v35 = vld [vmem:[#allocation43_spill] sm:$0xff] }
 0x216   : > { %v2705_v63 = vsel %vm7615_vm11, %v8672_v39, %v10850_v6  ;;  %v9115_v39 = vshll.u32 %v6590_v21, 16  ;;  %v4182_v19 = vsel %vm1290_vm13, %v6689_v15, %v8610_v52  ;;  %v6564_v6 = vcombine.low %v2409_v25, %v2409_v25 }
 0x217   : > { %3676 = vrot.lane.b32.xlu0 %v10851_v10, %s7408_s15  ;;  %3008 = vrot.lane.b32.xlu1 %v2705_v63, %s7409_s16  ;;  %v6565_v10 = vcombine.high %v2409_v25, %v2409_v25  ;;  %v2457_v37 = vsel %vm1290_vm13, %v7242_v27, %v8683_v22  ;;  %v4432_v3 = vshll.u32 %v6726_v18, 16  ;;  %v10854_v21 = vrot.slane %v8635_v24, 5 }
 0x218   : > { %10853 = vst [vmem:[#allocation90_spill] sm:$0xff] %v9115_v39  ;;  %v2695_v52 = vsel %vm7615_vm11, %v8655_v29, %v8612_v16  ;;  %v6748_v15 = vcombine.low %v4180_v17, %v4180_v17  ;;  %v9136_v43 = vcombine.high %v4180_v17, %v4180_v17  ;;  %v9138_v25 = vcombine.low %v4182_v19, %v4182_v19  ;;  %v956_v39 = vld [vmem:[#allocation2 + $0x60] sm:$0x8] }
 0x219   : > { %v2897_v41 = vsel %vm7615_vm11, %v8691_v49, %v10854_v21  ;;  %v4383_v24 = vrot.slane %v8706_v33, 4  ;;  %v9143_v22 = vrot.slane %v4420_v5, 7  ;;  %v9145_v18 = vor.u32 %v4432_v3, %v4431_v20  ;;  %v9148_v21 = vpop.permute.xlu0 %2345  ;;  %v9158_v3 = vpop.permute.xlu1 %5265 }
 0x21a   : > { %v6588_v27 = vcombine.low %v2457_v37, %v2457_v37  ;;  %v2707_v16 = vshrl.u32 %v6564_v6, 16  ;;  %v2710_v29 = vshll.u32 %v6564_v6, 16  ;;  %v2716_v17 = vshll.u32 %v6565_v10, 16 }
 0x21b   : > { %3040 = vrot.lane.b32.xlu1 %v2897_v41, %s7409_s16  ;;  %3006 = vrot.lane.b32.xlu0 %v2695_v52, %s7409_s16  ;;  %v2720_v19 = vshrl.u32 %v6565_v10, 16  ;;  %v6589_v63 = vcombine.high %v2457_v37, %v2457_v37  ;;  %v4391_v41 = vsel %vm8744_vm15, %v4383_v24, %v8697_v26  ;;  %v10855_v52 = vld [vmem:[#allocation74_spill] sm:$0xff]  ;;  %v4559_v20 = vrot.slane %v8792_v56, 4  ;;  %v10858_v26 = vld [vmem:[#allocation76_spill] sm:$0xff] }
 0x21c   : > { %v2887_v5 = vsel %vm7615_vm11, %v10856_v35, %v10855_v52  ;;  %10857 = vst [vmem:[#allocation74_spill] sm:$0xff] %v9158_v3  ;;  %v9160_v49 = vshrl.u32 %v6748_v15, 16  ;;  %v4596_v6 = vshrl.u32 %v9136_v43, 16  ;;  %v4605_v10 = vshrl.u32 %v9138_v25, 16  ;;  %v3775_v37 = vld [vmem:[#allocation2 + $0x50] sm:$0x8] }
 0x21d   : > { %v10859_v24 = vshll.u32 %v10858_v26, 16  ;;  %v4608_v52 = vshll.u32 %v9138_v25, 16  ;;  %v2899_v11 = vshrl.u32 %v6588_v27, 16  ;;  %v2902_v15 = vshll.u32 %v6588_v27, 16  ;;  %v7350_v26 = vld [vmem:[#allocation2 + $0x64] sm:$0xff]  }
 0x21e   : > { %v2709_v54 = vrot.slane %v2707_v16, 4  ;;  %v2712_v3 = vrot.slane %v2710_v29, 5  ;;  %v9171_v48 = vrot.slane %v2716_v17, 5  ;;  %v2722_v9 = vrot.slane %v2720_v19, 4  ;;  %v10862_v16 = vld [vmem:[#allocation78_spill] sm:$0xff] }
 0x21f   : > { %4688 = vrot.lane.b32.xlu1 %v4391_v41, %s7410_s17  ;;  %3038 = vrot.lane.b32.xlu0 %v2887_v5, %s7409_s16  ;;  %v4381_v2 = vor.u32 %v10859_v24, %v8706_v33  ;;  %v2908_v30 = vshll.u32 %v6589_v63, 16  ;;  %v2912_v8 = vshrl.u32 %v6589_v63, 16  ;;  %v7347_v41 = vld [vmem:[#allocation2 + $0x54] sm:$0xf]  ;;  %v4567_v5 = vsel %vm8744_vm15, %v4559_v20, %v8774_v60  ;;  %v9176_v33 = vpop.permute.xlu0 %2377  ;;  %v7348_v24 = vld [vmem:[#allocation2 + $0x58] sm:$0xf] }
 0x220   : > { %10860 = vst [vmem:[#allocation43_spill] sm:$0xff] %v9171_v48  ;;  %v6670_v53 = vcombine.low %v3775_v37, %v7347_v41  ;;  %10861 = vst [vmem:[#allocation76_spill] sm:$0xff] %v9176_v33  ;;  %v4607_v25 = vrot.slane %v4605_v10, 7  ;;  %v6671_v27 = vcombine.low %v7348_v24, %v7348_v24  ;;  %v10863_v29 = vrot.slane %v10862_v16, 11  ;;  %v10864_v37 = vld [vmem:[#allocation80_spill] sm:$0xff]  ;;  %v9187_v10 = vpop.permute.xlu1 %4096  ;;  %v10865_v16 = vld [vmem:[#allocation75_spill] sm:$0xff] }
 0x221   : > { %v2901_v17 = vrot.slane %v2899_v11, 4  ;;  %v2904_v19 = vrot.slane %v2902_v15, 5  ;;  %v3799_v60 = vld [vmem:[#allocation2 + $0xd0] sm:$0x8]  ;;  %v7349_v20 = vld [vmem:[#allocation2 + $0xd8] sm:$0xf]  ;;  %v2713_v24 = vor.u32 %v2712_v3, %v2709_v54  ;;  %v9192_v33 = vsel %vm1290_vm13, %v7350_v26, %v10865_v16 }
 0x222   : > { %v4382_v63 = vsel %vm8744_vm15, %v10863_v29, %v4381_v2  ;;  %v4135_v41 = vsel %vm1290_vm13, %v6670_v53, %v10864_v37  ;;  %v6687_v35 = vcombine.low %v7349_v20, %v7349_v20  ;;  %v4137_v11 = vsel %vm1290_vm13, %v6671_v27, %v10864_v37  ;;  %v10867_v15 = vld [vmem:[#allocation40_spill] sm:$0xff]  ;;  %v7351_v26 = vld [vmem:[#allocation2 + $0xd4] sm:$0xf] }
 0x223   : > { %4720 = vrot.lane.b32.xlu1 %v4567_v5, %s7410_s17  ;;  %4686 = vrot.lane.b32.xlu0 %v4382_v63, %s7410_s17  ;;  %v2723_v5 = vor.u32 %v2722_v9, %v9171_v48  ;;  %v9196_v2 = vrot.slane %v2908_v30, 5  ;;  %v2914_v53 = vrot.slane %v2912_v8, 4  ;;  %v10868_v63 = vld [vmem:[#allocation79_spill] sm:$0xff]  ;;  %v6721_v54 = vcombine.low %v4135_v41, %v4135_v41  ;;  %v10871_v30 = vld [vmem:[#allocation81_spill] sm:$0xff] }
 0x224   : > { %v4177_v29 = vsel %vm1290_vm13, %v6687_v35, %v10867_v15  ;;  %v10869_v20 = vrot.slane %v10868_v63, 5  ;;  %v9205_v3 = vcombine.high %v4135_v41, %v4135_v41  ;;  %v6686_v16 = vcombine.low %v3799_v60, %v7351_v26  ;;  %v9240_v26 = vpop.permute.xlu1 %4112  ;;  %v10883_v41 = vld [vmem:[#allocation27_spill] sm:$0xff] }
 0x225   : > { %10866 = vst [vmem:[#allocation78_spill] sm:$0xff] %v9196_v2  ;;  %v10872_v27 = vshll.u32 %v10871_v30, 16  ;;  %v9211_v37 = vrot.slane %v4596_v6, 7  ;;  %v9213_v35 = vor.u32 %v4608_v52, %v4607_v25  ;;  %v2905_v63 = vor.u32 %v2904_v19, %v2901_v17  ;;  %v10874_v25 = vld [vmem:[#allocation19_spill] sm:$0xff]  ;;  %10877 = vst [vmem:[#allocation40_spill] sm:$0xff] %v9240_v26 }
 0x226   : > { %v2681_v9 = vsel %vm7615_vm11, %v8819_v0, %v10869_v20  ;;  %10870 = vst [vmem:[#allocation80_spill] sm:$0xff] %v9205_v3  ;;  %v9215_v48 = vcombine.low %v4137_v11, %v4137_v11  ;;  %v9217_v0 = vpop.permute.xlu0 %2343  ;;  %v4175_v20 = vsel %vm1290_vm13, %v6686_v16, %v10867_v15  ;;  %v9227_v6 = vrot.slane %v2713_v24, 4  ;;  %v953_v30 = vld [vmem:[#allocation2 + $0x50] sm:$0x8] }
 0x227   : > { %3004 = vrot.lane.b32.xlu1 %v2681_v9, %s7409_s16  ;;  %v4557_v8 = vor.u32 %v10872_v27, %v8792_v56  ;;  %v9225_v56 = vcombine.low %v4177_v29, %v4177_v29  ;;  %v9229_v52 = vrot.slane %v2723_v5, 4  ;;  %v10875_v17 = vrot.slane %v10874_v25, 11  ;;  %v7352_v5 = vld [vmem:[#allocation2 + $0x64] sm:$0xf] }
 0x228   : > { %10873 = vst [vmem:[#allocation75_spill] sm:$0xff] %v9227_v6  ;;  %v10876_v11 = vrot.slane %v8768_v57, 5  ;;  %v2915_v15 = vor.u32 %v2914_v53, %v9196_v2  ;;  %v9243_v29 = vshrl.u32 %v6721_v54, 16  ;;  %v4398_v24 = vshrl.u32 %v9205_v3, 16  ;;  %v10888_v2 = vld [vmem:[#allocation29_spill] sm:$0xff] }
 0x229   : > { %v4558_v19 = vsel %vm8744_vm15, %v10875_v17, %v4557_v8  ;;  %v6388_v16 = vcombine.low %v956_v39, %v7352_v5  ;;  %v9248_v57 = vrot.slane %v2905_v63, 4  ;;  %v4407_v27 = vshrl.u32 %v9215_v48, 16  ;;  %v7353_v8 = vld [vmem:[#allocation2 + $0x68] sm:$0xf]  ;;  %v10882_v5 = vld [vmem:[#allocation20_spill] sm:$0xff] }
 0x22a   : > { %v2873_v9 = vsel %vm7615_vm11, %v8832_v50, %v10876_v11  ;;  %10878 = vst [vmem:[#allocation79_spill] sm:$0xff] %v9243_v29  ;;  %4718 = vrot.lane.b32.xlu0 %v4558_v19, %s7410_s17  ;;  %v6745_v50 = vcombine.low %v4175_v20, %v4175_v20  ;;  %v6389_v25 = vcombine.low %v7353_v8, %v7353_v8  ;;  %v4583_v17 = vshrl.u32 %v9225_v56, 16  ;;  %v10881_v11 = vld [vmem:[#allocation37_spill] sm:$0xff]  ;;  %v9264_v53 = vpop.permute.xlu0 %2375  ;;  %v7355_v29 = vld [vmem:[#allocation2 + $0x58] sm:$0xf] }
 0x22b   : > { %3036 = vrot.lane.b32.xlu1 %v2873_v9, %s7409_s16  ;;  %10879 = vst [vmem:[#allocation81_spill] sm:$0xff] %v9248_v57  ;;  %v9252_v54 = vcombine.high %v4175_v20, %v4175_v20  ;;  %v1323_v39 = vsel %vm1290_vm13, %v6388_v16, %v10881_v11  ;;  %v7354_v9 = vld [vmem:[#allocation2 + $0x54] sm:$0xf]  ;;  %v2671_v60 = vsel %vm7615_vm11, %v10883_v41, %v10882_v5  ;;  %v4361_v8 = vrot.slane %v8866_v38, 4  ;;  %v9280_v5 = vpop.permute.xlu1 %1272  ;;  %v7356_v57 = vld [vmem:[#allocation2 + $0xe4] sm:$0xf] }
 0x22c   : > { %v1325_v19 = vsel %vm1290_vm13, %v6389_v25, %v10881_v11  ;;  %v6386_v63 = vcombine.low %v953_v30, %v7354_v9  ;;  %10884 = vst [vmem:[#allocation37_spill] sm:$0xff] %v9264_v53  ;;  %v9266_v20 = vrot.slane %v2915_v15, 4  ;;  %v9269_v3 = vrot.slane %v4398_v24, 7  ;;  %v980_v25 = vld [vmem:[#allocation2 + $0xe0] sm:$0x8]  ;;  %v10886_v9 = vld [vmem:[#allocation41_spill] sm:$0xff] }
 0x22d   : > { %10880 = vst [vmem:[#allocation19_spill] sm:$0xff] %v9252_v54  ;;  %v4410_v16 = vshll.u32 %v9215_v48, 16  ;;  %v4409_v30 = vrot.slane %v4407_v27, 7  ;;  %v9273_v11 = vshrl.u32 %v6745_v50, 16  ;;  %v4369_v15 = vsel %vm8744_vm15, %v4361_v8, %v8871_v12  ;;  %10887 = vst [vmem:[#allocation27_spill] sm:$0xff] %v9280_v5  ;;  %v10889_v53 = vld [vmem:[#allocation39_spill] sm:$0xff] }
 0x22e   : > { %3002 = vrot.lane.b32.xlu0 %v2671_v60, %s7409_s16  ;;  %v1318_v41 = vsel %vm1290_vm13, %v6386_v63, %v10886_v9  ;;  %v4574_v24 = vshrl.u32 %v9252_v54, 16  ;;  %v9283_v26 = vcombine.high %v1323_v39, %v1323_v39  ;;  %v9285_v48 = vcombine.low %v1325_v19, %v1325_v19  ;;  %v7357_v19 = vld [vmem:[#allocation2 + $0xe8] sm:$0xf] }
 0x22f   : > { %10885 = vst [vmem:[#allocation20_spill] sm:$0xff] %v9273_v11  ;;  %v6387_v60 = vcombine.low %v7355_v29, %v7355_v29  ;;  %4684 = vrot.lane.b32.xlu1 %v4369_v15, %s7410_s17  ;;  %v4585_v27 = vrot.slane %v4583_v17, 7  ;;  %v6442_v50 = vcombine.low %v1323_v39, %v1323_v39  ;;  %v6404_v63 = vcombine.low %v980_v25, %v7356_v57  ;;  %v7248_v11 = vld [vmem:[#allocation2 + $0x74] sm:$0xff]   ;;  %v7366_v54 = vld [vmem:[#allocation2 + $0x88] sm:$0xf] }
 0x230   : > { %v2863_v12 = vsel %vm7615_vm11, %v10889_v53, %v10888_v2  ;;  %v9294_v6 = vcombine.high %v1318_v41, %v1318_v41  ;;  %v6405_v5 = vcombine.low %v7357_v19, %v7357_v19  ;;  %v10890_v29 = vshll.u32 %v8805_v14, 16  ;;  %v9305_v53 = vpop.permute.xlu0 %5259 }
 0x231   : > { %v1320_v8 = vsel %vm1290_vm13, %v6387_v60, %v10886_v9  ;;  %v9300_v39 = vor.u32 %v4410_v16, %v4409_v30  ;;  %v4586_v25 = vshll.u32 %v9225_v56, 16  ;;  %v4537_v2 = vrot.slane %v8945_v36, 4  ;;  %10891 = vst [vmem:[#allocation41_spill] sm:$0xff] %v9305_v53 }
 0x232   : > { %3034 = vrot.lane.b32.xlu0 %v2863_v12, %s7409_s16  ;;  %v4359_v17 = vor.u32 %v10890_v29, %v8866_v38  ;;  %v1639_v9 = vshrl.u32 %v9283_v26, 16  ;;  %v1648_v15 = vshrl.u32 %v9285_v48, 16  ;;  %v1363_v60 = vsel %vm1290_vm13, %v6404_v63, %v8864_v45  ;;  %v9325_v29 = vpop.permute.xlu1 %1288 }
 0x233   : > { %v1365_v14 = vsel %vm1290_vm13, %v6405_v5, %v8864_v45  ;;  %v10892_v38 = vcombine.high %v9192_v33, %v9192_v33  ;;  %v9317_v56 = vshrl.u32 %v6442_v50, 16  ;;  %v6439_v16 = vcombine.low %v1318_v41, %v1318_v41  ;;  %10895 = vst [vmem:[#allocation39_spill] sm:$0xff] %v9325_v29  ;;  %v977_v50 = vld [vmem:[#allocation2 + $0xd0] sm:$0x8] }
 0x234   : > { %v9319_v30 = vcombine.low %v1320_v8, %v1320_v8  ;;  %v10894_v12 = vrot.slane %v8834_v31, 11  ;;  %v9328_v45 = vrot.slane %v4574_v24, 7  ;;  %v9330_v5 = vor.u32 %v4586_v25, %v4585_v27  ;;  %v7358_v31 = vld [vmem:[#allocation2 + $0xe4] sm:$0xff]   ;;  %v9354_v53 = vpop.permute.xlu0 %1274 }
 0x235   : > { %3658 = vrot.lane.b32.xlu1 %v10892_v38, %s7408_s15  ;;  %10893 = vst [vmem:[#allocation29_spill] sm:$0xff] %v9317_v56  ;;  %v1617_v38 = vshrl.u32 %v9294_v6, 16  ;;  %v9334_v41 = vcombine.high %v1363_v60, %v1363_v60  ;;  %v9336_v8 = vcombine.low %v1365_v14, %v1365_v14  ;;  %v4545_v24 = vsel %vm8744_vm15, %v4537_v2, %v8947_v58 }
 0x236   : > { %v4360_v19 = vsel %vm8744_vm15, %v10894_v12, %v4359_v17  ;;  %10896 = vst [vmem:[#allocation91_spill] sm:$0xff] %v9330_v5  ;;  %v9340_v17 = vsel %vm1290_vm13, %v7358_v31, %v8906_v51  ;;  %v9345_v27 = vrot.slane %v1639_v9, 7  ;;  %v1642_v25 = vshll.u32 %v9283_v26, 16  ;;  %v7359_v31 = vld [vmem:[#allocation2 + $0xd4] sm:$0xf] }
 0x237   : > { %4682 = vrot.lane.b32.xlu0 %v4360_v19, %s7410_s17  ;;  %v1650_v12 = vrot.slane %v1648_v15, 7  ;;  %v1651_v19 = vshll.u32 %v9285_v48, 16  ;;  %v9351_v63 = vshrl.u32 %v6439_v16, 16  ;;  %v1626_v51 = vshrl.u32 %v9319_v30, 16  ;;  %v7360_v9 = vld [vmem:[#allocation2 + $0xd8] sm:$0xf] }
 0x238   : > { %10897 = vst [vmem:[#allocation92_spill] sm:$0xff] %v9345_v27  ;;  %v6402_v57 = vcombine.low %v977_v50, %v7359_v31  ;;  %v9356_v58 = vrot.slane %v1617_v38, 7  ;;  %v6466_v2 = vcombine.low %v1363_v60, %v1363_v60  ;;  %v6403_v26 = vcombine.low %v7360_v9, %v7360_v9  ;;  %v10901_v50 = vld [vmem:[#allocation44_spill] sm:$0xff]  ;;  %v7361_v38 = vld [vmem:[#allocation2 + $0x54] sm:$0xff]  }
 0x239   : > { %4716 = vrot.lane.b32.xlu1 %v4545_v24, %s7410_s17  ;;  %10898 = vst [vmem:[#allocation93_spill] sm:$0xff] %v9351_v63  ;;  %v6659_v48 = vcombine.high %v9340_v17, %v9340_v17  ;;  %v10900_v15 = vcombine.low %v9192_v33, %v9192_v33  ;;  %v1815_v16 = vshrl.u32 %v9334_v41, 16  ;;  %v1824_v24 = vshrl.u32 %v9336_v8, 16  ;;  %v10908_v33 = vld [vmem:[#allocation84_spill] sm:$0xff] }
 0x23a   : > { %10899 = vst [vmem:[#allocation94_spill] sm:$0xff] %v9356_v58  ;;  %v1358_v31 = vsel %vm1290_vm13, %v6402_v57, %v10901_v50  ;;  %v9370_v60 = vsel %vm1290_vm13, %v7361_v38, %v8955_v32  ;;  %v9372_v9 = vpop.permute.xlu1 %5261  ;;  %v9375_v14 = vor.u32 %v1642_v25, %v9345_v27  ;;  %v1620_v56 = vshll.u32 %v9294_v6, 16 }
 0x23b   : > { %3656 = vrot.lane.b32.xlu0 %v10900_v15, %s7408_s15  ;;  %10902 = vst [vmem:[#allocation44_spill] sm:$0xff] %v9372_v9  ;;  %v9378_v15 = vor.u32 %v1651_v19, %v1650_v12  ;;  %v1628_v29 = vrot.slane %v1626_v51, 7  ;;  %v1629_v32 = vshll.u32 %v9319_v30, 16  ;;  %v1360_v38 = vsel %vm1290_vm13, %v6403_v26, %v10901_v50  ;;  %v7362_v30 = vld [vmem:[#allocation2 + $0xd4] sm:$0xff]  }
 0x23c   : > { %10903 = vst [vmem:[#allocation95_spill] sm:$0xff] %v9375_v14  ;;  %v9386_v9 = vshrl.u32 %v6466_v2, 16  ;;  %v9388_v25 = vcombine.high %v1358_v31, %v1358_v31  ;;  %v6641_v12 = vcombine.high %v9370_v60, %v9370_v60  ;;  %v2427_v6 = vsel %vm1290_vm13, %v7248_v11, %v8964_v28  ;;  %v9403_v2 = vpop.permute.xlu0 %3522  ;;  %v7249_v28 = vld [vmem:[#allocation2 + $0x7c] ss:$0 sps:$4 sm:$0x11]   ;;  %v10910_v11 = vld [vmem:[#allocation32_spill] sm:$0xff] }
 0x23d   : > { %10904 = vst [vmem:[#allocation96_spill] sm:$0xff] %v9378_v15  ;;  %3690 = vrot.lane.b32.xlu1 %v6659_v48, %s7408_s15  ;;  %v9395_v19 = vor.u32 %v1620_v56, %v9356_v58  ;;  %v9397_v48 = vrot.slane %v1815_v16, 7  ;;  %v1826_v51 = vrot.slane %v1824_v24, 7  ;;  %v9401_v26 = vsel %vm1290_vm13, %v7362_v30, %v10908_v33  ;;  %10909 = vst [vmem:[#allocation84_spill] sm:$0xff] %v9403_v2 }
 0x23e   : > { %10905 = vst [vmem:[#allocation97_spill] sm:$0xff] %v9386_v9  ;;  %v9405_v50 = vpop.permute.xlu1 %3642  ;;  %v6463_v14 = vcombine.low %v1358_v31, %v1358_v31  ;;  %v9408_v27 = vcombine.low %v1360_v38, %v1360_v38  ;;  %v10911_v56 = vshll.u32 %v10910_v11, 16  ;;  %v9414_v24 = vor.u32 %v1629_v32, %v1628_v29  ;;  %v7250_v32 = vld [vmem:[#allocation2 + $0xf4] sm:$0xff]  }
 0x23f   : > { %10906 = vst [vmem:[#allocation98_spill] sm:$0xff] %v9395_v19  ;;  %10907 = vst [vmem:[#allocation99_spill] sm:$0xff] %v9397_v48  ;;  %v1818_v33 = vshll.u32 %v9334_v41, 16  ;;  %v1827_v30 = vshll.u32 %v9336_v8, 16  ;;  %v6573_v2 = vcombine.low %v2427_v6, %v2427_v6  ;;  %v1793_v31 = vshrl.u32 %v9388_v25, 16  ;;  %v10915_v41 = vld [vmem:[#allocation18_spill] sm:$0xff] }
 0x240   : > { %v4535_v16 = vor.u32 %v10911_v56, %v8945_v36  ;;  %10912 = vst [vmem:[#allocation32_spill] sm:$0xff] %v9414_v24  ;;  %v6657_v38 = vcombine.high %v9401_v26, %v9401_v26  ;;  %v6574_v57 = vcombine.high %v2427_v6, %v2427_v6  ;;  %v9434_v15 = vshrl.u32 %v6463_v14, 16  ;;  %v3784_v36 = vld [vmem:[#allocation2 + $0x80] sm:$0x8]  ;;  %v7365_v24 = vld [vmem:[#allocation2 + $0x84] sm:$0xf] }
 0x241   : > { %3654 = vrot.lane.b32.xlu1 %v6641_v12, %s7408_s15  ;;  %v9423_v11 = vor.u32 %v1818_v33, %v9397_v48  ;;  %v9426_v29 = vor.u32 %v1827_v30, %v1826_v51  ;;  %v10916_v12 = vrot.slane %v10915_v41, 11  ;;  %v1796_v9 = vshll.u32 %v9388_v25, 16  ;;  %v10918_v33 = vld [vmem:[#allocation62_spill] sm:$0xff]  ;;  %v962_v51 = vld [vmem:[#allocation2 + $0x80] sm:$0x8]  ;;  %v9445_v48 = vpop.permute.xlu0 %3504 }
 0x242   : > { %v9432_v56 = vpop.permute.xlu1 %3674  ;;  %10917 = vst [vmem:[#allocation18_spill] sm:$0xff] %v9434_v15  ;;  %v1802_v6 = vshrl.u32 %v9408_v27, 16  ;;  %v1805_v30 = vshll.u32 %v9408_v27, 16  ;;  %v2779_v41 = vshrl.u32 %v6573_v2, 16  ;;  %v9447_v25 = vrot.slane %v1793_v31, 7 }
 0x243   : > { %10913 = vst [vmem:[#allocation100_spill] sm:$0xff] %v9423_v11  ;;  %10914 = vst [vmem:[#allocation101_spill] sm:$0xff] %v9426_v29  ;;  %v4536_v8 = vsel %vm8744_vm15, %v10916_v12, %v4535_v16  ;;  %v2430_v11 = vsel %vm1290_vm13, %v7249_v28, %v10918_v33  ;;  %v2782_v16 = vshll.u32 %v6573_v2, 16  ;;  %v10919_v12 = vld [vmem:[#allocation54_spill] sm:$0xff]  ;;  %v6658_v28 = vcombine.low %v9340_v17, %v9340_v17  ;;  %v7363_v27 = vld [vmem:[#allocation2 + $0x84] sm:$0xf] }
 0x244   : > { %4714 = vrot.lane.b32.xlu0 %v4536_v8, %s7410_s17  ;;  %v2475_v14 = vsel %vm1290_vm13, %v7250_v32, %v10919_v12  ;;  %v2788_v33 = vshll.u32 %v6574_v57, 16  ;;  %v2792_v8 = vshrl.u32 %v6574_v57, 16  ;;  %v6575_v29 = vcombine.low %v2430_v11, %v2430_v11  ;;  %v7364_v2 = vld [vmem:[#allocation2 + $0x88] sm:$0xf] }
 0x245   : > { %3686 = vrot.lane.b32.xlu1 %v6657_v38, %s7408_s15  ;;  %v6640_v38 = vcombine.low %v9370_v60, %v9370_v60  ;;  %v6392_v63 = vcombine.low %v962_v51, %v7363_v27  ;;  %v6393_v19 = vcombine.low %v7364_v2, %v7364_v2  ;;  %v6597_v32 = vcombine.low %v2475_v14, %v2475_v14  ;;  %v10920_v2 = vld [vmem:[#allocation56_spill] sm:$0xff]  ;;  %v7255_v15 = vld [vmem:[#allocation2 + $0x6c] ss:$0 sps:$4 sm:$0x11]  }
 0x246   : > { %v6598_v12 = vcombine.high %v2475_v14, %v2475_v14  ;;  %v6676_v31 = vcombine.low %v3784_v36, %v7365_v24  ;;  %v6677_v5 = vcombine.low %v7366_v54, %v7366_v54  ;;  %v2781_v17 = vrot.slane %v2779_v41, 4 }
 0x247   : > { %v2784_v57 = vrot.slane %v2782_v16, 5  ;;  %v9458_v60 = vsel %vm1290_vm13, %v6392_v63, %v9354_v53  ;;  %v1335_v11 = vsel %vm1290_vm13, %v6393_v19, %v9354_v53  ;;  %v9462_v51 = vrot.slane %v2788_v33, 5 }
 0x248   : > { %v9453_v58 = vpop.permute.xlu1 %3638  ;;  %3688 = vrot.lane.b32.xlu0 %v6658_v28, %s7408_s15  ;;  %v2794_v27 = vrot.slane %v2792_v8, 4  ;;  %v4150_v14 = vsel %vm1290_vm13, %v6676_v31, %v10920_v2  ;;  %v4152_v54 = vsel %vm1290_vm13, %v6677_v5, %v10920_v2  ;;  %v9470_v36 = vor.u32 %v1796_v9, %v9447_v25 }
 0x249   : > { %v1804_v41 = vrot.slane %v1802_v6, 7  ;;  %v9472_v63 = vshll.u32 %v6575_v29, 16  ;;  %v9474_v16 = vpop.permute.xlu0 %3520  ;;  %v2971_v19 = vshrl.u32 %v6597_v32, 16  ;;  %v2974_v28 = vshll.u32 %v6597_v32, 16 }
 0x24a   : > { %10921 = vst [vmem:[#allocation62_spill] sm:$0xff] %v9474_v16  ;;  %v9480_v33 = vcombine.high %v9458_v60, %v9458_v60  ;;  %v9482_v8 = vcombine.low %v1335_v11, %v1335_v11  ;;  %v2785_v5 = vor.u32 %v2784_v57, %v2781_v17  ;;  %v2980_v9 = vshll.u32 %v6598_v12, 16  ;;  %v7251_v57 = vld [vmem:[#allocation2 + $0xfc] ss:$0 sps:$4 sm:$0x11]  }
 0x24b   : > { %v6730_v31 = vcombine.low %v4150_v14, %v4150_v14  ;;  %v9485_v6 = vcombine.low %v4152_v54, %v4152_v54  ;;  %v6656_v29 = vcombine.low %v9401_v26, %v9401_v26  ;;  %v2795_v2 = vor.u32 %v2794_v27, %v9462_v51 }
 0x24c   : > { %v9476_v53 = vpop.permute.xlu1 %3670  ;;  %3652 = vrot.lane.b32.xlu0 %v6640_v38, %s7408_s15  ;;  %v2984_v24 = vshrl.u32 %v6598_v12, 16  ;;  %v10922_v32 = vrot.slane %v9059_v23, 5  ;;  %v9496_v38 = vor.u32 %v1805_v30, %v1804_v41  ;;  %v9499_v54 = vcombine.high %v4150_v14, %v4150_v14 }
 0x24d   : > { %v9504_v23 = vrot.slane %v2971_v19, 4  ;;  %v9506_v27 = vrot.slane %v2974_v28, 5  ;;  %v1692_v30 = vshrl.u32 %v9482_v8, 16  ;;  %v9511_v41 = vrot.slane %v2785_v5, 4 }
 0x24e   : > { %v2753_v11 = vsel %vm7615_vm11, %v9091_v44, %v10922_v32  ;;  %v1683_v44 = vshrl.u32 %v9480_v33, 16  ;;  %v9513_v14 = vrot.slane %v2980_v9, 5  ;;  %v9515_v32 = vshrl.u32 %v6730_v31, 16 }
 0x24f   : > { %3016 = vrot.lane.b32.xlu1 %v2753_v11, %s7409_s16  ;;  %v9502_v26 = vpop.permute.xlu0 %3640  ;;  %10923 = vst [vmem:[#allocation54_spill] sm:$0xff] %v9504_v23  ;;  %10924 = vst [vmem:[#allocation56_spill] sm:$0xff] %v9506_v27  ;;  %v4473_v11 = vshrl.u32 %v9485_v6, 16  ;;  %v9518_v17 = vrot.slane %v2795_v2, 4  ;;  %v9520_v19 = vrot.slane %v2984_v24, 4  ;;  %v6448_v28 = vcombine.low %v9458_v60, %v9458_v60  ;;  %v7257_v2 = vld [vmem:[#allocation2 + $0x64] sm:$0xff]  }
 0x250   : > { %3684 = vrot.lane.b32.xlu0 %v6656_v29, %s7408_s15  ;;  %v10926_v16 = vrot.slane %v9061_v34, 5  ;;  %v9531_v9 = vsel %vm1290_vm13, %v7251_v57, %v9063_v13  ;;  %v4464_v31 = vshrl.u32 %v9499_v54, 16  ;;  %v2743_v34 = vsel %vm7615_vm11, %v9089_v47, %v9044_v4  ;;  %v3781_v47 = vld [vmem:[#allocation2 + $0x70] sm:$0x8] }
 0x251   : > { %10925 = vst [vmem:[#allocation102_spill] sm:$0xff] %v9520_v19  ;;  %v1694_v13 = vrot.slane %v1692_v30, 7  ;;  %v4427_v57 = vrot.slane %v9143_v22, 4  ;;  %v4475_v27 = vrot.slane %v4473_v11, 7  ;;  %v2421_v4 = vsel %vm1290_vm13, %v7257_v2, %v9217_v0  ;;  %v10929_v2 = vld [vmem:[#allocation63_spill] sm:$0xff]  ;;  %v10934_v29 = vld [vmem:[#allocation66_spill] sm:$0xff] }
 0x252   : > { %v3001_v12 = vpop.permute.xlu1 %3000  ;;  %v2945_v5 = vsel %vm7615_vm11, %v9110_v7, %v10926_v16  ;;  %v1685_v16 = vrot.slane %v1683_v44, 7  ;;  %v1678_v23 = vshrl.u32 %v6448_v28, 16  ;;  %v1695_v7 = vshll.u32 %v9482_v8, 16 }
 0x253   : > { %3048 = vrot.lane.b32.xlu1 %v2945_v5, %s7409_s16  ;;  %v9548_v5 = vsel %vm1290_vm13, %v7255_v15, %v9148_v21  ;;  %v4435_v44 = vsel %vm8744_vm15, %v4427_v57, %v9145_v18  ;;  %v4603_v30 = vrot.slane %v9211_v37, 4  ;;  %v2935_v21 = vsel %vm7615_vm11, %v9108_v46, %v9057_v40  ;;  %v7367_v46 = vld [vmem:[#allocation2 + $0x84] sm:$0xff]  }
 0x254   : > { %v9540_v60 = vpop.permute.xlu0 %3672  ;;  %3014 = vrot.lane.b32.xlu0 %v2743_v34, %s7409_s16  ;;  %v1686_v34 = vshll.u32 %v9480_v33, 16  ;;  %v10927_v0 = vshll.u32 %v9083_v42, 16  ;;  %v1690_v18 = vrot.slane %v1685_v16, 4  ;;  %v1697_v28 = vor.u32 %v1695_v7, %v1694_v13  ;;  %v10928_v33 = vld [vmem:[#allocation71_spill] sm:$0xff]  ;;  %v10932_v7 = vld [vmem:[#allocation68_spill] sm:$0xff] }
 0x255   : > { %v10930_v57 = vrot.slane %v10929_v2, 4  ;;  %v9578_v42 = vsel %vm1290_vm13, %v7367_v46, %v9121_v55  ;;  %v10933_v13 = vrot.slane %v10932_v7, 4  ;;  %v10935_v2 = vld [vmem:[#allocation60_spill] sm:$0xff]  ;;  %v4611_v55 = vsel %vm8744_vm15, %v4603_v30, %v9213_v35  ;;  %v10941_v7 = vld [vmem:[#allocation10_spill] sm:$0xff] }
 0x256   : > { %v3033_v24 = vpop.permute.xlu1 %3032  ;;  %v4425_v15 = vor.u32 %v10927_v0, %v9143_v22  ;;  %v7368_v22 = vld [vmem:[#allocation2 + $0x74] sm:$0xf]  ;;  %v10931_v0 = vld [vmem:[#allocation73_spill] sm:$0xff]  ;;  %v10936_v19 = vrot.slane %v10935_v2, 11  ;;  %v10943_v35 = vrot.slane %v9093_v1, 11  ;;  %v10944_v30 = vshll.u32 %v9136_v43, 16 }
 0x257   : > { %4696 = vrot.lane.b32.xlu1 %v4435_v44, %s7410_s17  ;;  %v1544_v40 = vsel %vm8744_vm15, %v10930_v57, %v10928_v33  ;;  %v6674_v44 = vcombine.low %v3781_v47, %v7368_v22  ;;  %v1688_v57 = vor.u32 %v1686_v34, %v1685_v16  ;;  %v10937_v47 = vld [vmem:[#allocation72_spill] sm:$0xff]  ;;  %v9607_v16 = vcombine.low %v2421_v4, %v2421_v4 }
 0x258   : > { %v9566_v8 = vpop.permute.xlu0 %3636  ;;  %3046 = vrot.lane.b32.xlu0 %v2935_v21, %s7409_s16  ;;  %1889 = vst.msk [vmem:[#allocation3 + $0xc] sm:$0xf] %vm1885_vm1, %v1544_v40  ;;  %v1720_v21 = vsel %vm8744_vm15, %v10933_v13, %v10931_v0  ;;  %v1535_v33 = vsel %vm8744_vm15, %v10936_v19, %v10934_v29  ;;  %v10938_v40 = vld [vmem:[#allocation64_spill] sm:$0xff]  ;;  %v10940_v0 = vld [vmem:[#allocation13_spill] sm:$0xff]  ;;  %v10942_v19 = vrot.slane %v10941_v7, 4  ;;  %v4601_v34 = vor.u32 %v10944_v30, %v9211_v37 }
 0x259   : > { %3094 = vst.msk [vmem:[#allocation3 + $0xc] sm:$0xf] %vm3090_vm0, %v3001_v12  ;;  %v10939_v46 = vrot.slane %v10938_v40, 11  ;;  %v4426_v12 = vsel %vm8744_vm15, %v10943_v35, %v4425_v15  ;;  %v9624_v2 = vrot.slane %v4464_v31, 7  ;;  %v6572_v1 = vcombine.low %v9548_v5, %v9548_v5  ;;  %v10946_v5 = vld [vmem:[#allocation9_spill] sm:$0xff] }
 0x25a   : > { %v9568_v11 = vpop.permute.xlu1 %4680  ;;  %1905 = vst.msk [vmem:[#allocation3 + $0x4c] sm:$0xf] %vm1885_vm1, %v1720_v21  ;;  %1888 = vst.msk [vmem:[#allocation3 + $0x8] sm:$0xf] %vm1885_vm1, %v1535_v33  ;;  %v1522_v29 = vsel %vm8744_vm15, %v10942_v19, %v10940_v0  ;;  %v6480_v15 = vrot.slane %v1678_v23, 11  ;;  %v1698_v43 = vsel %vm8744_vm15, %v1690_v18, %v1697_v28  ;;  %v9635_v37 = vcombine.high %v2421_v4, %v2421_v4  ;;  %v10945_v23 = vld [vmem:[#allocation15_spill] sm:$0xff] }
 0x25b   : > { %v1711_v22 = vsel %vm8744_vm15, %v10939_v46, %v10937_v47  ;;  %4728 = vrot.lane.b32.xlu1 %v4611_v55, %s7410_s17  ;;  %3110 = vst.msk [vmem:[#allocation3 + $0x4c] sm:$0xf] %vm3090_vm0, %v3033_v24  ;;  %v7369_v24 = vld [vmem:[#allocation2 + $0x78] sm:$0xf]  ;;  %v4145_v33 = vsel %vm1290_vm13, %v6674_v44, %v9187_v10  ;;  %v10947_v55 = vrot.slane %v10946_v5, 11  ;;  %v6646_v4 = vcombine.low %v9578_v42, %v9578_v42 }
 0x25c   : > { %1904 = vst.msk [vmem:[#allocation3 + $0x48] sm:$0xf] %vm1885_vm1, %v1711_v22  ;;  %1887 = vst.msk [vmem:[#allocation3 + $0x4] sm:$0xf] %vm1885_vm1, %v1522_v29  ;;  %4694 = vrot.lane.b32.xlu0 %v4426_v12, %s7410_s17  ;;  %v6675_v31 = vcombine.low %v7369_v24, %v7369_v24  ;;  %v959_v18 = vld [vmem:[#allocation2 + $0x70] sm:$0x8]  ;;  %v1689_v40 = vsel %vm8744_vm15, %v6480_v15, %v1688_v57  ;;  %v6647_v57 = vcombine.high %v9578_v42, %v9578_v42 }
 0x25d   : > { %v9617_v13 = vpop.permute.xlu0 %3668  ;;  %3736 = vst.msk [vmem:[#allocation3 + $0xc] sm:$0xf] %vm3732_vm2, %v9405_v50  ;;  %3752 = vst.msk [vmem:[#allocation3 + $0x4c] sm:$0xf] %vm3732_vm2, %v9432_v56  ;;  %v1513_v50 = vsel %vm8744_vm15, %v10947_v55, %v10945_v23  ;;  %v10948_v56 = vshll.u32 %v9485_v6, 16  ;;  %v10949_v28 = vrot.slane %v9081_v59, 5  ;;  %v6727_v7 = vcombine.low %v4145_v33, %v4145_v33 }
 0x25e   : > { %v9621_v21 = vpop.permute.xlu1 %4712  ;;  %1903 = vst.msk [vmem:[#allocation3 + $0x44] sm:$0xf] %vm1885_vm1, %v1698_v43  ;;  %1886 = vst.msk [vmem:[#allocation3] sm:$0xf] %vm1885_vm1, %v1513_v50  ;;  %v2755_v46 = vshrl.u32 %v9607_v16, 16  ;;  %v4147_v6 = vsel %vm1290_vm13, %v6675_v31, %v9187_v10  ;;  %v2758_v0 = vshll.u32 %v9607_v16, 16 }
 0x25f   : > { %v9647_v47 = vor.u32 %v10948_v56, %v4475_v27  ;;  %v2729_v44 = vsel %vm7615_vm11, %v9229_v52, %v10949_v28  ;;  %v10950_v27 = vrot.slane %v9160_v49, 11  ;;  %1902 = vst.msk [vmem:[#allocation3 + $0x40] sm:$0xf] %vm1885_vm1, %v1689_v40  ;;  %v9674_v49 = vshll.u32 %v6572_v1, 16  ;;  %v7370_v35 = vld [vmem:[#allocation2 + $0x74] sm:$0xf] }
 0x260   : > { %3012 = vrot.lane.b32.xlu1 %v2729_v44, %s7409_s16  ;;  %v7256_v10 = vld [vmem:[#allocation2 + $0xec] ss:$0 sps:$4 sm:$0x11]   ;;  %v2764_v19 = vshll.u32 %v9635_v37, 16  ;;  %v2768_v29 = vshrl.u32 %v9635_v37, 16  ;;  %v6390_v12 = vcombine.low %v959_v18, %v7370_v35  ;;  %v9682_v16 = vcombine.low %v4147_v6, %v4147_v6  ;;  %v10951_v15 = vld [vmem:[#allocation90_spill] sm:$0xff] }
 0x261   : > { %v4602_v59 = vsel %vm8744_vm15, %v10950_v27, %v4601_v34  ;;  %v2999_v22 = vpop.permute.xlu0 %2998  ;;  %v7371_v30 = vld [vmem:[#allocation2 + $0x78] sm:$0xf]  ;;  %v10952_v1 = vrot.slane %v10951_v15, 5  ;;  %v4405_v37 = vrot.slane %v9269_v3, 4  ;;  %v9692_v24 = vrot.slane %v2755_v46, 4  ;;  %v10956_v56 = vld [vmem:[#allocation12_spill] sm:$0xff] }
 0x262   : > { %v2997_v52 = vpop.permute.xlu1 %2996  ;;  %4726 = vrot.lane.b32.xlu0 %v4602_v59, %s7410_s17  ;;  %3093 = vst.msk [vmem:[#allocation3 + $0x8] sm:$0xf] %vm3090_vm0, %v2999_v22  ;;  %v6391_v34 = vcombine.low %v7371_v30, %v7371_v30  ;;  %v10953_v31 = vld [vmem:[#allocation27_spill] sm:$0xff]  ;;  %v9707_v18 = vshrl.u32 %v6727_v7, 16  ;;  %v10957_v44 = vld [vmem:[#allocation86_spill] sm:$0xff]  ;;  %v2776_v27 = vrot.slane %v9674_v49, 5 }
 0x263   : > { %3092 = vst.msk [vmem:[#allocation3 + $0x4] sm:$0xf] %vm3090_vm0, %v2997_v52  ;;  %v2921_v43 = vsel %vm7615_vm11, %v9266_v20, %v10952_v1  ;;  %v9698_v23 = vsel %vm1290_vm13, %v6390_v12, %v10953_v31  ;;  %v10954_v5 = vld [vmem:[#allocation43_spill] sm:$0xff]  ;;  %v10958_v40 = vld [vmem:[#allocation82_spill] sm:$0xff]  ;;  %v10960_v59 = vld [vmem:[#allocation76_spill] sm:$0xff]  ;;  %v9723_v52 = vrot.slane %v2764_v19, 5 }
 0x264   : > { %3734 = vst.msk [vmem:[#allocation3 + $0x4] sm:$0xf] %vm3732_vm2, %v9453_v58  ;;  %3735 = vst.msk [vmem:[#allocation3 + $0x8] sm:$0xf] %vm3732_vm2, %v9502_v26  ;;  %v9694_v58 = vcombine.high %v4145_v33, %v4145_v33  ;;  %v7259_v26 = vld [vmem:[#allocation2 + $0xe4] sm:$0xff]   ;;  %3044 = vrot.lane.b32.xlu1 %v2921_v43, %s7409_s16  ;;  %v10955_v55 = vld [vmem:[#allocation75_spill] sm:$0xff]  ;;  %v1330_v33 = vsel %vm1290_vm13, %v6391_v34, %v10953_v31  ;;  %v9721_v22 = vsel %vm1290_vm13, %v7256_v10, %v10960_v59 }
 0x265   : > { %4776 = vst.msk [vmem:[#allocation3 + $0x4] sm:$0xf] %vm4774_vm3, %v9568_v11  ;;  %v2719_v20 = vsel %vm7615_vm11, %v10955_v55, %v10954_v5  ;;  %v3031_v50 = vpop.permute.xlu0 %3030  ;;  %v2760_v11 = vrot.slane %v2758_v0, 5  ;;  %v10959_v46 = vrot.slane %v10958_v40, 4  ;;  %v10961_v0 = vld [vmem:[#allocation37_spill] sm:$0xff]  ;;  %v2770_v35 = vrot.slane %v2768_v29, 4 }
 0x266   : > { %5337 = vst.msk [vmem:[#allocation3 + $0x4] sm:$0xf] %vm5335_vm4, %v10956_v56  ;;  %3010 = vrot.lane.b32.xlu0 %v2719_v20, %s7409_s16  ;;  %v3029_v28 = vpop.permute.xlu1 %3028  ;;  %v2469_v7 = vsel %vm1290_vm13, %v7259_v26, %v10961_v0  ;;  %v4451_v12 = vshrl.u32 %v9682_v16, 16  ;;  %v9734_v30 = vcombine.high %v9698_v23, %v9698_v23  ;;  %v4413_v10 = vsel %vm8744_vm15, %v4405_v37, %v9300_v39  ;;  %v10963_v34 = vld [vmem:[#allocation81_spill] sm:$0xff]  ;;  %v10964_v15 = vld [vmem:[#allocation80_spill] sm:$0xff] }
 0x267   : > { %3109 = vst.msk [vmem:[#allocation3 + $0x48] sm:$0xf] %vm3090_vm0, %v3031_v50  ;;  %v1588_v6 = vsel %vm8744_vm15, %v10959_v46, %v10957_v44  ;;  %3108 = vst.msk [vmem:[#allocation3 + $0x44] sm:$0xf] %vm3090_vm0, %v3029_v28  ;;  %v9741_v19 = vcombine.low %v1330_v33, %v1330_v33  ;;  %v10965_v1 = vshll.u32 %v10964_v15, 16  ;;  %v10966_v39 = vld [vmem:[#allocation88_spill] sm:$0xff]  ;;  %v2761_v5 = vor.u32 %v2760_v11, %v9692_v24 }
 0x268   : > { %3751 = vst.msk [vmem:[#allocation3 + $0x48] sm:$0xf] %vm3732_vm2, %v9540_v60  ;;  %3750 = vst.msk [vmem:[#allocation3 + $0x44] sm:$0xf] %vm3732_vm2, %v9476_v53  ;;  %4692 = vrot.lane.b32.xlu1 %v4413_v10, %s7410_s17  ;;  %v10962_v60 = vld [vmem:[#allocation78_spill] sm:$0xff]  ;;  %v10967_v53 = vld [vmem:[#allocation67_spill] sm:$0xff]  ;;  %v6445_v33 = vcombine.low %v9698_v23, %v9698_v23  ;;  %v2771_v0 = vor.u32 %v2770_v35, %v9723_v52 }
 0x269   : > { %1893 = vst.msk [vmem:[#allocation3 + $0x1c] sm:$0xf] %vm1885_vm1, %v1588_v6  ;;  %v2911_v29 = vsel %vm7615_vm11, %v10963_v34, %v10962_v60  ;;  %v4403_v43 = vor.u32 %v10965_v1, %v9269_v3  ;;  %v9751_v26 = vpop.permute.xlu0 %4678  ;;  %v10968_v37 = vrot.slane %v10967_v53, 4  ;;  %v6765_v55 = vrot.slane %v9707_v18, 11  ;;  %v10969_v3 = vld [vmem:[#allocation17_spill] sm:$0xff]  ;;  %v10971_v11 = vld [vmem:[#allocation36_spill] sm:$0xff] }
 0x26a   : > { %4792 = vst.msk [vmem:[#allocation3 + $0x44] sm:$0xf] %vm4774_vm3, %v9621_v21  ;;  %v4442_v20 = vshrl.u32 %v9694_v58, 16  ;;  %v4445_v50 = vshll.u32 %v9694_v58, 16  ;;  %3042 = vrot.lane.b32.xlu0 %v2911_v29, %s7409_s16  ;;  %v4454_v21 = vshll.u32 %v9682_v16, 16  ;;  %v10970_v24 = vld [vmem:[#allocation85_spill] sm:$0xff]  ;;  %v9784_v23 = vpop.permute.xlu1 %3650  ;;  %v6599_v18 = vcombine.low %v9531_v9, %v9531_v9 }
 0x26b   : > { %v1764_v31 = vsel %vm8744_vm15, %v10968_v37, %v10966_v39  ;;  %5353 = vst.msk [vmem:[#allocation3 + $0x44] sm:$0xf] %vm5335_vm4, %v10969_v3  ;;  %v3805_v56 = vld [vmem:[#allocation2 + $0xf0] sm:$0x8]  ;;  %v10972_v28 = vrot.slane %v10971_v11, 11  ;;  %v10973_v40 = vld [vmem:[#allocation69_spill] sm:$0xff] }
 0x26c   : > { %1909 = vst.msk [vmem:[#allocation3 + $0x5c] sm:$0xf] %vm1885_vm1, %v1764_v31  ;;  %v10974_v46 = vld [vmem:[#allocation87_spill] sm:$0xff]  ;;  %v4453_v10 = vrot.slane %v4451_v12, 7  ;;  %v1661_v16 = vshrl.u32 %v9734_v30, 16  ;;  %v4581_v60 = vrot.slane %v9328_v45, 4  ;;  %3666 = vrot.lane.b32.xlu1 %v6647_v57, %s7408_s15 }
 0x26d   : > { %v1579_v44 = vsel %vm8744_vm15, %v10972_v28, %v10970_v24  ;;  %v10975_v6 = vrot.slane %v10974_v46, 11  ;;  %v1670_v34 = vshrl.u32 %v9741_v19, 16  ;;  %v10976_v29 = vld [vmem:[#allocation79_spill] sm:$0xff]  ;;  %v9797_v15 = vpop.permute.xlu0 %4710  ;;  %v10978_v1 = vld [vmem:[#allocation49_spill] sm:$0xff]  ;;  %v10981_v31 = vld [vmem:[#allocation58_spill] sm:$0xff]  ;;  %v9809_v57 = vrot.slane %v4442_v20, 7 }
 0x26e   : > { %1892 = vst.msk [vmem:[#allocation3 + $0x18] sm:$0xf] %vm1885_vm1, %v1579_v44  ;;  %v10977_v35 = vrot.slane %v10976_v29, 11  ;;  %v10979_v39 = vld [vmem:[#allocation45_spill] sm:$0xff]  ;;  %v10982_v3 = vld [vmem:[#allocation55_spill] sm:$0xff]  ;;  %v9811_v28 = vcombine.low %v2469_v7, %v2469_v7  ;;  %v9813_v44 = vcombine.high %v2469_v7, %v2469_v7  ;;  %v10985_v46 = vld [vmem:[#allocation38_spill] sm:$0xff] }
 0x26f   : > { %v1755_v59 = vsel %vm8744_vm15, %v10975_v6, %v10973_v40  ;;  %v10980_v53 = vrot.slane %v10979_v39, 4  ;;  %v10983_v24 = vrot.slane %v10982_v3, 4  ;;  %v10984_v40 = vld [vmem:[#allocation47_spill] sm:$0xff]  ;;  %v10986_v6 = vrot.slane %v10985_v46, 11  ;;  %v7372_v20 = vld [vmem:[#allocation2 + $0xf4] sm:$0xf] }
 0x270   : > { %1908 = vst.msk [vmem:[#allocation3 + $0x58] sm:$0xf] %vm1885_vm1, %v1755_v59  ;;  %v4404_v12 = vsel %vm8744_vm15, %v10977_v35, %v4403_v43  ;;  %v983_v43 = vld [vmem:[#allocation2 + $0xf0] sm:$0x8]  ;;  %v9823_v29 = vrot.slane %v2761_v5, 4  ;;  %v6690_v35 = vcombine.low %v3805_v56, %v7372_v20  ;;  %v9825_v39 = vshrl.u32 %v6445_v33, 16 }
 0x271   : > { %v1566_v37 = vsel %vm8744_vm15, %v10980_v53, %v10978_v1  ;;  %v1742_v11 = vsel %vm8744_vm15, %v10983_v24, %v10981_v31  ;;  %4690 = vrot.lane.b32.xlu0 %v4404_v12, %s7410_s17  ;;  %v1557_v59 = vsel %vm8744_vm15, %v10986_v6, %v10984_v40  ;;  %v7373_v1 = vld [vmem:[#allocation2 + $0xf8] sm:$0xf]  ;;  %v7266_v12 = vld [vmem:[%s10565_s3 + $0x10] ss:$0 sps:$4 sm:$0x33]   ;;  %v9831_v53 = vrot.slane %v1661_v16, 7  ;;  %v2995_v20 = vpop.permute.xlu0 %2994 }
 0x272   : > { %1891 = vst.msk [vmem:[#allocation3 + $0x14] sm:$0xf] %vm1885_vm1, %v1566_v37  ;;  %1907 = vst.msk [vmem:[#allocation3 + $0x54] sm:$0xf] %vm1885_vm1, %v1742_v11  ;;  %v6691_v7 = vcombine.low %v7373_v1, %v7373_v1  ;;  %v7374_v37 = vld [vmem:[#allocation2 + $0x74] sm:$0xff]   ;;  %v10988_v3 = vld [vmem:[#allocation57_spill] sm:$0xff]  ;;  %v9847_v46 = vor.u32 %v4454_v21, %v4453_v10  ;;  %7090 = vmatprep.subr.msk.bf16.mxu1 %vm5556_vm5, %v7266_v12 }
 0x273   : > { %1890 = vst.msk [vmem:[#allocation3 + $0x10] sm:$0xf] %vm1885_vm1, %v1557_v59  ;;  %v9835_v31 = vsel %vm1290_vm13, %v7374_v37, %v9445_v48  ;;  %v10987_v5 = vld [vmem:[#allocation91_spill] sm:$0xff]  ;;  %v10989_v33 = vld [vmem:[#allocation53_spill] sm:$0xff]  ;;  %v9845_v40 = vrot.slane %v2771_v0, 4  ;;  %v1672_v16 = vrot.slane %v1670_v34, 7 }
 0x274   : > { %v4589_v56 = vsel %vm8744_vm15, %v4581_v60, %v10987_v5  ;;  %v10990_v24 = vrot.slane %v10989_v33, 11  ;;  %v10991_v48 = vld [vmem:[#allocation19_spill] sm:$0xff]  ;;  %v7267_v60 = vld [vmem:[%s10565_s3 + $0x8] sm:$0xff]   ;;  %v10993_v1 = vld [vmem:[#allocation40_spill] sm:$0xff]  ;;  %v1664_v21 = vshll.u32 %v9734_v30, 16  ;;  %v6645_v30 = vcombine.high %v9835_v31, %v9835_v31 }
 0x275   : > { %4724 = vrot.lane.b32.xlu1 %v4589_v56, %s7410_s17  ;;  %v10992_v6 = vshll.u32 %v10991_v48, 16  ;;  %v9859_v0 = vsel %vm1290_vm13, %v6690_v35, %v10993_v1  ;;  %v7375_v10 = vld [vmem:[#allocation2 + $0xf4] sm:$0xf]  ;;  %3664 = vrot.lane.b32.xlu0 %v6646_v4, %s7408_s15  ;;  %3091 = vst.msk [vmem:[#allocation3] sm:$0xf] %vm3090_vm0, %v2995_v20  ;;  %v9871_v5 = vsel %vm1290_vm13, %v6691_v7, %v10993_v1  ;;  %v1673_v35 = vshll.u32 %v9741_v19, 16 }
 0x276   : > { %v1733_v11 = vsel %vm8744_vm15, %v10990_v24, %v10988_v3  ;;  %v6406_v34 = vcombine.low %v983_v43, %v7375_v10  ;;  %v679_v37 = vld [vmem:[#allocation2 + $0x11c] sm:$0x1]  ;;  %3733 = vst.msk [vmem:[#allocation3] sm:$0xf] %vm3732_vm2, %v9566_v8  ;;  %v5558_v42 = vsel %vm5556_vm5, %v7266_v12, 0  ;;  %v6479_v4 = vrot.slane %v9825_v39, 11 }
 0x277   : > { %v4579_v59 = vor.u32 %v10992_v6, %v9328_v45  ;;  %1906 = vst.msk [vmem:[#allocation3 + $0x50] sm:$0xf] %vm1885_vm1, %v1733_v11  ;;  %v9867_v45 = vpop.permute.xlu1 %4708  ;;  %v1666_v43 = vor.u32 %v1664_v21, %v9831_v53  ;;  %v7376_v56 = vld [vmem:[#allocation2 + $0xf8] sm:$0xf]  ;;  %v4844_v19 = vld [vmem:[#allocation2 + $0xe8] sm:$0xf]  ;;  %7017 = vmatpush3.bf16.msra.mxu1 %v5558_v42  ;;  %v1675_v24 = vor.u32 %v1673_v35, %v1672_v16  ;;  %v3027_v6 = vpop.permute.xlu0 %3026 }
 0x278   : > { %v6407_v3 = vcombine.low %v7376_v56, %v7376_v56  ;;  %v10994_v7 = vld [vmem:[#allocation39_spill] sm:$0xff]  ;;  %4775 = vst.msk [vmem:[#allocation3] sm:$0xf] %vm4774_vm3, %v9751_v26  ;;  %v1668_v8 = vrot.slane %v9831_v53, 4  ;;  %v10995_v12 = vld [vmem:[#allocation20_spill] sm:$0xff]  ;;  %v10997_v48 = vld [vmem:[#allocation6_spill] sm:$0xff]  ;;  %7018 = vmatprep.subr.bf16.mxu1 %v7267_v60  ;;  %v6644_v1 = vcombine.low %v9835_v31, %v9835_v31 }
 0x279   : > { %v9884_v33 = vsel %vm1290_vm13, %v6406_v34, %v10994_v7  ;;  %3662 = vrot.lane.b32.xlu1 %v6645_v30, %s7408_s15  ;;  %v10996_v39 = vrot.slane %v10995_v12, 11  ;;  %5336 = vst.msk [vmem:[#allocation3] sm:$0xf] %vm5335_vm4, %v10997_v48  ;;  %v680_v26 = vsel %vm7523_vm7, 0, %v679_v37  ;;  %v7268_v53 = vld [vmem:[%s10565_s3] sm:$0xff]   ;;  %v11000_v21 = vld [vmem:[#allocation94_spill] sm:$0xff] }
 0x27a   : > { %v1370_v16 = vsel %vm1290_vm13, %v6407_v3, %v10994_v7  ;;  %3107 = vst.msk [vmem:[#allocation3 + $0x40] sm:$0xf] %vm3090_vm0, %v3027_v6  ;;  %681 = vst [vmem:[#allocation2 + $0x11c] sm:$0x1] %v680_v26  ;;  %v11001_v10 = vrot.slane %v11000_v21, 4  ;;  %v11002_v37 = vrot.slane %v9447_v25, 4 }
 0x27b   : > { %v4580_v11 = vsel %vm8744_vm15, %v10996_v39, %v4579_v59  ;;  %v10999_v59 = vld [vmem:[#allocation32_spill] sm:$0xff]  ;;  %v11003_v30 = vrot.slane %v9472_v63, 5  ;;  %v4471_v42 = vrot.slane %v9624_v2, 4  ;;  %3749 = vst.msk [vmem:[#allocation3 + $0x40] sm:$0xf] %vm3732_vm2, %v9617_v13  ;;  %v5153_v56 = vshll.u32 %v4844_v19, 16  ;;  %7019 = vmatpush3.bf16.msra.mxu1 %v7267_v60 }
 0x27c   : > { %4722 = vrot.lane.b32.xlu0 %v4580_v11, %s7410_s17  ;;  %v1632_v34 = vsel %vm8744_vm15, %v11001_v10, %v10999_v59  ;;  %v1808_v35 = vsel %vm8744_vm15, %v11002_v37, %v9496_v38  ;;  %v11004_v25 = vld [vmem:[#allocation98_spill] sm:$0xff]  ;;  %v11005_v3 = vld [vmem:[#allocation93_spill] sm:$0xff]  ;;  %4791 = vst.msk [vmem:[#allocation3 + $0x40] sm:$0xf] %vm4774_vm3, %v9797_v15  ;;  %v9934_v38 = vpop.permute.xlu1 %3682  ;;  %v11009_v11 = vld [vmem:[#allocation23_spill] sm:$0xff]  ;;  %v9955_v10 = vcombine.high %v9884_v33, %v9884_v33 }
 0x27d   : > { %v2801_v31 = vsel %vm7615_vm11, %v9518_v17, %v11003_v30  ;;  %1897 = vst.msk [vmem:[#allocation3 + $0x2c] sm:$0xf] %vm1885_vm1, %v1632_v34  ;;  %1913 = vst.msk [vmem:[#allocation3 + $0x6c] sm:$0xf] %vm1885_vm1, %v1808_v35  ;;  %v11006_v7 = vrot.slane %v11005_v3, 11  ;;  %v5157_v17 = vshrl.u32 %v4844_v19, 16  ;;  %v9960_v34 = vpop.permute.xlu0 %3648  ;;  %7020 = vmatprep.subr.bf16.mxu1 %v7268_v53 }
 0x27e   : > { %v11007_v13 = vld [vmem:[#allocation18_spill] sm:$0xff]  ;;  %v11010_v48 = vld [vmem:[#allocation28_spill] sm:$0xff]  ;;  %v11012_v59 = vld [vmem:[#allocation83_spill] sm:$0xff]  ;;  %v2956_v19 = vshll.u32 %v9813_v44, 16  ;;  %3024 = vrot.lane.b32.xlu1 %v2801_v31, %s7409_s16 }
 0x27f   : > { %v1623_v63 = vsel %vm8744_vm15, %v11006_v7, %v11004_v25  ;;  %v11008_v12 = vrot.slane %v11007_v13, 11  ;;  %v11011_v6 = vrot.slane %v11010_v48, 4  ;;  %v11013_v15 = vld [vmem:[#allocation31_spill] sm:$0xff]  ;;  %v11016_v35 = vld [vmem:[#allocation22_spill] sm:$0xff]  ;;  %v11019_v31 = vld [vmem:[#allocation52_spill] sm:$0xff]  ;;  %v1667_v48 = vsel %vm8744_vm15, %v6479_v4, %v1666_v43  ;;  %7021 = vmatpush3.bf16.msra.mxu1 %v7268_v53 }
 0x280   : > { %1896 = vst.msk [vmem:[#allocation3 + $0x28] sm:$0xf] %vm1885_vm1, %v1623_v63  ;;  %v11014_v21 = vrot.slane %v11013_v15, 4  ;;  %v4847_v37 = vld [vmem:[#allocation2 + $0xf8] sm:$0xf]  ;;  %v11017_v30 = vld [vmem:[#allocation42_spill] sm:$0xff]  ;;  %3660 = vrot.lane.b32.xlu0 %v6644_v1, %s7408_s15  ;;  %v10019_v53 = vcombine.low %v9871_v5, %v9871_v5  ;;  %v2777_v5 = vsel %vm7615_vm11, %v9845_v40, %v2776_v27 }
 0x281   : > { %v1799_v39 = vsel %vm8744_vm15, %v11008_v12, %v9470_v36  ;;  %v1610_v26 = vsel %vm8744_vm15, %v11011_v6, %v11009_v11  ;;  %v11015_v36 = vld [vmem:[#allocation7_spill] sm:$0xff]  ;;  %v11018_v25 = vrot.slane %v11017_v30, 11  ;;  %v11020_v7 = vld [vmem:[#allocation26_spill] sm:$0xff]  ;;  %v9975_v12 = vcombine.low %v1370_v16, %v1370_v16  ;;  %v11022_v6 = vld [vmem:[#allocation96_spill] sm:$0xff]  ;;  %1900 = vst.msk [vmem:[#allocation3 + $0x38] sm:$0xf] %vm1885_vm1, %v1667_v48 }
 0x282   : > { %v1786_v60 = vsel %vm8744_vm15, %v11014_v21, %v11012_v59  ;;  %5352 = vst.msk [vmem:[#allocation3 + $0x40] sm:$0xf] %vm5335_vm4, %v11015_v36  ;;  %v11021_v63 = vrot.slane %v11020_v7, 11  ;;  %v1676_v11 = vsel %vm8744_vm15, %v1668_v8, %v1675_v24  ;;  %v11025_v1 = vshll.u32 %v9499_v54, 16  ;;  %v11026_v4 = vld [vmem:[#allocation95_spill] sm:$0xff]  ;;  %v11027_v43 = vld [vmem:[#allocation29_spill] sm:$0xff]  ;;  %v10024_v7 = vpop.permute.xlu1 %3646 }
 0x283   : > { %1912 = vst.msk [vmem:[#allocation3 + $0x68] sm:$0xf] %vm1885_vm1, %v1799_v39  ;;  %1895 = vst.msk [vmem:[#allocation3 + $0x24] sm:$0xf] %vm1885_vm1, %v1610_v26  ;;  %v1601_v3 = vsel %vm8744_vm15, %v11018_v25, %v11016_v35  ;;  %v4843_v39 = vld [vmem:[#allocation2 + $0xe4] sm:$0xf]  ;;  %v4479_v54 = vsel %vm8744_vm15, %v4471_v42, %v9647_v47  ;;  %v10008_v35 = vcombine.high %v9859_v0, %v9859_v0  ;;  %v10015_v47 = vpop.permute.xlu0 %4706 }
 0x284   : > { %1911 = vst.msk [vmem:[#allocation3 + $0x64] sm:$0xf] %vm1885_vm1, %v1786_v60  ;;  %v1777_v13 = vsel %vm8744_vm15, %v11021_v63, %v11019_v31  ;;  %1894 = vst.msk [vmem:[#allocation3 + $0x20] sm:$0xf] %vm1885_vm1, %v1601_v3  ;;  %v11023_v26 = vld [vmem:[#allocation92_spill] sm:$0xff]  ;;  %v4469_v15 = vor.u32 %v11025_v1, %v9624_v2  ;;  %v9992_v21 = vrot.slane %v5153_v56, 5  ;;  %4704 = vrot.lane.b32.xlu1 %v4479_v54, %s7410_s17 }
 0x285   : > { %1910 = vst.msk [vmem:[#allocation3 + $0x60] sm:$0xf] %vm1885_vm1, %v1777_v13  ;;  %v11024_v59 = vrot.slane %v11023_v26, 4  ;;  %1901 = vst.msk [vmem:[#allocation3 + $0x3c] sm:$0xf] %vm1885_vm1, %v1676_v11  ;;  %v11028_v8 = vrot.slane %v11027_v43, 11  ;;  %v2791_v30 = vsel %vm7615_vm11, %v9511_v41, %v9462_v51  ;;  %v2767_v54 = vsel %vm7615_vm11, %v9823_v29, %v9723_v52 }
 0x286   : > { %v5159_v2 = vrot.slane %v5157_v17, 4  ;;  %v7265_v56 = vld [vmem:[#allocation3] sm:$0xff]   ;;  %v5177_v60 = vshll.u32 %v4847_v37, 16  ;;  %v5181_v36 = vshrl.u32 %v4847_v37, 16  ;;  %v4845_v25 = vld [vmem:[#allocation2 + $0xec] sm:$0x1]  ;;  %3022 = vrot.lane.b32.xlu0 %v2791_v30, %s7409_s16 }
 0x287   : > { %v1654_v16 = vsel %vm8744_vm15, %v11024_v59, %v11022_v6  ;;  %v1645_v24 = vsel %vm8744_vm15, %v11028_v8, %v11026_v4  ;;  %v5144_v42 = vshrl.u32 %v4843_v39, 16  ;;  %v5147_v17 = vshll.u32 %v4843_v39, 16  ;;  %v790_v37 = vld [vmem:[#allocation2 + $0x11c] sm:$0x1]  ;;  %7022 = vmatprep.mubr.msk.bf16.mxu1 %vm5507_vm6, %v7265_v56  ;;  %v4846_v51 = vld [vmem:[#allocation2 + $0xf4] sm:$0xf]  ;;  %v10044_v59 = vpop.permute.xlu0 %3680 }
 0x288   : > { %1899 = vst.msk [vmem:[#allocation3 + $0x34] sm:$0xf] %vm1885_vm1, %v1654_v16  ;;  %1898 = vst.msk [vmem:[#allocation3 + $0x30] sm:$0xf] %vm1885_vm1, %v1645_v24  ;;  %v1837_v3 = vshrl.u32 %v9955_v10, 16  ;;  %v1846_v31 = vshrl.u32 %v9975_v12, 16  ;;  %v5160_v48 = vor.u32 %v5159_v2, %v9992_v21  ;;  %3020 = vrot.lane.b32.xlu1 %v2777_v5, %s7409_s16  ;;  %v4447_v2 = vor.u32 %v4445_v50, %v9809_v57 }
 0x289   : > { %v791_v41 = vsel %vm7523_vm7, 0, %v790_v37  ;;  %v2960_v63 = vshrl.u32 %v9813_v44, 16  ;;  %v11029_v13 = vrot.slane %v9515_v32, 11  ;;  %v4449_v11 = vrot.slane %v9809_v57, 4  ;;  %v4848_v49 = vld [vmem:[#allocation2 + $0xfc] sm:$0x1] }
 0x28a   : > { %792 = vst [vmem:[#allocation2 + $0x11c] sm:$0x1] %v791_v41  ;;  %v5163_v20 = vshll.u32 %v4845_v25, 16  ;;  %v10041_v6 = vrot.slane %v5177_v60, 5  ;;  %v5183_v26 = vrot.slane %v5181_v36, 4  ;;  %v5146_v27 = vrot.slane %v5144_v42, 4  ;;  %v10061_v25 = vpop.permute.xlu1 %3678 }
 0x28b   : > { %v4470_v39 = vsel %vm8744_vm15, %v11029_v13, %v4469_v15  ;;  %v5149_v40 = vrot.slane %v5147_v17, 5  ;;  %v5168_v32 = vshrl.u32 %v4846_v51, 16  ;;  %v5171_v16 = vshll.u32 %v4846_v51, 16  ;;  %v11030_v37 = vld [vmem:[#allocation101_spill] sm:$0xff]  ;;  %v11031_v52 = vld [vmem:[#allocation99_spill] sm:$0xff]  ;;  %v11033_v9 = vld [vmem:[#allocation100_spill] sm:$0xff] }
 0x28c   : > { %v4618_v1 = vshrl.u32 %v10008_v35, 16  ;;  %v4627_v15 = vshrl.u32 %v10019_v53, 16  ;;  %v1839_v4 = vrot.slane %v1837_v3, 7  ;;  %v1848_v43 = vrot.slane %v1846_v31, 7  ;;  %4702 = vrot.lane.b32.xlu0 %v4470_v39, %s7410_s17 }
 0x28d   : > { %v1849_v8 = vshll.u32 %v9975_v12, 16  ;;  %v4457_v24 = vsel %vm8744_vm15, %v4449_v11, %v9847_v46  ;;  %v5161_v56 = vrot.slane %v5160_v48, 4  ;;  %v5165_v60 = vrot.slane %v5163_v20, 5  ;;  %v10064_v46 = vpop.permute.xlu0 %3644 }
 0x28e   : > { %v5184_v36 = vor.u32 %v5183_v26, %v10041_v6  ;;  %v5187_v30 = vshll.u32 %v4848_v49, 16  ;;  %4700 = vrot.lane.b32.xlu1 %v4457_v24, %s7410_s17  ;;  %v5150_v12 = vor.u32 %v5149_v40, %v5146_v27  ;;  %v5170_v42 = vrot.slane %v5168_v32, 4 }
 0x28f   : > { %v5173_v17 = vrot.slane %v5171_v16, 5  ;;  %v11032_v29 = vrot.slane %v11031_v52, 4  ;;  %v2947_v50 = vshrl.u32 %v9811_v28, 16  ;;  %v6469_v57 = vcombine.low %v9884_v33, %v9884_v33  ;;  %v7378_v52 = vld [vmem:[#allocation2 + $0x104] sm:$0xf] }
 0x290   : > { %v1844_v3 = vrot.slane %v1839_v4, 4  ;;  %v1851_v31 = vor.u32 %v1849_v8, %v1848_v43  ;;  %3018 = vrot.lane.b32.xlu0 %v2767_v54, %s7409_s16  ;;  %v2950_v51 = vshll.u32 %v9811_v28, 16  ;;  %v10079_v41 = vrot.slane %v2956_v19, 5  ;;  %v11034_v43 = vld [vmem:[#allocation97_spill] sm:$0xff] }
 0x291   : > { %v1830_v58 = vsel %vm8744_vm15, %v11032_v29, %v11030_v37  ;;  %v2962_v5 = vrot.slane %v2960_v63, 4  ;;  %v4629_v13 = vrot.slane %v4627_v15, 7  ;;  %v4620_v39 = vrot.slane %v4618_v1, 7  ;;  %v10089_v26 = vpop.permute.xlu0 %3676 }
 0x292   : > { %1915 = vst.msk [vmem:[#allocation3 + $0x74] sm:$0xf] %vm1885_vm1, %v1830_v58  ;;  %v5166_v11 = vsel %vm7615_vm11, %v5161_v56, %v5165_v60  ;;  %v5185_v48 = vrot.slane %v5184_v36, 4  ;;  %v5189_v33 = vrot.slane %v5187_v30, 5  ;;  %v4630_v20 = vshll.u32 %v10019_v53, 16  ;;  %v3009_v53 = vpop.permute.xlu1 %3008  ;;  %v11036_v56 = vld [vmem:[#allocation102_spill] sm:$0xff] }
 0x293   : > { %5289 = vrot.lane.b32.xlu1 %v5166_v11, %s7407_s12  ;;  %v4448_v28 = vsel %vm8744_vm15, %v6765_v55, %v4447_v2  ;;  %v5151_v44 = vrot.slane %v5150_v12, 4  ;;  %v5174_v19 = vor.u32 %v5173_v17, %v5170_v42  ;;  %v6596_v63 = vcombine.low %v9721_v22, %v9721_v22  ;;  %3098 = vst.msk [vmem:[#allocation3 + $0x1c] sm:$0xf] %vm3090_vm0, %v3009_v53  ;;  %v3808_v22 = vld [vmem:[#allocation2 + $0x100] sm:$0x8] }
 0x294   : > { %v1832_v49 = vshrl.u32 %v6469_v57, 16  ;;  %v1840_v27 = vshll.u32 %v9955_v10, 16  ;;  %4698 = vrot.lane.b32.xlu0 %v4448_v28, %s7410_s17  ;;  %v1852_v40 = vsel %vm8744_vm15, %v1844_v3, %v1851_v31  ;;  %v2963_v55 = vor.u32 %v2962_v5, %v10079_v41  ;;  %3740 = vst.msk [vmem:[#allocation3 + $0x1c] sm:$0xf] %vm3732_vm2, %v9784_v23  ;;  %v7377_v60 = vld [vmem:[#allocation2 + $0x108] sm:$0xf] }
 0x295   : > { %v6751_v32 = vcombine.low %v9859_v0, %v9859_v0  ;;  %v4632_v16 = vor.u32 %v4630_v20, %v4629_v13  ;;  %1917 = vst.msk [vmem:[#allocation3 + $0x7c] sm:$0xf] %vm1885_vm1, %v1852_v40  ;;  %v5190_v1 = vsel %vm7615_vm11, %v5185_v48, %v5189_v33  ;;  %v4625_v15 = vrot.slane %v4620_v39, 4  ;;  %v3007_v17 = vpop.permute.xlu0 %3006  ;;  %v11039_v48 = vld [vmem:[#allocation8_spill] sm:$0xff] }
 0x296   : > { %v1842_v10 = vor.u32 %v1840_v27, %v1839_v4  ;;  %v11035_v8 = vrot.slane %v11034_v43, 11  ;;  %v2949_v24 = vrot.slane %v2947_v50, 4  ;;  %v2952_v54 = vrot.slane %v2950_v51, 5  ;;  %v3041_v42 = vpop.permute.xlu1 %3040  ;;  %3097 = vst.msk [vmem:[#allocation3 + $0x18] sm:$0xf] %vm3090_vm0, %v3007_v17  ;;  %v11037_v50 = vld [vmem:[#allocation70_spill] sm:$0xff] }
 0x297   : > { %5293 = vrot.lane.b32.xlu1 %v5190_v1, %s7407_s12  ;;  %v5156_v4 = vsel %vm7615_vm11, %v5151_v44, %v9992_v21  ;;  %v5175_v2 = vrot.slane %v5174_v19, 4  ;;  %v2987_v23 = vor.u32 %v11036_v56, %v9513_v14  ;;  %v6693_v36 = vcombine.low %v7377_v60, %v7377_v60  ;;  %3114 = vst.msk [vmem:[#allocation3 + $0x5c] sm:$0xf] %vm3090_vm0, %v3041_v42  ;;  %v11041_v19 = vld [vmem:[#allocation11_spill] sm:$0xff] }
 0x298   : > { %v1821_v0 = vsel %vm8744_vm15, %v11035_v8, %v11033_v9  ;;  %v2966_v30 = vshll.u32 %v6596_v63, 16  ;;  %v6487_v12 = vrot.slane %v1832_v49, 11  ;;  %5287 = vrot.lane.b32.xlu0 %v5156_v4, %s7407_s12  ;;  %v2990_v37 = vshll.u32 %v6599_v18, 16  ;;  %3756 = vst.msk [vmem:[#allocation3 + $0x5c] sm:$0xf] %vm3732_vm2, %v9934_v38  ;;  %v11038_v38 = vld [vmem:[#allocation5_spill] sm:$0xff] }
 0x299   : > { %1914 = vst.msk [vmem:[#allocation3 + $0x70] sm:$0xf] %vm1885_vm1, %v1821_v0  ;;  %v6692_v29 = vcombine.low %v3808_v22, %v7378_v52  ;;  %v4613_v58 = vshrl.u32 %v6751_v32, 16  ;;  %v4621_v21 = vshll.u32 %v10008_v35, 16  ;;  %v4192_v57 = vsel %vm1290_vm13, %v6693_v36, %v11037_v50  ;;  %v3039_v44 = vpop.permute.xlu0 %3038  ;;  %v11042_v63 = vld [vmem:[#allocation16_spill] sm:$0xff]  ;;  %v7379_v0 = vld [vmem:[#allocation2 + $0xf4] sm:$0xff]  }
 0x29a   : > { %v2964_v3 = vrot.slane %v2963_v55, 4  ;;  %v4633_v31 = vsel %vm8744_vm15, %v4625_v15, %v4632_v16  ;;  %3739 = vst.msk [vmem:[#allocation3 + $0x18] sm:$0xf] %vm3732_vm2, %v9960_v34  ;;  %v1843_v35 = vsel %vm8744_vm15, %v6487_v12, %v1842_v10  ;;  %v2953_v5 = vor.u32 %v2952_v54, %v2949_v24  ;;  %v4689_v28 = vpop.permute.xlu1 %4688  ;;  %v11044_v16 = vld [vmem:[#allocation54_spill] sm:$0xff]  ;;  %v11045_v22 = vld [vmem:[#allocation56_spill] sm:$0xff] }
 0x29b   : > { %v10136_v51 = vsel %vm1290_vm13, %v6692_v29, %v11037_v50  ;;  %4732 = vrot.lane.b32.xlu1 %v4633_v31, %s7410_s17  ;;  %v5180_v13 = vsel %vm7615_vm11, %v5175_v2, %v10041_v6  ;;  %v4623_v11 = vor.u32 %v4621_v21, %v4620_v39  ;;  %1916 = vst.msk [vmem:[#allocation3 + $0x78] sm:$0xf] %vm1885_vm1, %v1843_v35  ;;  %v2968_v20 = vrot.slane %v2966_v30, 5  ;;  %v11046_v24 = vld [vmem:[#allocation62_spill] sm:$0xff]  ;;  %v4850_v36 = vld [vmem:[#allocation2 + $0x108] sm:$0xf] }
 0x29c   : > { %v11040_v34 = vcombine.low %v11039_v48, %v11039_v48  ;;  %5291 = vrot.lane.b32.xlu0 %v5180_v13, %s7407_s12  ;;  %v11043_v49 = vcombine.low %v11041_v19, %v11042_v63  ;;  %v6756_v39 = vcombine.low %v4192_v57, %v4192_v57  ;;  %v6773_v27 = vrot.slane %v4613_v58, 11  ;;  %3113 = vst.msk [vmem:[#allocation3 + $0x58] sm:$0xf] %vm3090_vm0, %v3039_v44  ;;  %v7380_v29 = vld [vmem:[#allocation2 + $0x104] sm:$0xff]  }
 0x29d   : > { %v2988_v53 = vrot.slane %v2987_v23, 4  ;;  %v2992_v40 = vrot.slane %v2990_v37, 5  ;;  %v10159_v18 = vcombine.high %v10136_v51, %v10136_v51  ;;  %v2969_v55 = vsel %vm7615_vm11, %v2964_v3, %v2968_v20  ;;  %3755 = vst.msk [vmem:[#allocation3 + $0x58] sm:$0xf] %vm3732_vm2, %v10044_v59  ;;  %v10180_v2 = vpop.permute.xlu0 %4686  ;;  %v4853_v37 = vld [vmem:[#allocation2 + $0x118] sm:$0xf] }
 0x29e   : > { %v4197_v33 = vsel %vm1290_vm13, %v11040_v34, %v11038_v38  ;;  %v10154_v6 = vsel %vm1290_vm13, %v11043_v49, %v11038_v38  ;;  %v2977_v10 = vor.u32 %v11045_v22, %v11044_v16  ;;  %v2954_v1 = vrot.slane %v2953_v5, 4  ;;  %v4721_v9 = vpop.permute.xlu1 %4720  ;;  %v11047_v58 = vld [vmem:[#allocation84_spill] sm:$0xff]  ;;  %v4852_v49 = vld [vmem:[#allocation2 + $0x114] sm:$0xf] }
 0x29f   : > { %v6759_v32 = vcombine.low %v4197_v33, %v4197_v33  ;;  %3052 = vrot.lane.b32.xlu1 %v2969_v55, %s7409_s16  ;;  %v4624_v15 = vsel %vm8744_vm15, %v6773_v27, %v4623_v11  ;;  %v10173_v43 = vcombine.high %v10154_v6, %v10154_v6  ;;  %v4649_v8 = vshrl.u32 %v6756_v39, 16  ;;  %v4849_v48 = vld [vmem:[#allocation2 + $0x104] sm:$0xf] }
 0x2a0   : > { %4730 = vrot.lane.b32.xlu0 %v4624_v15, %s7410_s17  ;;  %v4640_v59 = vshrl.u32 %v10159_v18, 16  ;;  %v3553_v54 = vsel %vm1290_vm13, %v7379_v0, %v11046_v24  ;;  %v2993_v4 = vsel %vm7615_vm11, %v2988_v53, %v2992_v40  ;;  %v2978_v23 = vrot.slane %v2977_v10, 4 }
 0x2a1   : > { %v4671_v56 = vshrl.u32 %v6759_v32, 16  ;;  %v2959_v60 = vsel %vm7615_vm11, %v2954_v1, %v10079_v41  ;;  %v4662_v12 = vshrl.u32 %v10173_v43, 16  ;;  %v4651_v42 = vrot.slane %v4649_v8, 7  ;;  %v10205_v11 = vpop.permute.xlu0 %4718  ;;  %v4854_v8 = vld [vmem:[#allocation2 + $0x11c] sm:$0x1] }
 0x2a2   : > { %v3005_v30 = vpop.permute.xlu1 %3004  ;;  %v6661_v17 = vcombine.high %v3553_v54, %v3553_v54  ;;  %v4642_v52 = vrot.slane %v4640_v59, 7  ;;  %v3555_v21 = vsel %vm1290_vm13, %v7380_v29, %v11047_v58  ;;  %v5201_v41 = vshll.u32 %v4850_v36, 16 }
 0x2a3   : > { %3056 = vrot.lane.b32.xlu1 %v2993_v4, %s7409_s16  ;;  %3096 = vst.msk [vmem:[#allocation3 + $0x14] sm:$0xf] %vm3090_vm0, %v3005_v30  ;;  %v5205_v50 = vshrl.u32 %v4850_v36, 16  ;;  %v4673_v57 = vrot.slane %v4671_v56, 7  ;;  %v4674_v3 = vshll.u32 %v6759_v32, 16  ;;  %v4652_v31 = vshll.u32 %v6756_v39, 16 }
 0x2a4   : > { %3050 = vrot.lane.b32.xlu0 %v2959_v60, %s7409_s16  ;;  %3738 = vst.msk [vmem:[#allocation3 + $0x14] sm:$0xf] %vm3732_vm2, %v10024_v7  ;;  %v2983_v35 = vsel %vm7615_vm11, %v2978_v23, %v9513_v14  ;;  %v6757_v5 = vcombine.low %v10154_v6, %v10154_v6  ;;  %v6754_v13 = vcombine.low %v10136_v51, %v10136_v51  ;;  %v11048_v7 = vld [vmem:[#allocation46_spill] sm:$0xff]  ;;  %v5225_v34 = vshll.u32 %v4853_v37, 16  ;;  %v4851_v39 = vld [vmem:[#allocation2 + $0x10c] sm:$0x1] }
 0x2a5   : > { %4780 = vst.msk [vmem:[#allocation3 + $0x14] sm:$0xf] %vm4774_vm3, %v4689_v28  ;;  %v5229_v33 = vshrl.u32 %v4853_v37, 16  ;;  %v4664_v14 = vrot.slane %v4662_v12, 7  ;;  %v4654_v20 = vor.u32 %v4652_v31, %v4651_v42  ;;  %v6663_v28 = vcombine.high %v3555_v21, %v3555_v21  ;;  %v11049_v32 = vld [vmem:[#allocation50_spill] sm:$0xff] }
 0x2a6   : > { %5341 = vst.msk [vmem:[#allocation3 + $0x14] sm:$0xf] %vm5335_vm4, %v11048_v7  ;;  %v3037_v38 = vpop.permute.xlu1 %3036  ;;  %v6660_v44 = vcombine.low %v3553_v54, %v3553_v54  ;;  %v4647_v19 = vrot.slane %v4642_v52, 4  ;;  %v10210_v51 = vrot.slane %v5201_v41, 5  ;;  %v5207_v63 = vrot.slane %v5205_v50, 4  ;;  %v11050_v36 = vld [vmem:[#allocation30_spill] sm:$0xff] }
 0x2a7   : > { %3694 = vrot.lane.b32.xlu1 %v6661_v17, %s7408_s15  ;;  %3112 = vst.msk [vmem:[#allocation3 + $0x54] sm:$0xf] %vm3090_vm0, %v3037_v38  ;;  %v4676_v6 = vor.u32 %v4674_v3, %v4673_v57  ;;  %v5192_v27 = vshrl.u32 %v4849_v48, 16  ;;  %v5195_v53 = vshll.u32 %v4849_v48, 16  ;;  %v4657_v40 = vshrl.u32 %v6757_v5, 16  ;;  %v11052_v3 = vld [vmem:[#allocation34_spill] sm:$0xff] }
 0x2a8   : > { %3054 = vrot.lane.b32.xlu0 %v2983_v35, %s7409_s16  ;;  %3754 = vst.msk [vmem:[#allocation3 + $0x54] sm:$0xf] %vm3732_vm2, %v10061_v25  ;;  %v4635_v55 = vshrl.u32 %v6754_v13, 16  ;;  %v3003_v25 = vpop.permute.xlu0 %3002  ;;  %v10217_v16 = vrot.slane %v5225_v34, 5  ;;  %v5231_v22 = vrot.slane %v5229_v33, 4  ;;  %v4643_v10 = vshll.u32 %v10159_v18, 16 }
 0x2a9   : > { %4796 = vst.msk [vmem:[#allocation3 + $0x54] sm:$0xf] %vm4774_vm3, %v4721_v9  ;;  %v6662_v1 = vcombine.low %v3555_v21, %v3555_v21  ;;  %v5216_v15 = vshrl.u32 %v4852_v49, 16  ;;  %v5219_v9 = vshll.u32 %v4852_v49, 16  ;;  %v4655_v59 = vsel %vm8744_vm15, %v4647_v19, %v4654_v20  ;;  %v11053_v7 = vld [vmem:[#allocation48_spill] sm:$0xff]  ;;  %v11054_v34 = vld [vmem:[#allocation61_spill] sm:$0xff] }
 0x2aa   : > { %5357 = vst.msk [vmem:[#allocation3 + $0x54] sm:$0xf] %vm5335_vm4, %v11049_v32  ;;  %v4669_v0 = vrot.slane %v4664_v14, 4  ;;  %v4685_v24 = vpop.permute.xlu1 %4684  ;;  %v5208_v54 = vor.u32 %v5207_v63, %v10210_v51  ;;  %v5211_v4 = vshll.u32 %v4851_v39, 16  ;;  %v4665_v56 = vshll.u32 %v10173_v43, 16 }
 0x2ab   : > { %3698 = vrot.lane.b32.xlu1 %v6663_v28, %s7408_s15  ;;  %3095 = vst.msk [vmem:[#allocation3 + $0x10] sm:$0xf] %vm3090_vm0, %v3003_v25  ;;  %v4645_v18 = vor.u32 %v4643_v10, %v4642_v52  ;;  %v5194_v23 = vrot.slane %v5192_v27, 4  ;;  %v5197_v60 = vrot.slane %v5195_v53, 5  ;;  %v5232_v43 = vor.u32 %v5231_v22, %v10217_v16 }
 0x2ac   : > { %3692 = vrot.lane.b32.xlu0 %v6660_v44, %s7408_s15  ;;  %3737 = vst.msk [vmem:[#allocation3 + $0x10] sm:$0xf] %vm3732_vm2, %v10064_v46  ;;  %v11051_v46 = vld [vmem:[#allocation59_spill] sm:$0xff]  ;;  %v3035_v30 = vpop.permute.xlu0 %3034  ;;  %v5235_v12 = vshll.u32 %v4854_v8, 16  ;;  %v6774_v42 = vrot.slane %v4635_v55, 11  ;;  %v5221_v17 = vrot.slane %v5219_v9, 5  ;;  %v4677_v37 = vsel %vm8744_vm15, %v4669_v0, %v4676_v6 }
 0x2ad   : > { %4779 = vst.msk [vmem:[#allocation3 + $0x10] sm:$0xf] %vm4774_vm3, %v10180_v2  ;;  %4778 = vst.msk [vmem:[#allocation3 + $0xc] sm:$0xf] %vm4774_vm3, %v4685_v24  ;;  %v5218_v2 = vrot.slane %v5216_v15, 4  ;;  %v5209_v52 = vrot.slane %v5208_v54, 4  ;;  %v4667_v50 = vor.u32 %v4665_v56, %v4664_v14  ;;  %v5198_v57 = vor.u32 %v5197_v60, %v5194_v23 }
 0x2ae   : > { %5340 = vst.msk [vmem:[#allocation3 + $0x10] sm:$0xf] %vm5335_vm4, %v11050_v36  ;;  %5339 = vst.msk [vmem:[#allocation3 + $0xc] sm:$0xf] %vm5335_vm4, %v11051_v46  ;;  %v5213_v29 = vrot.slane %v5211_v4, 5  ;;  %v3659_v58 = vpop.permute.xlu1 %3658  ;;  %v6775_v21 = vrot.slane %v4657_v40, 11  ;;  %v4646_v41 = vsel %vm8744_vm15, %v6774_v42, %v4645_v18 }
 0x2af   : > { %4736 = vrot.lane.b32.xlu1 %v4655_v59, %s7410_s17  ;;  %3111 = vst.msk [vmem:[#allocation3 + $0x50] sm:$0xf] %vm3090_vm0, %v3035_v30  ;;  %v5233_v35 = vrot.slane %v5232_v43, 4  ;;  %v5222_v5 = vor.u32 %v5221_v17, %v5218_v2  ;;  %v5199_v48 = vrot.slane %v5198_v57, 4  ;;  %v11055_v6 = vld [vmem:[#allocation51_spill] sm:$0xff]  ;;  %v11056_v9 = vld [vmem:[#allocation77_spill] sm:$0xff] }
 0x2b0   : > { %3696 = vrot.lane.b32.xlu0 %v6662_v1, %s7408_s15  ;;  %3753 = vst.msk [vmem:[#allocation3 + $0x50] sm:$0xf] %vm3732_vm2, %v10089_v26  ;;  %v4683_v31 = vpop.permute.xlu0 %4682  ;;  %v5237_v26 = vrot.slane %v5235_v12, 5  ;;  %v5214_v13 = vsel %vm7615_vm11, %v5209_v52, %v5213_v29  ;;  %v4668_v38 = vsel %vm8744_vm15, %v6775_v21, %v4667_v50  ;;  %v11057_v24 = vld [vmem:[#allocation65_spill] sm:$0xff]  ;;  %v11058_v4 = vld [vmem:[#allocation24_spill] sm:$0xff]  ;;  %v11059_v23 = vld [vmem:[#allocation35_spill] sm:$0xff] }
 0x2b1   : > { %4795 = vst.msk [vmem:[#allocation3 + $0x50] sm:$0xf] %vm4774_vm3, %v10205_v11  ;;  %4777 = vst.msk [vmem:[#allocation3 + $0x8] sm:$0xf] %vm4774_vm3, %v4683_v31  ;;  %v5223_v14 = vrot.slane %v5222_v5, 4  ;;  %v5204_v20 = vsel %vm7615_vm11, %v5199_v48, %v10210_v51  ;;  %v11060_v46 = vld [vmem:[#allocation25_spill] sm:$0xff] }
 0x2b2   : > { %5356 = vst.msk [vmem:[#allocation3 + $0x50] sm:$0xf] %vm5335_vm4, %v11052_v3  ;;  %5338 = vst.msk [vmem:[#allocation3 + $0x8] sm:$0xf] %vm5335_vm4, %v11053_v7  ;;  %v4717_v11 = vpop.permute.xlu1 %4716  ;;  %v5238_v33 = vsel %vm7615_vm11, %v5233_v35, %v5237_v26  ;;  %v11061_v42 = vld [vmem:[#allocation33_spill] sm:$0xff]  ;;  %v11065_v31 = vld [vmem:[#allocation44_spill] sm:$0xff] }
 0x2b3   : > { %4740 = vrot.lane.b32.xlu1 %v4677_v37, %s7410_s17  ;;  %4794 = vst.msk [vmem:[#allocation3 + $0x4c] sm:$0xf] %vm4774_vm3, %v4717_v11  ;;  %v5228_v44 = vsel %vm7615_vm11, %v5223_v14, %v10217_v16  ;;  %v11062_v52 = vld [vmem:[#allocation21_spill] sm:$0xff]  ;;  %v5769_v11 = vld [vmem:[%s10567_s5] sm:$0x3]  ;;  %vm6213_vm7 = vcmask 125952  }
 0x2b4   : > { %4734 = vrot.lane.b32.xlu0 %v4646_v41, %s7410_s17  ;;  %5355 = vst.msk [vmem:[#allocation3 + $0x4c] sm:$0xf] %vm5335_vm4, %v11054_v34  ;;  %v3657_v62 = vpop.permute.xlu0 %3656  ;;  %v11063_v41 = vld [vmem:[#allocation14_spill] sm:$0xff]  ;;  %v11066_v35 = vld [vmem:[#allocation89_spill] sm:$0xff]  ;;  %7091 = vmatprep.subr.msk.bf16.mxu0 %vm5556_vm5, %v5769_v11 }
 0x2b5   : > { %v7270_v63 = vld [vmem:[#allocation3 + $0x10] sm:$0xff]   ;;  %v11067_v5 = vld [vmem:[#allocation41_spill] sm:$0xff] }
 0x2b6   : > { %v3691_v28 = vpop.permute.xlu1 %3690 }
 0x2b7   : > { %5297 = vrot.lane.b32.xlu1 %v5214_v13, %s7407_s12 }
 0x2b8   : > { %4738 = vrot.lane.b32.xlu0 %v4668_v38, %s7410_s17  ;;  %v4715_v51 = vpop.permute.xlu0 %4714  ;;  %v5826_v38 = vsel %vm5556_vm5, %v5769_v11, 0 }
 0x2b9   : > { %v7269_v19 = vld [vmem:[#allocation3 + $0x8] sm:$0xff]   ;;  %4793 = vst.msk [vmem:[#allocation3 + $0x48] sm:$0xf] %vm4774_vm3, %v4715_v51  ;;  %7055 = vmatpush3.bf16.msra.mxu0 %v5826_v38 }
 0x2ba   : > { %7023 = vmatmul.mubr.msk.bf16.vlgmr.msra.gmra.mxu1 %vm5507_vm6, %v7269_v19  ;;  %v3655_v49 = vpop.permute.xlu1 %3654  ;;  %5354 = vst.msk [vmem:[#allocation3 + $0x48] sm:$0xf] %vm5335_vm4, %v11055_v6 }
 0x2bb   : > { %5301 = vrot.lane.b32.xlu1 %v5238_v33, %s7407_s12  ;;  %7026 = vmatprep.mubr.msk.bf16.mxu1 %vm5507_vm6, %v7270_v63  ;;  %v7276_v63 = vld [vmem:[#allocation3 + $0x40] sm:$0xff]  }
 0x2bc   : > { %5295 = vrot.lane.b32.xlu0 %v5204_v20, %s7407_s12  ;;  %v3689_v39 = vpop.permute.xlu0 %3688 }
 0x2be   : > { %v3687_v27 = vpop.permute.xlu1 %3686 }
 0x2c0   : > { %5299 = vrot.lane.b32.xlu0 %v5228_v44, %s7407_s12  ;;  %v3653_v53 = vpop.permute.xlu0 %3652 }
 0x2c2   : > { %v3017_v61 = vpop.permute.xlu1 %3016 }
 0x2c3   : > { %3102 = vst.msk [vmem:[#allocation3 + $0x2c] sm:$0xf] %vm3090_vm0, %v3017_v61 }
 0x2c4   : > { %v3685_v40 = vpop.permute.xlu0 %3684  ;;  %3744 = vst.msk [vmem:[#allocation3 + $0x2c] sm:$0xf] %vm3732_vm2, %v3659_v58 }
 0x2c6   : > { %v3049_v55 = vpop.permute.xlu1 %3048 }
 0x2c7   : > { %3118 = vst.msk [vmem:[#allocation3 + $0x6c] sm:$0xf] %vm3090_vm0, %v3049_v55 }
 0x2c8   : > { %v3015_v32 = vpop.permute.xlu0 %3014  ;;  %3760 = vst.msk [vmem:[#allocation3 + $0x6c] sm:$0xf] %vm3732_vm2, %v3691_v28 }
 0x2c9   : > { %3101 = vst.msk [vmem:[#allocation3 + $0x28] sm:$0xf] %vm3090_vm0, %v3015_v32 }
 0x2ca   : > { %3743 = vst.msk [vmem:[#allocation3 + $0x28] sm:$0xf] %vm3732_vm2, %v3657_v62  ;;  %v4697_v25 = vpop.permute.xlu1 %4696 }
 0x2cc   : > { %v3047_v16 = vpop.permute.xlu0 %3046 }
 0x2cd   : > { %3117 = vst.msk [vmem:[#allocation3 + $0x68] sm:$0xf] %vm3090_vm0, %v3047_v16 }
 0x2ce   : > { %3759 = vst.msk [vmem:[#allocation3 + $0x68] sm:$0xf] %vm3732_vm2, %v3689_v39  ;;  %v4729_v22 = vpop.permute.xlu1 %4728 }
 0x2d0   : > { %v4695_v10 = vpop.permute.xlu0 %4694 }
 0x2d2   : > { %v3013_v1 = vpop.permute.xlu1 %3012 }
 0x2d3   : > { %3100 = vst.msk [vmem:[#allocation3 + $0x24] sm:$0xf] %vm3090_vm0, %v3013_v1 }
 0x2d4   : > { %v4727_v15 = vpop.permute.xlu0 %4726  ;;  %3742 = vst.msk [vmem:[#allocation3 + $0x24] sm:$0xf] %vm3732_vm2, %v3655_v49 }
 0x2d5   : > { %4784 = vst.msk [vmem:[#allocation3 + $0x24] sm:$0xf] %vm4774_vm3, %v4697_v25 }
 0x2d6   : > { %5345 = vst.msk [vmem:[#allocation3 + $0x24] sm:$0xf] %vm5335_vm4, %v11056_v9  ;;  %v3045_v8 = vpop.permute.xlu1 %3044 }
 0x2d7   : > { %3116 = vst.msk [vmem:[#allocation3 + $0x64] sm:$0xf] %vm3090_vm0, %v3045_v8 }
 0x2d8   : > { %v3011_v59 = vpop.permute.xlu0 %3010  ;;  %3758 = vst.msk [vmem:[#allocation3 + $0x64] sm:$0xf] %vm3732_vm2, %v3687_v27  ;;  %v7277_v27 = vld [vmem:[#allocation3 + $0x48] sm:$0xff]  }
 0x2d9   : > { %3099 = vst.msk [vmem:[#allocation3 + $0x20] sm:$0xf] %vm3090_vm0, %v3011_v59 }
 0x2da   : > { %4800 = vst.msk [vmem:[#allocation3 + $0x64] sm:$0xf] %vm4774_vm3, %v4729_v22  ;;  %v4693_v0 = vpop.permute.xlu1 %4692 }
 0x2db   : > { %3741 = vst.msk [vmem:[#allocation3 + $0x20] sm:$0xf] %vm3732_vm2, %v3653_v53  ;;  %v7278_v53 = vld [vmem:[#allocation3 + $0x50] sm:$0xff]  }
 0x2dc   : > { %4783 = vst.msk [vmem:[#allocation3 + $0x20] sm:$0xf] %vm4774_vm3, %v4695_v10  ;;  %4782 = vst.msk [vmem:[#allocation3 + $0x1c] sm:$0xf] %vm4774_vm3, %v4693_v0  ;;  %v3043_v54 = vpop.permute.xlu0 %3042 }
 0x2dd   : > { %5344 = vst.msk [vmem:[#allocation3 + $0x20] sm:$0xf] %vm5335_vm4, %v11057_v24  ;;  %5343 = vst.msk [vmem:[#allocation3 + $0x1c] sm:$0xf] %vm5335_vm4, %v11058_v4  ;;  %v10385_v4 = vld [vmem:[%s10566_s4] ss:$0 sm:$0xff] }
 0x2de   : > { %3115 = vst.msk [vmem:[#allocation3 + $0x60] sm:$0xf] %vm3090_vm0, %v3043_v54  ;;  %v3667_v56 = vpop.permute.xlu1 %3666 }
 0x2df   : > { %3757 = vst.msk [vmem:[#allocation3 + $0x60] sm:$0xf] %vm3732_vm2, %v3685_v40 }
 0x2e0   : > { %4799 = vst.msk [vmem:[#allocation3 + $0x60] sm:$0xf] %vm4774_vm3, %v4727_v15 }
 0x2e3   : > { %v4691_v18 = vpop.permute.xlu0 %4690 }
 0x2e4   : > { %4781 = vst.msk [vmem:[#allocation3 + $0x18] sm:$0xf] %vm4774_vm3, %v4691_v18  ;;  %v7272_v2 = vld [vmem:[#allocation3 + $0x20] sm:$0xff]  }
 0x2e5   : > { %5342 = vst.msk [vmem:[#allocation3 + $0x18] sm:$0xf] %vm5335_vm4, %v11059_v23 }
 0x2e7   : > { %v4725_v60 = vpop.permute.xlu1 %4724  ;;  %v3665_v36 = vpop.permute.xlu0 %3664 }
 0x2e8   : > { %4798 = vst.msk [vmem:[#allocation3 + $0x5c] sm:$0xf] %vm4774_vm3, %v4725_v60 }
 0x2e9   : > { %5359 = vst.msk [vmem:[#allocation3 + $0x5c] sm:$0xf] %vm5335_vm4, %v11060_v46 }
 0x2eb   : > { %v3663_v30 = vpop.permute.xlu1 %3662 }
 0x2ec   : > { %v7271_v12 = vld [vmem:[#allocation3 + $0x18] sm:$0xff]  }
 0x2ed   : > { %7027 = vmatmul.mubr.msk.bf16.gmra.mxu1 %vm5507_vm6, %v7271_v12 }
 0x2ee   : > { %v4723_v43 = vpop.permute.xlu0 %4722  ;;  %7030 = vmatprep.mubr.msk.bf16.mxu1 %vm5507_vm6, %v7272_v2 }
 0x2ef   : > { %4797 = vst.msk [vmem:[#allocation3 + $0x58] sm:$0xf] %vm4774_vm3, %v4723_v43 }
 0x2f0   : > { %5358 = vst.msk [vmem:[#allocation3 + $0x58] sm:$0xf] %vm5335_vm4, %v11061_v42  ;;  %v3025_v17 = vpop.permute.xlu1 %3024 }
 0x2f1   : > { %3106 = vst.msk [vmem:[#allocation3 + $0x3c] sm:$0xf] %vm3090_vm0, %v3025_v17 }
 0x2f2   : > { %v3661_v37 = vpop.permute.xlu0 %3660  ;;  %3748 = vst.msk [vmem:[#allocation3 + $0x3c] sm:$0xf] %vm3732_vm2, %v3667_v56 }
 0x2f3   : > { %4790 = vst.msk [vmem:[#allocation3 + $0x3c] sm:$0xf] %vm4774_vm3, %v9867_v45  ;;  %v11064_v45 = vld [vmem:[#allocation74_spill] sm:$0xff] }
 0x2f4   : > { %5351 = vst.msk [vmem:[#allocation3 + $0x3c] sm:$0xf] %vm5335_vm4, %v11062_v52 }
 0x2f6   : > { %v4705_v29 = vpop.permute.xlu1 %4704 }
 0x2f7   : > { %v7279_v25 = vld [vmem:[#allocation3 + $0x58] sm:$0xff]  }
 0x2f8   : > { %v3023_v58 = vpop.permute.xlu0 %3022 }
 0x2f9   : > { %3105 = vst.msk [vmem:[#allocation3 + $0x38] sm:$0xf] %vm3090_vm0, %v3023_v58 }
 0x2fa   : > { %3747 = vst.msk [vmem:[#allocation3 + $0x38] sm:$0xf] %vm3732_vm2, %v3665_v36  ;;  %v3021_v21 = vpop.permute.xlu1 %3020 }
 0x2fb   : > { %4789 = vst.msk [vmem:[#allocation3 + $0x38] sm:$0xf] %vm4774_vm3, %v10015_v47 }
 0x2fc   : > { %5350 = vst.msk [vmem:[#allocation3 + $0x38] sm:$0xf] %vm5335_vm4, %v11063_v41 }
 0x2fd   : > { %3104 = vst.msk [vmem:[#allocation3 + $0x34] sm:$0xf] %vm3090_vm0, %v3021_v21 }
 0x2fe   : > { %v4703_v50 = vpop.permute.xlu0 %4702  ;;  %3746 = vst.msk [vmem:[#allocation3 + $0x34] sm:$0xf] %vm3732_vm2, %v3663_v30 }
 0x2ff   : > { %4788 = vst.msk [vmem:[#allocation3 + $0x34] sm:$0xf] %vm4774_vm3, %v4705_v29 }
 0x300   : > { %5349 = vst.msk [vmem:[#allocation3 + $0x34] sm:$0xf] %vm5335_vm4, %v11064_v45  ;;  %v4701_v57 = vpop.permute.xlu1 %4700 }
 0x301   : > { %4786 = vst.msk [vmem:[#allocation3 + $0x2c] sm:$0xf] %vm4774_vm3, %v4701_v57 }
 0x302   : > { %v3019_v3 = vpop.permute.xlu0 %3018  ;;  %5347 = vst.msk [vmem:[#allocation3 + $0x2c] sm:$0xf] %vm5335_vm4, %v11065_v31 }
 0x303   : > { %3103 = vst.msk [vmem:[#allocation3 + $0x30] sm:$0xf] %vm3090_vm0, %v3019_v3  ;;  %v7275_v19 = vld [vmem:[#allocation3 + $0x38] sm:$0xff]  }
 0x304   : > { %3745 = vst.msk [vmem:[#allocation3 + $0x30] sm:$0xf] %vm3732_vm2, %v3661_v37 }
 0x305   : > { %4787 = vst.msk [vmem:[#allocation3 + $0x30] sm:$0xf] %vm4774_vm3, %v4703_v50  ;;  %v5290_v47 = vpop.permute.xlu1 %5289 }
 0x306   : > { %5348 = vst.msk [vmem:[#allocation3 + $0x30] sm:$0xf] %vm5335_vm4, %v11066_v35  ;;  %5361 = vst.msk [vmem:[#allocation3 + $0x64] sm:$0xf] %vm5335_vm4, %v5290_v47  ;;  %v4699_v26 = vpop.permute.xlu0 %4698 }
 0x307   : > { %4785 = vst.msk [vmem:[#allocation3 + $0x28] sm:$0xf] %vm4774_vm3, %v4699_v26 }
 0x308   : > { %5346 = vst.msk [vmem:[#allocation3 + $0x28] sm:$0xf] %vm5335_vm4, %v11067_v5 }
 0x309   : > { %v5294_v13 = vpop.permute.xlu1 %5293 }
 0x30a   : > { %v5288_v7 = vpop.permute.xlu0 %5287 }
 0x30b   : > { %5360 = vst.msk [vmem:[#allocation3 + $0x60] sm:$0xf] %vm5335_vm4, %v5288_v7 }
 0x30d   : > { %v4733_v48 = vpop.permute.xlu1 %4732  ;;  %v7274_v14 = vld [vmem:[#allocation3 + $0x30] sm:$0xff]  }
 0x30e   : > { %4802 = vst.msk [vmem:[#allocation3 + $0x6c] sm:$0xf] %vm4774_vm3, %v4733_v48  ;;  %v5292_v34 = vpop.permute.xlu0 %5291 }
 0x30f   : > { %5363 = vst.msk [vmem:[#allocation3 + $0x6c] sm:$0xf] %vm5335_vm4, %v5294_v13  ;;  %v7273_v33 = vld [vmem:[#allocation3 + $0x28] sm:$0xff]  }
 0x310   : > { %7031 = vmatmul.mubr.msk.bf16.gmra.mxu1 %vm5507_vm6, %v7273_v33 }
 0x311   : > { %v3053_v20 = vpop.permute.xlu1 %3052  ;;  %7034 = vmatprep.mubr.msk.bf16.mxu1 %vm5507_vm6, %v7274_v14 }
 0x312   : > { %3120 = vst.msk [vmem:[#allocation3 + $0x74] sm:$0xf] %vm3090_vm0, %v3053_v20  ;;  %v4731_v28 = vpop.permute.xlu0 %4730  ;;  %v7280_v16 = vld [vmem:[#allocation3 + $0x60] sm:$0xff]  }
 0x313   : > { %4801 = vst.msk [vmem:[#allocation3 + $0x68] sm:$0xf] %vm4774_vm3, %v4731_v28 }
 0x314   : > { %5362 = vst.msk [vmem:[#allocation3 + $0x68] sm:$0xf] %vm5335_vm4, %v5292_v34 }
 0x315   : > { %v3057_v62 = vpop.permute.xlu1 %3056 }
 0x316   : > { %3122 = vst.msk [vmem:[#allocation3 + $0x7c] sm:$0xf] %vm3090_vm0, %v3057_v62  ;;  %v3051_v44 = vpop.permute.xlu0 %3050 }
 0x317   : > { %3119 = vst.msk [vmem:[#allocation3 + $0x70] sm:$0xf] %vm3090_vm0, %v3051_v44 }
 0x318   : > { %7035 = vmatmul.mubr.msk.bf16.gmra.mxu1 %vm5507_vm6, %v7275_v19 }
 0x319   : > { %v3695_v49 = vpop.permute.xlu1 %3694  ;;  %7038 = vmatprep.mubr.msk.bf16.mxu1 %vm5507_vm6, %v7276_v63 }
 0x31a   : > { %3762 = vst.msk [vmem:[#allocation3 + $0x74] sm:$0xf] %vm3732_vm2, %v3695_v49  ;;  %v3055_v51 = vpop.permute.xlu0 %3054 }
 0x31b   : > { %3121 = vst.msk [vmem:[#allocation3 + $0x78] sm:$0xf] %vm3090_vm0, %v3055_v51  ;;  %v7281_v9 = vld [vmem:[#allocation3 + $0x68] sm:$0xff]  }
 0x31d   : > { %v3699_v6 = vpop.permute.xlu1 %3698 }
 0x31e   : > { %3764 = vst.msk [vmem:[#allocation3 + $0x7c] sm:$0xf] %vm3732_vm2, %v3699_v6  ;;  %v3693_v39 = vpop.permute.xlu0 %3692 }
 0x31f   : > { %3761 = vst.msk [vmem:[#allocation3 + $0x70] sm:$0xf] %vm3732_vm2, %v3693_v39 }
 0x320   : > { %7039 = vmatmul.mubr.msk.bf16.gmra.mxu1 %vm5507_vm6, %v7277_v27 }
 0x321   : > { %v4737_v61 = vpop.permute.xlu1 %4736  ;;  %7042 = vmatprep.mubr.msk.bf16.mxu1 %vm5507_vm6, %v7278_v53 }
 0x322   : > { %4804 = vst.msk [vmem:[#allocation3 + $0x74] sm:$0xf] %vm4774_vm3, %v4737_v61  ;;  %v3697_v40 = vpop.permute.xlu0 %3696 }
 0x323   : > { %3763 = vst.msk [vmem:[#allocation3 + $0x78] sm:$0xf] %vm3732_vm2, %v3697_v40 }
 0x325   : > { %v4741_v55 = vpop.permute.xlu1 %4740 }
 0x326   : > { %4806 = vst.msk [vmem:[#allocation3 + $0x7c] sm:$0xf] %vm4774_vm3, %v4741_v55  ;;  %v4735_v32 = vpop.permute.xlu0 %4734 }
 0x327   : > { %4803 = vst.msk [vmem:[#allocation3 + $0x70] sm:$0xf] %vm4774_vm3, %v4735_v32 }
 0x328   : > { %7043 = vmatmul.mubr.msk.bf16.gmra.mxu1 %vm5507_vm6, %v7279_v25 }
 0x329   : > { %v5298_v22 = vpop.permute.xlu1 %5297  ;;  %7046 = vmatprep.mubr.msk.bf16.mxu1 %vm5507_vm6, %v7280_v16 }
 0x32a   : > { %5365 = vst.msk [vmem:[#allocation3 + $0x74] sm:$0xf] %vm5335_vm4, %v5298_v22  ;;  %v4739_v10 = vpop.permute.xlu0 %4738 }
 0x32b   : > { %4805 = vst.msk [vmem:[#allocation3 + $0x78] sm:$0xf] %vm4774_vm3, %v4739_v10 }
 0x32d   : > { %v5302_v1 = vpop.permute.xlu1 %5301 }
 0x32e   : > { %v5296_v15 = vpop.permute.xlu0 %5295  ;;  %5367 = vst.msk [vmem:[#allocation3 + $0x7c] sm:$0xf] %vm5335_vm4, %v5302_v1 }
 0x32f   : > { %5364 = vst.msk [vmem:[#allocation3 + $0x70] sm:$0xf] %vm5335_vm4, %v5296_v15 }
 0x330   : > { %7047 = vmatmul.mubr.msk.bf16.gmra.mxu1 %vm5507_vm6, %v7281_v9 }
 0x332   : > { %v5300_v8 = vpop.permute.xlu0 %5299 }
 0x333   : > { %5366 = vst.msk [vmem:[#allocation3 + $0x78] sm:$0xf] %vm5335_vm4, %v5300_v8 }
 0x336   : > { %v7282_v59 = vld [vmem:[#allocation3 + $0x70] sm:$0xff]  }
 0x337   : > { %7050 = vmatprep.mubr.msk.bf16.mxu1 %vm5507_vm6, %v7282_v59 }
 0x33a   : > { %v7283_v0 = vld [vmem:[#allocation3 + $0x78] sm:$0xff]  }
 0x33b   : > { %7051 = vmatmul.mubr.msk.bf16.gmra.mxu1 %vm5507_vm6, %v7283_v0 }
 0x37a   : > { %v7024_v24 = vpop.f32.mrf.mxu1 }
 0x37b   : > { %v5603_v60 = vadd.f32 %v7024_v24, %v10385_v4 }
 0x37c   : > { %v5594_v54 = vpop.f32.mrf.mxu1 }
 0x37d   : > { %v5595_v18 = vadd.f32 %v10385_v4, %v5594_v54  ;;  %v5723_v42 = vmax.f32 %v5603_v60, 0.0 }
 0x37e   : > { %v7025_v56 = vpop.f32.mrf.mxu1 }
 0x37f   : > { %v5606_v23 = vadd.f32 %v7025_v56, %v10385_v4  ;;  %v5721_v43 = vmax.f32 %v5595_v18, 0.0 }
 0x380   : > { %v5597_v36 = vpop.f32.mrf.mxu1 }
 0x381   : > { %v5598_v46 = vadd.f32 %v10385_v4, %v5597_v36  ;;  %v5724_v30 = vmax.f32 %v5606_v23, 0.0 }
 0x383   : > { %v5722_v12 = vmax.f32 %v5598_v46, 0.0  ;;  %v5754_v17 = vpack.c.bf16 %v5724_v30, %v5723_v42 }
 0x385   : > { %v5753_v2 = vpack.c.bf16 %v5722_v12, %v5721_v43 }
 0x387   : > { %7056 = vmatprep.mubr.msk.bf16.mxu0 %vm1290_vm13, %v5753_v2 }
 0x388   : > { %7057 = vmatmul.mubr.msk.bf16.vlgmr.msra.gmra.mxu0 %vm1290_vm13, %v5754_v17 }
 0x3ad   : > { %v7028_v37 = vpop.f32.mrf.mxu1 }
 0x3ae   : > { %v5619_v41 = vadd.f32 %v7028_v37, %v10385_v4 }
 0x3af   : > { %v5610_v52 = vpop.f32.mrf.mxu1 }
 0x3b0   : > { %v5611_v58 = vadd.f32 %v10385_v4, %v5610_v52  ;;  %v5727_v47 = vmax.f32 %v5619_v41, 0.0 }
 0x3b1   : > { %v7029_v29 = vpop.f32.mrf.mxu1 }
 0x3b2   : > { %v5622_v21 = vadd.f32 %v7029_v29, %v10385_v4  ;;  %v5725_v3 = vmax.f32 %v5611_v58, 0.0 }
 0x3b3   : > { %v5613_v50 = vpop.f32.mrf.mxu1 }
 0x3b4   : > { %v5614_v45 = vadd.f32 %v10385_v4, %v5613_v50  ;;  %v5728_v57 = vmax.f32 %v5622_v21, 0.0 }
 0x3b6   : > { %v5726_v31 = vmax.f32 %v5614_v45, 0.0  ;;  %v5756_v26 = vpack.c.bf16 %v5728_v57, %v5727_v47 }
 0x3b8   : > { %v5755_v35 = vpack.c.bf16 %v5726_v31, %v5725_v3 }
 0x3ba   : > { %7060 = vmatprep.mubr.msk.bf16.mxu0 %vm1290_vm13, %v5755_v35 }
 0x3bb   : > { %7061 = vmatmul.mubr.msk.bf16.gmra.mxu0 %vm1290_vm13, %v5756_v26 }
 0x3d0   : > { %v7032_v5 = vpop.f32.mrf.mxu1 }
 0x3d1   : > { %v5635_v48 = vadd.f32 %v7032_v5, %v10385_v4 }
 0x3d2   : > { %v5626_v13 = vpop.f32.mrf.mxu1 }
 0x3d3   : > { %v5627_v11 = vadd.f32 %v10385_v4, %v5626_v13  ;;  %v5731_v44 = vmax.f32 %v5635_v48, 0.0 }
 0x3d4   : > { %v7033_v7 = vpop.f32.mrf.mxu1 }
 0x3d5   : > { %v5638_v38 = vadd.f32 %v7033_v7, %v10385_v4  ;;  %v5729_v28 = vmax.f32 %v5627_v11, 0.0 }
 0x3d6   : > { %v5629_v34 = vpop.f32.mrf.mxu1 }
 0x3d7   : > { %v5630_v33 = vadd.f32 %v10385_v4, %v5629_v34  ;;  %v5732_v14 = vmax.f32 %v5638_v38, 0.0 }
 0x3d8   : > { %v7036_v20 = vpop.f32.mrf.mxu1 }
 0x3d9   : > { %v5730_v62 = vmax.f32 %v5630_v33, 0.0  ;;  %v5758_v49 = vpack.c.bf16 %v5732_v14, %v5731_v44  ;;  %v5651_v27 = vadd.f32 %v7036_v20, %v10385_v4 }
 0x3da   : > { %v5642_v19 = vpop.f32.mrf.mxu1 }
 0x3db   : > { %v5757_v63 = vpack.c.bf16 %v5730_v62, %v5729_v28  ;;  %v5643_v6 = vadd.f32 %v10385_v4, %v5642_v19  ;;  %v5735_v16 = vmax.f32 %v5651_v27, 0.0 }
 0x3dc   : > { %v7037_v51 = vpop.f32.mrf.mxu1 }
 0x3dd   : > { %v5654_v39 = vadd.f32 %v7037_v51, %v10385_v4  ;;  %7064 = vmatprep.mubr.msk.bf16.mxu0 %vm1290_vm13, %v5757_v63  ;;  %v5733_v32 = vmax.f32 %v5643_v6, 0.0 }
 0x3de   : > { %v5645_v53 = vpop.f32.mrf.mxu1  ;;  %7065 = vmatmul.mubr.msk.bf16.gmra.mxu0 %vm1290_vm13, %v5758_v49 }
 0x3df   : > { %v5646_v61 = vadd.f32 %v10385_v4, %v5645_v53  ;;  %v5736_v40 = vmax.f32 %v5654_v39, 0.0 }
 0x3e0   : > { %v7040_v55 = vpop.f32.mrf.mxu1 }
 0x3e1   : > { %v5734_v25 = vmax.f32 %v5646_v61, 0.0  ;;  %v5760_v1 = vpack.c.bf16 %v5736_v40, %v5735_v16  ;;  %v5667_v59 = vadd.f32 %v7040_v55, %v10385_v4  ;;  %v10438_v61 = vld [vmem:[%s10568_s6] ss:$0 sm:$0xff]  ;;  %v7381_v40 = vld [vmem:[%s7470_s8 + $0x8] sm:$0xff]  }
 0x3e2   : > { %v5658_v22 = vpop.f32.mrf.mxu1  ;;  %v5991_v55 = vunpack.c.l.bf16 %v7381_v40 }
 0x3e3   : > { %v5759_v10 = vpack.c.bf16 %v5734_v25, %v5733_v32  ;;  %v5659_v9 = vadd.f32 %v10385_v4, %v5658_v22  ;;  %v5739_v60 = vmax.f32 %v5667_v59, 0.0 }
 0x3e4   : > { %v7041_v15 = vpop.f32.mrf.mxu1 }
 0x3e5   : > { %v5670_v8 = vadd.f32 %v7041_v15, %v10385_v4  ;;  %7068 = vmatprep.mubr.msk.bf16.mxu0 %vm1290_vm13, %v5759_v10  ;;  %v5737_v18 = vmax.f32 %v5659_v9, 0.0  ;;  %v5992_v15 = vunpack.c.h.bf16 %v7381_v40 }
 0x3e6   : > { %v5661_v0 = vpop.f32.mrf.mxu1  ;;  %7069 = vmatmul.mubr.msk.bf16.gmra.mxu0 %vm1290_vm13, %v5760_v1 }
 0x3e7   : > { %v5662_v24 = vadd.f32 %v10385_v4, %v5661_v0  ;;  %v5740_v54 = vmax.f32 %v5670_v8, 0.0 }
 0x3e8   : > { %v7044_v56 = vpop.f32.mrf.mxu1 }
 0x3e9   : > { %v5738_v23 = vmax.f32 %v5662_v24, 0.0  ;;  %v5762_v30 = vpack.c.bf16 %v5740_v54, %v5739_v60  ;;  %v5683_v2 = vadd.f32 %v7044_v56, %v10385_v4 }
 0x3ea   : > { %v5674_v36 = vpop.f32.mrf.mxu1 }
 0x3eb   : > { %v5761_v46 = vpack.c.bf16 %v5738_v23, %v5737_v18  ;;  %v5675_v12 = vadd.f32 %v10385_v4, %v5674_v36  ;;  %v5743_v41 = vmax.f32 %v5683_v2, 0.0  ;;  %v7383_v2 = vld [vmem:[%s7470_s8 + $0x18] sm:$0xff]  }
 0x3ec   : > { %v7045_v43 = vpop.f32.mrf.mxu1 }
 0x3ed   : > { %v5686_v42 = vadd.f32 %v7045_v43, %v10385_v4  ;;  %7072 = vmatprep.mubr.msk.bf16.mxu0 %vm1290_vm13, %v5761_v46  ;;  %v5741_v58 = vmax.f32 %v5675_v12, 0.0 }
 0x3ee   : > { %v5677_v17 = vpop.f32.mrf.mxu1  ;;  %7073 = vmatmul.mubr.msk.bf16.gmra.mxu0 %vm1290_vm13, %v5762_v30 }
 0x3ef   : > { %v5678_v37 = vadd.f32 %v10385_v4, %v5677_v17  ;;  %v5744_v52 = vmax.f32 %v5686_v42, 0.0  ;;  %v5995_v17 = vunpack.c.l.bf16 %v7383_v2 }
 0x3f0   : > { %v7048_v29 = vpop.f32.mrf.mxu1 }
 0x3f1   : > { %v5742_v21 = vmax.f32 %v5678_v37, 0.0  ;;  %v5764_v57 = vpack.c.bf16 %v5744_v52, %v5743_v41  ;;  %v5699_v35 = vadd.f32 %v7048_v29, %v10385_v4  ;;  %v7384_v29 = vld [vmem:[%s7470_s8 + $0x10] sm:$0xff]  }
 0x3f2   : > { %v5690_v50 = vpop.f32.mrf.mxu1 }
 0x3f3   : > { %v5763_v45 = vpack.c.bf16 %v5742_v21, %v5741_v58  ;;  %v5691_v31 = vadd.f32 %v10385_v4, %v5690_v50  ;;  %v5747_v38 = vmax.f32 %v5699_v35, 0.0  ;;  %v5993_v58 = vunpack.c.l.bf16 %v7384_v29 }
 0x3f4   : > { %v7049_v3 = vpop.f32.mrf.mxu1  ;;  %v5994_v35 = vunpack.c.h.bf16 %v7384_v29 }
 0x3f5   : > { %v5702_v47 = vadd.f32 %v7049_v3, %v10385_v4  ;;  %7076 = vmatprep.mubr.msk.bf16.mxu0 %vm1290_vm13, %v5763_v45  ;;  %v5745_v7 = vmax.f32 %v5691_v31, 0.0  ;;  %v5996_v45 = vunpack.c.h.bf16 %v7383_v2 }
 0x3f6   : > { %v5693_v26 = vpop.f32.mrf.mxu1  ;;  %7077 = vmatmul.mubr.msk.bf16.gmra.mxu0 %vm1290_vm13, %v5764_v57 }
 0x3f7   : > { %v5694_v5 = vadd.f32 %v10385_v4, %v5693_v26  ;;  %v5748_v13 = vmax.f32 %v5702_v47, 0.0 }
 0x3f9   : > { %v5746_v11 = vmax.f32 %v5694_v5, 0.0  ;;  %v5766_v33 = vpack.c.bf16 %v5748_v13, %v5747_v38 }
 0x3fb   : > { %v5765_v48 = vpack.c.bf16 %v5746_v11, %v5745_v7  ;;  %v7052_v34 = vpop.f32.mrf.mxu1 }
 0x3fc   : > { %v5715_v44 = vadd.f32 %v7052_v34, %v10385_v4 }
 0x3fd   : > { %v5706_v14 = vpop.f32.mrf.mxu1  ;;  %7080 = vmatprep.mubr.msk.bf16.mxu0 %vm1290_vm13, %v5765_v48 }
 0x3fe   : > { %7081 = vmatmul.mubr.msk.bf16.gmra.mxu0 %vm1290_vm13, %v5766_v33  ;;  %v5707_v28 = vadd.f32 %v10385_v4, %v5706_v14  ;;  %v5751_v39 = vmax.f32 %v5715_v44, 0.0 }
 0x3ff   : > { %v7053_v20 = vpop.f32.mrf.mxu1 }
 0x400   : > { %v5718_v62 = vadd.f32 %v7053_v20, %v10385_v4  ;;  %v5749_v51 = vmax.f32 %v5707_v28, 0.0  ;;  %v7385_v28 = vld [vmem:[%s7470_s8 + $0x28] sm:$0xff]  }
 0x401   : > { %v5709_v19 = vpop.f32.mrf.mxu1 }
 0x402   : > { %v5710_v63 = vadd.f32 %v10385_v4, %v5709_v19  ;;  %v5752_v49 = vmax.f32 %v5718_v62, 0.0  ;;  %v7382_v4 = vld [vmem:[%s7470_s8] sm:$0xff]   ;;  %v5999_v62 = vunpack.c.l.bf16 %v7385_v28 }
 0x403   : > { %v5989_v25 = vunpack.c.l.bf16 %v7382_v4  ;;  %v5990_v8 = vunpack.c.h.bf16 %v7382_v4 }
 0x404   : > { %v5750_v6 = vmax.f32 %v5710_v63, 0.0  ;;  %v5768_v53 = vpack.c.bf16 %v5752_v49, %v5751_v39  ;;  %v7386_v63 = vld [vmem:[%s7470_s8 + $0x20] sm:$0xff]  }
 0x405   : > { %v5997_v49 = vunpack.c.l.bf16 %v7386_v63  ;;  %v5998_v4 = vunpack.c.h.bf16 %v7386_v63 }
 0x406   : > { %v5767_v27 = vpack.c.bf16 %v5750_v6, %v5749_v51 }
 0x408   : > { %7084 = vmatprep.mubr.msk.bf16.mxu0 %vm1290_vm13, %v5767_v27  ;;  %v6000_v27 = vunpack.c.h.bf16 %v7385_v28 }
 0x409   : > { %7085 = vmatmul.mubr.msk.bf16.gmra.mxu0 %vm1290_vm13, %v5768_v53 }
 0x448   : > { %v7058_v32 = vpop.f32.mrf.mxu0 }
 0x449   : > { %v5871_v16 = vadd.f32 %v7058_v32, %v10438_v61 }
 0x44a   : > { %v5862_v22 = vpop.f32.mrf.mxu0 }
 0x44b   : > { %v6023_v10 = vadd.f32 %v5991_v55, %v5871_v16  ;;  %v5863_v1 = vadd.f32 %v10438_v61, %v5862_v22  ;;  %v7387_v16 = vld [vmem:[%s7470_s8 + $0x38] sm:$0xff]  }
 0x44c   : > { %v7059_v9 = vpop.f32.mrf.mxu0  ;;  %v6003_v22 = vunpack.c.l.bf16 %v7387_v16 }
 0x44d   : > { %v6055_v59 = vmax.f32 %v6023_v10, 0.0  ;;  %v6021_v0 = vadd.f32 %v5989_v25, %v5863_v1  ;;  %v5874_v24 = vadd.f32 %v7059_v9, %v10438_v61 }
 0x44e   : > { %v5865_v54 = vpop.f32.mrf.mxu0 }
 0x44f   : > { %v6899_v56 = vpack.c.bf16 %v6055_v59, %v6055_v59  ;;  %v6053_v18 = vmax.f32 %v6021_v0, 0.0  ;;  %v6024_v23 = vadd.f32 %v5992_v15, %v5874_v24  ;;  %v5866_v60 = vadd.f32 %v10438_v61, %v5865_v54  ;;  %v7388_v59 = vld [vmem:[%s7470_s8 + $0x30] sm:$0xff]  }
 0x450   : > { %v6001_v0 = vunpack.c.l.bf16 %v7388_v59 }
 0x451   : > { %6216 = vst.msk [vmem:[%s10450_s13 + $0x8] sm:$0xf] %vm6213_vm7, %v6899_v56  ;;  %v6897_v36 = vpack.c.bf16 %v6053_v18, %v6053_v18  ;;  %v6056_v46 = vmax.f32 %v6024_v23, 0.0  ;;  %v6022_v30 = vadd.f32 %v5990_v8, %v5866_v60  ;;  %v6004_v60 = vunpack.c.h.bf16 %v7387_v16 }
 0x453   : > { %6214 = vst.msk [vmem:[%s10450_s13] sm:$0xf] %vm6213_vm7, %v6897_v36  ;;  %v6900_v43 = vpack.c.bf16 %v6056_v46, %v6056_v46  ;;  %v6054_v12 = vmax.f32 %v6022_v30, 0.0 }
 0x455   : > { %6217 = vst.msk [vmem:[%s10450_s13 + $0xc] sm:$0xf] %vm6213_vm7, %v6900_v43  ;;  %v6898_v42 = vpack.c.bf16 %v6054_v12, %v6054_v12 }
 0x457   : > { %6215 = vst.msk [vmem:[%s10450_s13 + $0x4] sm:$0xf] %vm6213_vm7, %v6898_v42  ;;  %v6002_v42 = vunpack.c.h.bf16 %v7388_v59 }
 0x47b   : > { %v7062_v37 = vpop.f32.mrf.mxu0 }
 0x47c   : > { %v5887_v52 = vadd.f32 %v7062_v37, %v10438_v61 }
 0x47d   : > { %v5878_v21 = vpop.f32.mrf.mxu0 }
 0x47e   : > { %v6027_v41 = vadd.f32 %v5995_v17, %v5887_v52  ;;  %v5879_v50 = vadd.f32 %v10438_v61, %v5878_v21 }
 0x47f   : > { %v7063_v57 = vpop.f32.mrf.mxu0 }
 0x480   : > { %v6059_v3 = vmax.f32 %v6027_v41, 0.0  ;;  %v6025_v31 = vadd.f32 %v5993_v58, %v5879_v50  ;;  %v5890_v47 = vadd.f32 %v7063_v57, %v10438_v61  ;;  %v7389_v58 = vld [vmem:[%s7470_s8 + $0x48] sm:$0xff]  }
 0x481   : > { %v5881_v26 = vpop.f32.mrf.mxu0  ;;  %v6007_v21 = vunpack.c.l.bf16 %v7389_v58 }
 0x482   : > { %v6903_v5 = vpack.c.bf16 %v6059_v3, %v6059_v3  ;;  %v6057_v13 = vmax.f32 %v6025_v31, 0.0  ;;  %v6028_v7 = vadd.f32 %v5996_v45, %v5890_v47  ;;  %v5882_v11 = vadd.f32 %v10438_v61, %v5881_v26  ;;  %v7390_v3 = vld [vmem:[%s7470_s8 + $0x40] sm:$0xff]  }
 0x483   : > { %v6005_v31 = vunpack.c.l.bf16 %v7390_v3 }
 0x484   : > { %6220 = vst.msk [vmem:[%s10450_s13 + $0x18] sm:$0xf] %vm6213_vm7, %v6903_v5  ;;  %v6901_v38 = vpack.c.bf16 %v6057_v13, %v6057_v13  ;;  %v6060_v48 = vmax.f32 %v6028_v7, 0.0  ;;  %v6026_v34 = vadd.f32 %v5994_v35, %v5882_v11  ;;  %v6008_v11 = vunpack.c.h.bf16 %v7389_v58 }
 0x486   : > { %6218 = vst.msk [vmem:[%s10450_s13 + $0x10] sm:$0xf] %vm6213_vm7, %v6901_v38  ;;  %v6904_v33 = vpack.c.bf16 %v6060_v48, %v6060_v48  ;;  %v6058_v14 = vmax.f32 %v6026_v34, 0.0 }
 0x488   : > { %6221 = vst.msk [vmem:[%s10450_s13 + $0x1c] sm:$0xf] %vm6213_vm7, %v6904_v33  ;;  %v6902_v20 = vpack.c.bf16 %v6058_v14, %v6058_v14  ;;  %v6006_v14 = vunpack.c.h.bf16 %v7390_v3 }
 0x48a   : > { %6219 = vst.msk [vmem:[%s10450_s13 + $0x14] sm:$0xf] %vm6213_vm7, %v6902_v20 }
 0x49e   : > { %v7066_v44 = vpop.f32.mrf.mxu0 }
 0x49f   : > { %v5903_v19 = vadd.f32 %v7066_v44, %v10438_v61 }
 0x4a0   : > { %v5894_v51 = vpop.f32.mrf.mxu0 }
 0x4a1   : > { %v6031_v6 = vadd.f32 %v5999_v62, %v5903_v19  ;;  %v5895_v39 = vadd.f32 %v10438_v61, %v5894_v51 }
 0x4a2   : > { %v7067_v53 = vpop.f32.mrf.mxu0 }
 0x4a3   : > { %v6063_v40 = vmax.f32 %v6031_v6, 0.0  ;;  %v6029_v55 = vadd.f32 %v5997_v49, %v5895_v39  ;;  %v5906_v32 = vadd.f32 %v7067_v53, %v10438_v61  ;;  %v7391_v49 = vld [vmem:[%s7470_s8 + $0x58] sm:$0xff]  }
 0x4a4   : > { %v5897_v25 = vpop.f32.mrf.mxu0  ;;  %v6011_v51 = vunpack.c.l.bf16 %v7391_v49 }
 0x4a5   : > { %v6907_v10 = vpack.c.bf16 %v6063_v40, %v6063_v40  ;;  %v6061_v1 = vmax.f32 %v6029_v55, 0.0  ;;  %v6032_v15 = vadd.f32 %v6000_v27, %v5906_v32  ;;  %v5898_v9 = vadd.f32 %v10438_v61, %v5897_v25  ;;  %v7392_v55 = vld [vmem:[%s7470_s8 + $0x50] sm:$0xff]  }
 0x4a6   : > { %v7070_v8 = vpop.f32.mrf.mxu0  ;;  %v6009_v32 = vunpack.c.l.bf16 %v7392_v55 }
 0x4a7   : > { %6224 = vst.msk [vmem:[%s10450_s13 + $0x28] sm:$0xf] %vm6213_vm7, %v6907_v10  ;;  %v6905_v24 = vpack.c.bf16 %v6061_v1, %v6061_v1  ;;  %v6064_v54 = vmax.f32 %v6032_v15, 0.0  ;;  %v6030_v56 = vadd.f32 %v5998_v4, %v5898_v9  ;;  %v5919_v18 = vadd.f32 %v7070_v8, %v10438_v61 }
 0x4a8   : > { %v5910_v23 = vpop.f32.mrf.mxu0  ;;  %v6012_v1 = vunpack.c.h.bf16 %v7391_v49 }
 0x4a9   : > { %6222 = vst.msk [vmem:[%s10450_s13 + $0x20] sm:$0xf] %vm6213_vm7, %v6905_v24  ;;  %v6908_v36 = vpack.c.bf16 %v6064_v54, %v6064_v54  ;;  %v6062_v46 = vmax.f32 %v6030_v56, 0.0  ;;  %v6035_v30 = vadd.f32 %v6003_v22, %v5919_v18  ;;  %v5911_v43 = vadd.f32 %v10438_v61, %v5910_v23 }
 0x4aa   : > { %v7071_v12 = vpop.f32.mrf.mxu0  ;;  %v6010_v24 = vunpack.c.h.bf16 %v7392_v55 }
 0x4ab   : > { %6225 = vst.msk [vmem:[%s10450_s13 + $0x2c] sm:$0xf] %vm6213_vm7, %v6908_v36  ;;  %v6906_v2 = vpack.c.bf16 %v6062_v46, %v6062_v46  ;;  %v6067_v17 = vmax.f32 %v6035_v30, 0.0  ;;  %v6033_v37 = vadd.f32 %v6001_v0, %v5911_v43  ;;  %v5922_v52 = vadd.f32 %v7071_v12, %v10438_v61  ;;  %v7393_v36 = vld [vmem:[%s7470_s8 + $0x68] sm:$0xff]  }
 0x4ac   : > { %v5913_v29 = vpop.f32.mrf.mxu0  ;;  %v6015_v46 = vunpack.c.l.bf16 %v7393_v36 }
 0x4ad   : > { %6223 = vst.msk [vmem:[%s10450_s13 + $0x24] sm:$0xf] %vm6213_vm7, %v6906_v2  ;;  %v6911_v41 = vpack.c.bf16 %v6067_v17, %v6067_v17  ;;  %v6065_v50 = vmax.f32 %v6033_v37, 0.0  ;;  %v6036_v45 = vadd.f32 %v6004_v60, %v5922_v52  ;;  %v5914_v57 = vadd.f32 %v10438_v61, %v5913_v29  ;;  %v7394_v17 = vld [vmem:[%s7470_s8 + $0x60] sm:$0xff]  }
 0x4ae   : > { %v7074_v47 = vpop.f32.mrf.mxu0  ;;  %v6013_v37 = vunpack.c.l.bf16 %v7394_v17 }
 0x4af   : > { %6228 = vst.msk [vmem:[%s10450_s13 + $0x38] sm:$0xf] %vm6213_vm7, %v6911_v41  ;;  %v6909_v35 = vpack.c.bf16 %v6065_v50, %v6065_v50  ;;  %v6068_v26 = vmax.f32 %v6036_v45, 0.0  ;;  %v6034_v5 = vadd.f32 %v6002_v42, %v5914_v57  ;;  %v5935_v13 = vadd.f32 %v7074_v47, %v10438_v61 }
 0x4b0   : > { %v5926_v7 = vpop.f32.mrf.mxu0  ;;  %v6016_v50 = vunpack.c.h.bf16 %v7393_v36 }
 0x4b1   : > { %6226 = vst.msk [vmem:[%s10450_s13 + $0x30] sm:$0xf] %vm6213_vm7, %v6909_v35  ;;  %v6912_v38 = vpack.c.bf16 %v6068_v26, %v6068_v26  ;;  %v6066_v48 = vmax.f32 %v6034_v5, 0.0  ;;  %v6039_v34 = vadd.f32 %v6007_v21, %v5935_v13  ;;  %v5927_v33 = vadd.f32 %v10438_v61, %v5926_v7 }
 0x4b2   : > { %v7075_v20 = vpop.f32.mrf.mxu0  ;;  %v6014_v35 = vunpack.c.h.bf16 %v7394_v17 }
 0x4b3   : > { %6229 = vst.msk [vmem:[%s10450_s13 + $0x3c] sm:$0xf] %vm6213_vm7, %v6912_v38  ;;  %v6910_v28 = vpack.c.bf16 %v6066_v48, %v6066_v48  ;;  %v6071_v62 = vmax.f32 %v6039_v34, 0.0  ;;  %v6037_v44 = vadd.f32 %v6005_v31, %v5927_v33  ;;  %v5938_v19 = vadd.f32 %v7075_v20, %v10438_v61 }
 0x4b4   : > { %v5929_v63 = vpop.f32.mrf.mxu0 }
 0x4b5   : > { %6227 = vst.msk [vmem:[%s10450_s13 + $0x34] sm:$0xf] %vm6213_vm7, %v6910_v28  ;;  %v6915_v6 = vpack.c.bf16 %v6071_v62, %v6071_v62  ;;  %v6069_v39 = vmax.f32 %v6037_v44, 0.0  ;;  %v6040_v27 = vadd.f32 %v6008_v11, %v5938_v19  ;;  %v5930_v53 = vadd.f32 %v10438_v61, %v5929_v63  ;;  %v7395_v62 = vld [vmem:[%s7470_s8 + $0x78] sm:$0xff]  }
 0x4b6   : > { %v7078_v40 = vpop.f32.mrf.mxu0  ;;  %v6019_v44 = vunpack.c.l.bf16 %v7395_v62 }
 0x4b7   : > { %6232 = vst.msk [vmem:[%s10450_s13 + $0x48] sm:$0xf] %vm6213_vm7, %v6915_v6  ;;  %v6913_v4 = vpack.c.bf16 %v6069_v39, %v6069_v39  ;;  %v6072_v25 = vmax.f32 %v6040_v27, 0.0  ;;  %v6038_v16 = vadd.f32 %v6006_v14, %v5930_v53  ;;  %v5951_v22 = vadd.f32 %v7078_v40, %v10438_v61  ;;  %v7396_v6 = vld [vmem:[%s7470_s8 + $0x70] sm:$0xff]  }
 0x4b8   : > { %v5942_v10 = vpop.f32.mrf.mxu0  ;;  %v6017_v39 = vunpack.c.l.bf16 %v7396_v6 }
 0x4b9   : > { %6230 = vst.msk [vmem:[%s10450_s13 + $0x40] sm:$0xf] %vm6213_vm7, %v6913_v4  ;;  %v6916_v15 = vpack.c.bf16 %v6072_v25, %v6072_v25  ;;  %v6070_v9 = vmax.f32 %v6038_v16, 0.0  ;;  %v6043_v8 = vadd.f32 %v6011_v51, %v5951_v22  ;;  %v5943_v59 = vadd.f32 %v10438_v61, %v5942_v10 }
 0x4ba   : > { %v7079_v0 = vpop.f32.mrf.mxu0  ;;  %v6018_v10 = vunpack.c.h.bf16 %v7396_v6 }
 0x4bb   : > { %6233 = vst.msk [vmem:[%s10450_s13 + $0x4c] sm:$0xf] %vm6213_vm7, %v6916_v15  ;;  %v6914_v54 = vpack.c.bf16 %v6070_v9, %v6070_v9  ;;  %v6075_v56 = vmax.f32 %v6043_v8, 0.0  ;;  %v6041_v18 = vadd.f32 %v6009_v32, %v5943_v59  ;;  %v5954_v23 = vadd.f32 %v7079_v0, %v10438_v61 }
 0x4bc   : > { %v5945_v60 = vpop.f32.mrf.mxu0  ;;  %v6020_v32 = vunpack.c.h.bf16 %v7395_v62 }
 0x4bd   : > { %6231 = vst.msk [vmem:[%s10450_s13 + $0x44] sm:$0xf] %vm6213_vm7, %v6914_v54  ;;  %v6919_v30 = vpack.c.bf16 %v6075_v56, %v6075_v56  ;;  %v6073_v43 = vmax.f32 %v6041_v18, 0.0  ;;  %v6044_v12 = vadd.f32 %v6012_v1, %v5954_v23  ;;  %v5946_v42 = vadd.f32 %v10438_v61, %v5945_v60 }
 0x4be   : > { %v7082_v2 = vpop.f32.mrf.mxu0 }
 0x4bf   : > { %6236 = vst.msk [vmem:[%s10450_s13 + $0x58] sm:$0xf] %vm6213_vm7, %v6919_v30  ;;  %v6917_v52 = vpack.c.bf16 %v6073_v43, %v6073_v43  ;;  %v6076_v29 = vmax.f32 %v6044_v12, 0.0  ;;  %v6042_v58 = vadd.f32 %v6010_v24, %v5946_v42  ;;  %v5967_v21 = vadd.f32 %v7082_v2, %v10438_v61 }
 0x4c0   : > { %v5958_v41 = vpop.f32.mrf.mxu0 }
 0x4c1   : > { %6234 = vst.msk [vmem:[%s10450_s13 + $0x50] sm:$0xf] %vm6213_vm7, %v6917_v52  ;;  %v6920_v45 = vpack.c.bf16 %v6076_v29, %v6076_v29  ;;  %v6074_v57 = vmax.f32 %v6042_v58, 0.0  ;;  %v6047_v3 = vadd.f32 %v6015_v46, %v5967_v21  ;;  %v5959_v31 = vadd.f32 %v10438_v61, %v5958_v41 }
 0x4c2   : > { %v7083_v47 = vpop.f32.mrf.mxu0 }
 0x4c3   : > { %6237 = vst.msk [vmem:[%s10450_s13 + $0x5c] sm:$0xf] %vm6213_vm7, %v6920_v45  ;;  %v6918_v26 = vpack.c.bf16 %v6074_v57, %v6074_v57  ;;  %v6079_v5 = vmax.f32 %v6047_v3, 0.0  ;;  %v6045_v13 = vadd.f32 %v6013_v37, %v5959_v31  ;;  %v5970_v7 = vadd.f32 %v7083_v47, %v10438_v61 }
 0x4c4   : > { %v5961_v11 = vpop.f32.mrf.mxu0 }
 0x4c5   : > { %6235 = vst.msk [vmem:[%s10450_s13 + $0x54] sm:$0xf] %vm6213_vm7, %v6918_v26  ;;  %v6923_v38 = vpack.c.bf16 %v6079_v5, %v6079_v5  ;;  %v6077_v48 = vmax.f32 %v6045_v13, 0.0  ;;  %v6048_v34 = vadd.f32 %v6016_v50, %v5970_v7  ;;  %v5962_v33 = vadd.f32 %v10438_v61, %v5961_v11 }
 0x4c7   : > { %6240 = vst.msk [vmem:[%s10450_s13 + $0x68] sm:$0xf] %vm6213_vm7, %v6923_v38  ;;  %v6921_v14 = vpack.c.bf16 %v6077_v48, %v6077_v48  ;;  %v6080_v20 = vmax.f32 %v6048_v34, 0.0  ;;  %v6046_v28 = vadd.f32 %v6014_v35, %v5962_v33 }
 0x4c9   : > { %6238 = vst.msk [vmem:[%s10450_s13 + $0x60] sm:$0xf] %vm6213_vm7, %v6921_v14  ;;  %v6924_v19 = vpack.c.bf16 %v6080_v20, %v6080_v20  ;;  %v6078_v63 = vmax.f32 %v6046_v28, 0.0  ;;  %v7086_v49 = vpop.f32.mrf.mxu0 }
 0x4ca   : > { %v5983_v51 = vadd.f32 %v7086_v49, %v10438_v61 }
 0x4cb   : > { %6241 = vst.msk [vmem:[%s10450_s13 + $0x6c] sm:$0xf] %vm6213_vm7, %v6924_v19  ;;  %v6922_v27 = vpack.c.bf16 %v6078_v63, %v6078_v63  ;;  %v5974_v53 = vpop.f32.mrf.mxu0 }
 0x4cc   : > { %v6051_v40 = vadd.f32 %v6019_v44, %v5983_v51  ;;  %v5975_v55 = vadd.f32 %v10438_v61, %v5974_v53 }
 0x4cd   : > { %6239 = vst.msk [vmem:[%s10450_s13 + $0x64] sm:$0xf] %vm6213_vm7, %v6922_v27  ;;  %v7087_v4 = vpop.f32.mrf.mxu0 }
 0x4ce   : > { %v6083_v25 = vmax.f32 %v6051_v40, 0.0  ;;  %v6049_v16 = vadd.f32 %v6017_v39, %v5975_v55  ;;  %v5986_v22 = vadd.f32 %v7087_v4, %v10438_v61 }
 0x4cf   : > { %v5977_v1 = vpop.f32.mrf.mxu0 }
 0x4d0   : > { %v6927_v15 = vpack.c.bf16 %v6083_v25, %v6083_v25  ;;  %v6081_v9 = vmax.f32 %v6049_v16, 0.0  ;;  %v6052_v8 = vadd.f32 %v6020_v32, %v5986_v22  ;;  %v5978_v59 = vadd.f32 %v10438_v61, %v5977_v1 }
 0x4d2   : > { %6244 = vst.msk [vmem:[%s10450_s13 + $0x78] sm:$0xf] %vm6213_vm7, %v6927_v15  ;;  %v6925_v0 = vpack.c.bf16 %v6081_v9, %v6081_v9  ;;  %v6084_v24 = vmax.f32 %v6052_v8, 0.0  ;;  %v6050_v54 = vadd.f32 %v6018_v10, %v5978_v59 }
 0x4d4   : > { %6242 = vst.msk [vmem:[%s10450_s13 + $0x70] sm:$0xf] %vm6213_vm7, %v6925_v0  ;;  %v6928_v56 = vpack.c.bf16 %v6084_v24, %v6084_v24  ;;  %v6082_v18 = vmax.f32 %v6050_v54, 0.0 }
 0x4d6   : > { %6245 = vst.msk [vmem:[%s10450_s13 + $0x7c] sm:$0xf] %vm6213_vm7, %v6928_v56  ;;  %v6926_v23 = vpack.c.bf16 %v6082_v18, %v6082_v18 }
 0x4d8   : > { %6243 = vst.msk [vmem:[%s10450_s13 + $0x74] sm:$0xf] %vm6213_vm7, %v6926_v23 }
 0x4d9 PF: > { %s17_s24 = sadd.s32 1, %s7403_s24  }
 0x4da   : > { %p14_p4 = scmp.ge.s32.totalorder %s17_s24, 4  }
 0x4dc   :  { %16 = sbr.rel (!%p14_p4) target bundleno = 1 (0x1), region = 81 }

</bundles_post_ra>
